<compile_context>
chip_gen: v7x
topology: tpu7x:2x2x1
jax: 0.10.0
libtpu: 0.0.40
codegen_flags: <defaults>
</compile_context>

<pallas_src>
import functools
import math

import jax
import jax.numpy as jnp
from jax import lax
from jax.experimental import pallas as pl
from jax.experimental.pallas import tpu as pltpu

# bf16 MXU inputs with f32 accumulation; all gate nonlinearities and the cell state stay f32.
MATMUL_DTYPE = jnp.bfloat16


def _round_up(x, m):
    return ((x + m - 1) // m) * m


def _largest_divisor_leq(n, cap):
    for cand in range(min(n, cap), 0, -1):
        if n % cand == 0:
            return cand
    return 1


def _pick_vmem_limit():
    """Per-generation VMEM budget: ~96 MiB on v5e/v6e (128 MiB), ~48 MiB on v7x (64 MiB)."""
    cap = 128 * 1024 * 1024
    try:
        cap = int(getattr(pltpu.get_tpu_info(), "vmem_capacity_bytes", cap))
    except Exception:
        pass
    return min((cap * 3) // 4, 100 * 1024 * 1024)


def _sigmoid(x):
    # sigma(x) = 0.5*(1 + tanh(x/2)): one EUP op per element instead of exp + reciprocal,
    # relieving the single EUP slot on the serial recurrence path.
    return 0.5 * (jnp.tanh(0.5 * x) + 1.0)


# --------------------------------------------------------------------------- #
# Kernel 1: LSTM recurrence.  Grid = (batch tiles [parallel], T tiles [arbitrary]);
# h/c carry lives in VMEM scratch across the T axis.                           #
# --------------------------------------------------------------------------- #
def lstm_recurrence_kernel(x_ref, w_ih_ref, w_hh_ref, b_ref, h0_ref, c0_ref,
                           h_seq_ref, hn_ref, cn_ref,
                           h_sc, c_sc, gx_sc, *, t_valid):
    t_blk = pl.program_id(1)
    T_tile, B_tile, _ = x_ref.shape
    Hp4 = w_ih_ref.shape[1]
    Hp = Hp4 // 4
    needs_mask = (t_valid % T_tile) != 0   # static: does the last tile contain padded steps?

    @pl.when(t_blk == 0)
    def _():
        h_sc[...] = h0_ref[...]
        c_sc[...] = c0_ref[...]

    # Hoisted input projection for this whole T tile: one MXU-friendly matmul
    # (bf16 inputs, f32 accumulation) instead of T tiny per-step matmuls.
    # Stored in bf16 -- halves the largest per-tile VMEM consumer.
    x2d = x_ref[...].reshape(T_tile * B_tile, x_ref.shape[2])
    gx = jnp.dot(x2d, w_ih_ref[...], preferred_element_type=jnp.float32) + b_ref[...]
    gx_sc[...] = gx.reshape(T_tile, B_tile, Hp4).astype(gx_sc.dtype)

    w_hh = w_hh_ref[...]  # (Hp, 4Hp) bf16, resident for the whole tile

    def step(t, carry):
        h32, hb, c = carry  # f32 / bf16 / f32, each (B_tile, Hp)
        gates = gx_sc[t] + jnp.dot(hb, w_hh, preferred_element_type=jnp.float32)
        # Hp is a multiple of 128 -> gate slices are lane-aligned (free views).
        i = _sigmoid(gates[:, 0 * Hp:1 * Hp])
        f = _sigmoid(gates[:, 1 * Hp:2 * Hp])
        g = jnp.tanh(gates[:, 2 * Hp:3 * Hp])
        o = _sigmoid(gates[:, 3 * Hp:4 * Hp])
        c_new = f * c + i * g
        h_new = o * jnp.tanh(c_new)
        hb_new = h_new.astype(hb.dtype)    # single cast, reused for the store + next matmul
        if needs_mask:
            # Padded timesteps must not advance the state (zero-input steps are NOT
            # identity for an LSTM: gates = bias).
            valid = (t_blk * T_tile + t) < t_valid
            h_new = jnp.where(valid, h_new, h32)
            hb_new = jnp.where(valid, hb_new, hb)
            c_new = jnp.where(valid, c_new, c)
        h_seq_ref[t] = hb_new
        return (h_new, hb_new, c_new)

    h_init = h_sc[...]
    carry0 = (h_init, h_init.astype(h_seq_ref.dtype), c_sc[...])
    h_fin, _, c_fin = lax.fori_loop(0, T_tile, step, carry0, unroll=True)
    h_sc[...] = h_fin
    c_sc[...] = c_fin

    @pl.when(t_blk == pl.num_programs(1) - 1)
    def _():
        hn_ref[...] = h_fin
        cn_ref[...] = c_fin


# --------------------------------------------------------------------------- #
# Kernel 2: batched output projection H -> V.  Grid = (V tiles, T tiles), both #
# parallel, T innermost so each W_out block is streamed from HBM only once.    #
# Output is emitted batch-first directly (no post-kernel transpose).           #
# --------------------------------------------------------------------------- #
def output_projection_kernel(h_ref, w_out_ref, b_out_ref, out_ref):
    Bp, T_tile, Hp = h_ref.shape
    h2d = h_ref[...].reshape(Bp * T_tile, Hp)
    logits = jnp.dot(h2d, w_out_ref[...], preferred_element_type=jnp.float32)
    logits = logits + b_out_ref[...]
    out_ref[...] = logits.reshape(Bp, T_tile, -1).astype(out_ref.dtype)


# --------------------------------------------------------------------------- #
# Parameter init (matches the PyTorch module, incl. its explicit              #
# kaiming_uniform_(nonlinearity='relu') on the Linear weight).                 #
# --------------------------------------------------------------------------- #
def init_params(key, vocab_size, hidden_size, emb_size):
    ks = jax.random.split(key, 7)
    embedding = jax.random.normal(ks[0], (vocab_size, emb_size), jnp.float32)
    k = 1.0 / math.sqrt(hidden_size)
    w_ih = jax.random.uniform(ks[1], (4 * hidden_size, emb_size), jnp.float32, -k, k)
    w_hh = jax.random.uniform(ks[2], (4 * hidden_size, hidden_size), jnp.float32, -k, k)
    b_ih = jax.random.uniform(ks[3], (4 * hidden_size,), jnp.float32, -k, k)
    b_hh = jax.random.uniform(ks[4], (4 * hidden_size,), jnp.float32, -k, k)
    w_bound = math.sqrt(2.0) * math.sqrt(3.0 / hidden_size)   # kaiming_uniform_, relu
    w_lin = jax.random.uniform(ks[5], (vocab_size, hidden_size), jnp.float32, -w_bound, w_bound)
    b_bound = 1.0 / math.sqrt(hidden_size)
    b_lin = jax.random.uniform(ks[6], (vocab_size,), jnp.float32, -b_bound, b_bound)
    return dict(embedding=embedding, w_ih=w_ih, w_hh=w_hh, b_ih=b_ih, b_hh=b_hh,
                w_lin=w_lin, b_lin=b_lin)


# --------------------------------------------------------------------------- #
# One-time parameter preparation: pad lane dims to 128, cast MXU inputs to     #
# bf16, gate-block the LSTM weights (PyTorch gate order [i, f, g, o]).         #
# --------------------------------------------------------------------------- #
def prepare_params(params):
    f32 = jnp.float32
    mmdt = MATMUL_DTYPE
    V, E = params["embedding"].shape
    H = params["w_hh"].shape[1]
    Ep, Hp, Vp = _round_up(E, 128), _round_up(H, 128), _round_up(V, 128)

    emb_p = jnp.zeros((V, Ep), mmdt).at[:, :E].set(params["embedding"].astype(mmdt))

    w_ih_g = params["w_ih"].T.reshape(E, 4, H)
    w_hh_g = params["w_hh"].T.reshape(H, 4, H)
    b_g = (params["b_ih"] + params["b_hh"]).reshape(4, H)

    w_ih_p = jnp.zeros((Ep, 4, Hp), f32).at[:E, :, :H].set(w_ih_g)
    w_ih_p = w_ih_p.reshape(Ep, 4 * Hp).astype(mmdt)
    w_hh_p = jnp.zeros((Hp, 4, Hp), f32).at[:H, :, :H].set(w_hh_g)
    w_hh_p = w_hh_p.reshape(Hp, 4 * Hp).astype(mmdt)
    b_p = jnp.zeros((4, Hp), f32).at[:, :H].set(b_g).reshape(1, 4 * Hp)

    w_out_p = jnp.zeros((Hp, Vp), f32).at[:H, :V].set(params["w_lin"].T).astype(mmdt)
    b_out_p = jnp.zeros((1, Vp), f32).at[0, :V].set(params["b_lin"])

    prepped = dict(embedding=emb_p, w_ih=w_ih_p, w_hh=w_hh_p, b=b_p,
                   w_out=w_out_p, b_out=b_out_p)
    dims = (V, E, H)                  # static, hashable
    return prepped, dims


# --------------------------------------------------------------------------- #
# Forward pass wrapper.                                                        #
# --------------------------------------------------------------------------- #
@functools.partial(jax.jit, static_argnames=("dims", "t_tile_cap", "v_tile_cap"))
def lstm_network_forward(x_ids, hidden, prepped, dims, t_tile_cap=16, v_tile_cap=1024):
    """x_ids: (B, T) int32 token ids.  hidden = (h0, c0), each (1, B, H)."""
    # TODO(synk): only num_layers=1 is implemented (matches the PyTorch default).
    V, _E, H = dims
    h0, c0 = hidden
    B, T = x_ids.shape
    f32 = jnp.float32
    mmdt = MATMUL_DTYPE

    Ep = prepped["w_ih"].shape[0]
    Hp = prepped["w_hh"].shape[0]
    Vp = prepped["w_out"].shape[1]
    Bp = _round_up(B, 16)

    # ---- tiling ---- #
    n_b = 2 if Bp >= 32 else 1            # batch-parallel axis (v7x has 2 TensorCores)
    B_TILE = Bp // n_b                    # Bp multiple of 16 -> B_TILE multiple of 16

    T_TILE = min(_round_up(t_tile_cap, 8), _round_up(T, 8))
    Tp = _round_up(T, T_TILE)             # pad T; padded steps are masked in-kernel
    n_t = Tp // T_TILE

    # Kernel-2 T tile decoupled from kernel-1's: target GEMM M = Bp*T2_TILE >= ~512 rows.
    t2_cap = max(T_TILE, _round_up(max(1, 512 // Bp), 8))
    T2_TILE = 8 * _largest_divisor_leq(Tp // 8, max(1, t2_cap // 8))
    n_t2 = Tp // T2_TILE

    V_TILE = min(Vp, _round_up(v_tile_cap, 128))
    if Vp % V_TILE != 0:
        V_TILE = 128
    n_v = Vp // V_TILE

    vmem_limit = _pick_vmem_limit()

    # Embedding gather (glue, plain JAX): the pre-padded bf16 table + padded time-major ids
    # directly produce the (Tp, Bp, Ep) bf16 kernel input (no extra pad/transpose passes).
    # TODO(synk): the gather itself stays in XLA (no tidy Pallas gather win here).
    ids_tb = jnp.transpose(x_ids.astype(jnp.int32), (1, 0))           # (T, B), tiny
    ids_p = jnp.zeros((Tp, Bp), jnp.int32).at[:T, :B].set(ids_tb)
    x_p = jnp.take(prepped["embedding"], ids_p, axis=0)               # (Tp, Bp, Ep) bf16

    h0_p = jnp.zeros((Bp, Hp), f32).at[:B, :H].set(h0[0])
    c0_p = jnp.zeros((Bp, Hp), f32).at[:B, :H].set(c0[0])

    # ---------------- Kernel 1: recurrence ---------------- #
    kernel1 = functools.partial(lstm_recurrence_kernel, t_valid=T)
    h_seq, hn_p, cn_p = pl.pallas_call(
        kernel1,
        grid=(n_b, n_t),
        in_specs=[
            pl.BlockSpec((T_TILE, B_TILE, Ep), lambda b, t: (t, b, 0)),
            pl.BlockSpec((Ep, 4 * Hp), lambda b, t: (0, 0)),
            pl.BlockSpec((Hp, 4 * Hp), lambda b, t: (0, 0)),
            pl.BlockSpec((1, 4 * Hp), lambda b, t: (0, 0)),
            pl.BlockSpec((B_TILE, Hp), lambda b, t: (b, 0)),
            pl.BlockSpec((B_TILE, Hp), lambda b, t: (b, 0)),
        ],
        out_specs=(
            pl.BlockSpec((T_TILE, B_TILE, Hp), lambda b, t: (t, b, 0)),
            pl.BlockSpec((B_TILE, Hp), lambda b, t: (b, 0)),
            pl.BlockSpec((B_TILE, Hp), lambda b, t: (b, 0)),
        ),
        out_shape=(
            jax.ShapeDtypeStruct((Tp, Bp, Hp), mmdt),    # per-step hidden states
            jax.ShapeDtypeStruct((Bp, Hp), f32),         # h_T
            jax.ShapeDtypeStruct((Bp, Hp), f32),         # c_T
        ),
        scratch_shapes=[
            pltpu.VMEM((B_TILE, Hp), f32),               # h carry
            pltpu.VMEM((B_TILE, Hp), f32),               # c carry
            pltpu.VMEM((T_TILE, B_TILE, 4 * Hp), mmdt),  # hoisted input gates (bf16)
        ],
        compiler_params=pltpu.CompilerParams(
            dimension_semantics=("parallel", "arbitrary"),
            vmem_limit_bytes=vmem_limit,
        ),
    )(x_p, prepped["w_ih"], prepped["w_hh"], prepped["b"], h0_p, c0_p)

    # Batch-first relayout of the *hidden* sequence (T*B*H bf16) so kernel 2 can emit
    # logits batch-first directly; this replaces the old post-kernel transpose over the
    # much larger (T*B*V f32) logits tensor.
    h_bt = jnp.transpose(h_seq, (1, 0, 2))               # (Bp, Tp, Hp) bf16

    # ---------------- Kernel 2: batched output projection ---------------- #
    out_p = pl.pallas_call(
        output_projection_kernel,
        grid=(n_v, n_t2),
        in_specs=[
            pl.BlockSpec((Bp, T2_TILE, Hp), lambda v, t: (0, t, 0)),
            pl.BlockSpec((Hp, V_TILE), lambda v, t: (0, v)),
            pl.BlockSpec((1, V_TILE), lambda v, t: (0, v)),
        ],
        out_specs=pl.BlockSpec((Bp, T2_TILE, V_TILE), lambda v, t: (0, t, v)),
        out_shape=jax.ShapeDtypeStruct((Bp, Tp, Vp), f32),
        compiler_params=pltpu.CompilerParams(
            dimension_semantics=("parallel", "parallel"),
            vmem_limit_bytes=vmem_limit,
        ),
    )(h_bt, prepped["w_out"], prepped["b_out"])

    # Un-pad: slices only -- no transpose of the logits tensor.
    out = out_p[:B, :T, :V]
    hn = hn_p[:B, :H][None, ...]
    cn = cn_p[:B, :H][None, ...]
    return out, (hn, cn)


# Pure-JAX f32 reference (for a coarse sanity check only).
def lstm_network_reference(x_ids, hidden, params):
    h, c = hidden[0][0], hidden[1][0]
    H = params["w_hh"].shape[1]
    emb = jnp.take(params["embedding"], x_ids, axis=0)
    w_ih_t, w_hh_t = params["w_ih"].T, params["w_hh"].T
    b = params["b_ih"] + params["b_hh"]

    def step(carry, x_t):
        h, c = carry
        gates = x_t @ w_ih_t + h @ w_hh_t + b
        i = jax.nn.sigmoid(gates[:, :H])
        f = jax.nn.sigmoid(gates[:, H:2 * H])
        g = jnp.tanh(gates[:, 2 * H:3 * H])
        o = jax.nn.sigmoid(gates[:, 3 * H:])
        c = f * c + i * g
        h = o * jnp.tanh(c)
        return (h, c), h

    (hT, cT), hs = lax.scan(step, (h, c), jnp.transpose(emb, (1, 0, 2)))
    out = jnp.einsum("tbh,vh->btv", hs, params["w_lin"]) + params["b_lin"]
    return out, (hT[None], cT[None])


if __name__ == "__main__":
    vocab_size, hidden_size, emb_size, num_layers = 32, 32, 16, 1
    B, T = 2, 8

    key = jax.random.PRNGKey(0)
    k_param, k_x, k_h, k_c = jax.random.split(key, 4)

    params = init_params(k_param, vocab_size, hidden_size, emb_size)
    x_ids = jax.random.randint(k_x, (B, T), 0, vocab_size, dtype=jnp.int32)
    h0 = jax.random.normal(k_h, (num_layers, B, hidden_size), jnp.float32)
    c0 = jax.random.normal(k_c, (num_layers, B, hidden_size), jnp.float32)

    prepped, dims = prepare_params(params)
    out, (hn, cn) = lstm_network_forward(x_ids, (h0, c0), prepped, dims)
    jax.block_until_ready((out, hn, cn))

    assert out.shape == (B, T, vocab_size), out.shape
    assert hn.shape == (num_layers, B, hidden_size)
    assert cn.shape == (num_layers, B, hidden_size)
    assert bool(jnp.all(jnp.isfinite(out)))

    # Coarse sanity check vs. f32 reference (loose tolerance: MXU inputs / gx / h_seq are bf16).
    out_ref, (hn_ref, cn_ref) = lstm_network_reference(x_ids, (h0, c0), params)
    max_diff = float(jnp.max(jnp.abs(out - out_ref)))
    assert max_diff < 0.2, f"max |diff| vs reference too large: {max_diff}"

    print("KERNEL_OK")
</pallas_src>

<mosaic_0001>
module attributes {stable_mosaic.version = 11 : i64} {
  func.func @output_projection_kernel(%arg0: i32, %arg1: i32, %arg2: memref<16x8x128xbf16, #tpu.memory_space<vmem>>, %arg3: memref<128x128xbf16, #tpu.memory_space<vmem>>, %arg4: memref<1x128xf32, #tpu.memory_space<vmem>>, %arg5: memref<16x8x128xf32, #tpu.memory_space<vmem>>) attributes {dimension_semantics = [#tpu.dimension_semantics<parallel>, #tpu.dimension_semantics<parallel>], iteration_bounds = array<i64: 1, 1>, scalar_prefetch = 0 : i64, scratch_operands = 0 : i64, tpu.core_type = #tpu.core_type<tc>, window_params = [{transform_indices = @transform_0, window_bounds = array<i64: 16, 8, 128>}, {transform_indices = @transform_1, window_bounds = array<i64: 128, 128>}, {transform_indices = @transform_2, window_bounds = array<i64: 1, 128>}, {transform_indices = @transform_3, window_bounds = array<i64: 16, 8, 128>}]} {
    %c0 = arith.constant 0 : index
    %c0_0 = arith.constant 0 : index
    %c0_1 = arith.constant 0 : index
    %0 = vector.load %arg2[%c0, %c0_0, %c0_1] : memref<16x8x128xbf16, #tpu.memory_space<vmem>>, vector<16x8x128xbf16>
    %1 = vector.shape_cast %0 : vector<16x8x128xbf16> to vector<128x128xbf16>
    %c0_2 = arith.constant 0 : index
    %c0_3 = arith.constant 0 : index
    %2 = vector.load %arg3[%c0_2, %c0_3] : memref<128x128xbf16, #tpu.memory_space<vmem>>, vector<128x128xbf16>
    %cst = arith.constant dense<0.000000e+00> : vector<128x128xf32>
    %3 = tpu.matmul %1, %2, %cst {dimension_numbers = #tpu.dot_dimension_numbers<[1], [0], [0], [1], [0, 0, 1, 1], [], []>} : vector<128x128xbf16>, vector<128x128xbf16>, vector<128x128xf32> -> vector<128x128xf32>
    %c0_4 = arith.constant 0 : index
    %c0_5 = arith.constant 0 : index
    %4 = vector.load %arg4[%c0_4, %c0_5] : memref<1x128xf32, #tpu.memory_space<vmem>>, vector<1x128xf32>
    %5 = vector.broadcast %4 : vector<1x128xf32> to vector<128x128xf32>
    %6 = arith.addf %3, %5 : vector<128x128xf32>
    %7 = vector.shape_cast %6 : vector<128x128xf32> to vector<16x8x128xf32>
    %c0_6 = arith.constant 0 : index
    %c0_7 = arith.constant 0 : index
    %c0_8 = arith.constant 0 : index
    %8 = vector.load %arg5[%c0_6, %c0_7, %c0_8] : memref<16x8x128xf32, #tpu.memory_space<vmem>>, vector<16x8x128xf32>
    tpu.vector_store %arg5[%c0_6, %c0_7, %c0_8], %7 {strides = array<i32>} : memref<16x8x128xf32, #tpu.memory_space<vmem>>, vector<16x8x128xf32>,
    return
  }
  func.func @transform_0(%arg0: i32, %arg1: i32) -> (i32, i32, i32) {
    %c0_i32 = arith.constant 0 : i32
    %c0_i32_0 = arith.constant 0 : i32
    %c0_i32_1 = arith.constant 0 : i32
    return %c0_i32, %arg1, %c0_i32_0 : i32, i32, i32
  }
  func.func @transform_1(%arg0: i32, %arg1: i32) -> (i32, i32) {
    %c0_i32 = arith.constant 0 : i32
    %c0_i32_0 = arith.constant 0 : i32
    return %c0_i32, %arg0 : i32, i32
  }
  func.func @transform_2(%arg0: i32, %arg1: i32) -> (i32, i32) {
    %c0_i32 = arith.constant 0 : i32
    %c0_i32_0 = arith.constant 0 : i32
    return %c0_i32, %arg0 : i32, i32
  }
  func.func @transform_3(%arg0: i32, %arg1: i32) -> (i32, i32, i32) {
    %c0_i32 = arith.constant 0 : i32
    %c0_i32_0 = arith.constant 0 : i32
    return %c0_i32, %arg1, %arg0 : i32, i32, i32
  }
}

module attributes {stable_mosaic.version = 11 : i64} {
  func.func @lstm_recurrence_kernel(%arg0: i32, %arg1: i32, %arg2: memref<8x16x128xbf16, #tpu.memory_space<vmem>>, %arg3: memref<128x512xbf16, #tpu.memory_space<vmem>>, %arg4: memref<128x512xbf16, #tpu.memory_space<vmem>>, %arg5: memref<1x512xf32, #tpu.memory_space<vmem>>, %arg6: memref<16x128xf32, #tpu.memory_space<vmem>>, %arg7: memref<16x128xf32, #tpu.memory_space<vmem>>, %arg8: memref<8x16x128xbf16, #tpu.memory_space<vmem>>, %arg9: memref<16x128xf32, #tpu.memory_space<vmem>>, %arg10: memref<16x128xf32, #tpu.memory_space<vmem>>, %arg11: memref<16x128xf32, #tpu.memory_space<vmem>>, %arg12: memref<16x128xf32, #tpu.memory_space<vmem>>, %arg13: memref<8x16x512xbf16, #tpu.memory_space<vmem>>) attributes {dimension_semantics = [#tpu.dimension_semantics<parallel>, #tpu.dimension_semantics<arbitrary>], iteration_bounds = array<i64: 1, 1>, scalar_prefetch = 0 : i64, scratch_operands = 3 : i64, tpu.core_type = #tpu.core_type<tc>, window_params = [{transform_indices = @transform_0, window_bounds = array<i64: 8, 16, 128>}, {pipeline_mode = #tpu.pipeline_mode<synchronous>, transform_indices = @transform_1, window_bounds = array<i64: 128, 512>}, {pipeline_mode = #tpu.pipeline_mode<synchronous>, transform_indices = @transform_2, window_bounds = array<i64: 128, 512>}, {pipeline_mode = #tpu.pipeline_mode<synchronous>, transform_indices = @transform_3, window_bounds = array<i64: 1, 512>}, {transform_indices = @transform_4, window_bounds = array<i64: 16, 128>}, {transform_indices = @transform_5, window_bounds = array<i64: 16, 128>}, {transform_indices = @transform_6, window_bounds = array<i64: 8, 16, 128>}, {transform_indices = @transform_7, window_bounds = array<i64: 16, 128>}, {transform_indices = @transform_8, window_bounds = array<i64: 16, 128>}]} {
    %c0_i32 = arith.constant 0 : i32
    %0 = arith.cmpi eq, %arg1, %c0_i32 : i32
    %1 = arith.extui %0 : i1 to i32
    %c0_i32_0 = arith.constant 0 : i32
    %2 = arith.cmpi ne, %1, %c0_i32_0 : i32
    scf.if %2 {
      %c0_135 = arith.constant 0 : index
      %c0_136 = arith.constant 0 : index
      %358 = vector.load %arg6[%c0_135, %c0_136] : memref<16x128xf32, #tpu.memory_space<vmem>>, vector<16x128xf32>
      %c0_137 = arith.constant 0 : index
      %c0_138 = arith.constant 0 : index
      %359 = vector.load %arg11[%c0_137, %c0_138] : memref<16x128xf32, #tpu.memory_space<vmem>>, vector<16x128xf32>
      tpu.vector_store %arg11[%c0_137, %c0_138], %358 {strides = array<i32>} : memref<16x128xf32, #tpu.memory_space<vmem>>, vector<16x128xf32>,
      %c0_139 = arith.constant 0 : index
      %c0_140 = arith.constant 0 : index
      %360 = vector.load %arg7[%c0_139, %c0_140] : memref<16x128xf32, #tpu.memory_space<vmem>>, vector<16x128xf32>
      %c0_141 = arith.constant 0 : index
      %c0_142 = arith.constant 0 : index
      %361 = vector.load %arg12[%c0_141, %c0_142] : memref<16x128xf32, #tpu.memory_space<vmem>>, vector<16x128xf32>
      tpu.vector_store %arg12[%c0_141, %c0_142], %360 {strides = array<i32>} : memref<16x128xf32, #tpu.memory_space<vmem>>, vector<16x128xf32>,
    } else {
    }
    %c0 = arith.constant 0 : index
    %c0_1 = arith.constant 0 : index
    %c0_2 = arith.constant 0 : index
    %3 = vector.load %arg2[%c0, %c0_1, %c0_2] : memref<8x16x128xbf16, #tpu.memory_space<vmem>>, vector<8x16x128xbf16>
    %4 = vector.shape_cast %3 : vector<8x16x128xbf16> to vector<128x128xbf16>
    %c0_3 = arith.constant 0 : index
    %c0_4 = arith.constant 0 : index
    %5 = vector.load %arg3[%c0_3, %c0_4] : memref<128x512xbf16, #tpu.memory_space<vmem>>, vector<128x512xbf16>
    %cst = arith.constant dense<0.000000e+00> : vector<128x512xf32>
    %6 = tpu.matmul %4, %5, %cst {dimension_numbers = #tpu.dot_dimension_numbers<[1], [0], [0], [1], [0, 0, 1, 1], [], []>} : vector<128x128xbf16>, vector<128x512xbf16>, vector<128x512xf32> -> vector<128x512xf32>
    %c0_5 = arith.constant 0 : index
    %c0_6 = arith.constant 0 : index
    %7 = vector.load %arg5[%c0_5, %c0_6] : memref<1x512xf32, #tpu.memory_space<vmem>>, vector<1x512xf32>
    %8 = vector.broadcast %7 : vector<1x512xf32> to vector<128x512xf32>
    %9 = arith.addf %6, %8 : vector<128x512xf32>
    %10 = vector.shape_cast %9 : vector<128x512xf32> to vector<8x16x512xf32>
    %11 = arith.truncf %10 : vector<8x16x512xf32> to vector<8x16x512xbf16>
    %c0_7 = arith.constant 0 : index
    %c0_8 = arith.constant 0 : index
    %c0_9 = arith.constant 0 : index
    %12 = vector.load %arg13[%c0_7, %c0_8, %c0_9] : memref<8x16x512xbf16, #tpu.memory_space<vmem>>, vector<8x16x512xbf16>
    tpu.vector_store %arg13[%c0_7, %c0_8, %c0_9], %11 {strides = array<i32>} : memref<8x16x512xbf16, #tpu.memory_space<vmem>>, vector<8x16x512xbf16>,
    %c0_10 = arith.constant 0 : index
    %c0_11 = arith.constant 0 : index
    %13 = vector.load %arg4[%c0_10, %c0_11] : memref<128x512xbf16, #tpu.memory_space<vmem>>, vector<128x512xbf16>
    %c0_12 = arith.constant 0 : index
    %c0_13 = arith.constant 0 : index
    %14 = vector.load %arg11[%c0_12, %c0_13] : memref<16x128xf32, #tpu.memory_space<vmem>>, vector<16x128xf32>
    %15 = arith.truncf %14 : vector<16x128xf32> to vector<16x128xbf16>
    %c0_14 = arith.constant 0 : index
    %c0_15 = arith.constant 0 : index
    %16 = vector.load %arg12[%c0_14, %c0_15] : memref<16x128xf32, #tpu.memory_space<vmem>>, vector<16x128xf32>
    %c0_i32_16 = arith.constant 0 : i32
    %17 = arith.index_cast %c0_i32_16 : i32 to index
    %c0_17 = arith.constant 0 : index
    %c0_18 = arith.constant 0 : index
    %18 = vector.load %arg13[%17, %c0_17, %c0_18] : memref<8x16x512xbf16, #tpu.memory_space<vmem>>, vector<1x16x512xbf16>
    %19 = vector.shape_cast %18 : vector<1x16x512xbf16> to vector<16x512xbf16>
    %cst_19 = arith.constant dense<0.000000e+00> : vector<16x512xf32>
    %20 = tpu.matmul %15, %13, %cst_19 {dimension_numbers = #tpu.dot_dimension_numbers<[1], [0], [0], [1], [0, 0, 1, 1], [], []>} : vector<16x128xbf16>, vector<128x512xbf16>, vector<16x512xf32> -> vector<16x512xf32>
    %21 = arith.extf %19 : vector<16x512xbf16> to vector<16x512xf32>
    %22 = arith.addf %21, %20 : vector<16x512xf32>
    %23 = vector.extract_strided_slice %22 {offsets = [0, 0], sizes = [16, 128], strides = [1, 1]} : vector<16x512xf32> to vector<16x128xf32>
    %cst_20 = arith.constant 5.000000e-01 : f32
    %24 = vector.broadcast %cst_20 : f32 to vector<16x128xf32>
    %25 = arith.mulf %24, %23 : vector<16x128xf32>
    %26 = math.tanh %25 : vector<16x128xf32>
    %cst_21 = arith.constant 1.000000e+00 : f32
    %27 = vector.broadcast %cst_21 : f32 to vector<16x128xf32>
    %28 = arith.addf %26, %27 : vector<16x128xf32>
    %cst_22 = arith.constant 5.000000e-01 : f32
    %29 = vector.broadcast %cst_22 : f32 to vector<16x128xf32>
    %30 = arith.mulf %29, %28 : vector<16x128xf32>
    %31 = vector.extract_strided_slice %22 {offsets = [0, 128], sizes = [16, 128], strides = [1, 1]} : vector<16x512xf32> to vector<16x128xf32>
    %cst_23 = arith.constant 5.000000e-01 : f32
    %32 = vector.broadcast %cst_23 : f32 to vector<16x128xf32>
    %33 = arith.mulf %32, %31 : vector<16x128xf32>
    %34 = math.tanh %33 : vector<16x128xf32>
    %cst_24 = arith.constant 1.000000e+00 : f32
    %35 = vector.broadcast %cst_24 : f32 to vector<16x128xf32>
    %36 = arith.addf %34, %35 : vector<16x128xf32>
    %cst_25 = arith.constant 5.000000e-01 : f32
    %37 = vector.broadcast %cst_25 : f32 to vector<16x128xf32>
    %38 = arith.mulf %37, %36 : vector<16x128xf32>
    %39 = vector.extract_strided_slice %22 {offsets = [0, 256], sizes = [16, 128], strides = [1, 1]} : vector<16x512xf32> to vector<16x128xf32>
    %40 = math.tanh %39 : vector<16x128xf32>
    %41 = vector.extract_strided_slice %22 {offsets = [0, 384], sizes = [16, 128], strides = [1, 1]} : vector<16x512xf32> to vector<16x128xf32>
    %cst_26 = arith.constant 5.000000e-01 : f32
    %42 = vector.broadcast %cst_26 : f32 to vector<16x128xf32>
    %43 = arith.mulf %42, %41 : vector<16x128xf32>
    %44 = math.tanh %43 : vector<16x128xf32>
    %cst_27 = arith.constant 1.000000e+00 : f32
    %45 = vector.broadcast %cst_27 : f32 to vector<16x128xf32>
    %46 = arith.addf %44, %45 : vector<16x128xf32>
    %cst_28 = arith.constant 5.000000e-01 : f32
    %47 = vector.broadcast %cst_28 : f32 to vector<16x128xf32>
    %48 = arith.mulf %47, %46 : vector<16x128xf32>
    %49 = arith.mulf %38, %16 : vector<16x128xf32>
    %50 = arith.mulf %30, %40 : vector<16x128xf32>
    %51 = arith.addf %49, %50 : vector<16x128xf32>
    %52 = math.tanh %51 : vector<16x128xf32>
    %53 = arith.mulf %48, %52 : vector<16x128xf32>
    %54 = arith.truncf %53 : vector<16x128xf32> to vector<16x128xbf16>
    %55 = arith.index_cast %c0_i32_16 : i32 to index
    %c0_29 = arith.constant 0 : index
    %c0_30 = arith.constant 0 : index
    %56 = vector.load %arg8[%55, %c0_29, %c0_30] : memref<8x16x128xbf16, #tpu.memory_space<vmem>>, vector<1x16x128xbf16>
    %57 = vector.shape_cast %56 : vector<1x16x128xbf16> to vector<16x128xbf16>
    %58 = vector.shape_cast %54 : vector<16x128xbf16> to vector<1x16x128xbf16>
    tpu.vector_store %arg8[%55, %c0_29, %c0_30], %58 {strides = array<i32>} : memref<8x16x128xbf16, #tpu.memory_space<vmem>>, vector<1x16x128xbf16>,
    %c1_i32 = arith.constant 1 : i32
    %59 = arith.index_cast %c1_i32 : i32 to index
    %c0_31 = arith.constant 0 : index
    %c0_32 = arith.constant 0 : index
    %60 = vector.load %arg13[%59, %c0_31, %c0_32] : memref<8x16x512xbf16, #tpu.memory_space<vmem>>, vector<1x16x512xbf16>
    %61 = vector.shape_cast %60 : vector<1x16x512xbf16> to vector<16x512xbf16>
    %cst_33 = arith.constant dense<0.000000e+00> : vector<16x512xf32>
    %62 = tpu.matmul %54, %13, %cst_33 {dimension_numbers = #tpu.dot_dimension_numbers<[1], [0], [0], [1], [0, 0, 1, 1], [], []>} : vector<16x128xbf16>, vector<128x512xbf16>, vector<16x512xf32> -> vector<16x512xf32>
    %63 = arith.extf %61 : vector<16x512xbf16> to vector<16x512xf32>
    %64 = arith.addf %63, %62 : vector<16x512xf32>
    %65 = vector.extract_strided_slice %64 {offsets = [0, 0], sizes = [16, 128], strides = [1, 1]} : vector<16x512xf32> to vector<16x128xf32>
    %cst_34 = arith.constant 5.000000e-01 : f32
    %66 = vector.broadcast %cst_34 : f32 to vector<16x128xf32>
    %67 = arith.mulf %66, %65 : vector<16x128xf32>
    %68 = math.tanh %67 : vector<16x128xf32>
    %cst_35 = arith.constant 1.000000e+00 : f32
    %69 = vector.broadcast %cst_35 : f32 to vector<16x128xf32>
    %70 = arith.addf %68, %69 : vector<16x128xf32>
    %cst_36 = arith.constant 5.000000e-01 : f32
    %71 = vector.broadcast %cst_36 : f32 to vector<16x128xf32>
    %72 = arith.mulf %71, %70 : vector<16x128xf32>
    %73 = vector.extract_strided_slice %64 {offsets = [0, 128], sizes = [16, 128], strides = [1, 1]} : vector<16x512xf32> to vector<16x128xf32>
    %cst_37 = arith.constant 5.000000e-01 : f32
    %74 = vector.broadcast %cst_37 : f32 to vector<16x128xf32>
    %75 = arith.mulf %74, %73 : vector<16x128xf32>
    %76 = math.tanh %75 : vector<16x128xf32>
    %cst_38 = arith.constant 1.000000e+00 : f32
    %77 = vector.broadcast %cst_38 : f32 to vector<16x128xf32>
    %78 = arith.addf %76, %77 : vector<16x128xf32>
    %cst_39 = arith.constant 5.000000e-01 : f32
    %79 = vector.broadcast %cst_39 : f32 to vector<16x128xf32>
    %80 = arith.mulf %79, %78 : vector<16x128xf32>
    %81 = vector.extract_strided_slice %64 {offsets = [0, 256], sizes = [16, 128], strides = [1, 1]} : vector<16x512xf32> to vector<16x128xf32>
    %82 = math.tanh %81 : vector<16x128xf32>
    %83 = vector.extract_strided_slice %64 {offsets = [0, 384], sizes = [16, 128], strides = [1, 1]} : vector<16x512xf32> to vector<16x128xf32>
    %cst_40 = arith.constant 5.000000e-01 : f32
    %84 = vector.broadcast %cst_40 : f32 to vector<16x128xf32>
    %85 = arith.mulf %84, %83 : vector<16x128xf32>
    %86 = math.tanh %85 : vector<16x128xf32>
    %cst_41 = arith.constant 1.000000e+00 : f32
    %87 = vector.broadcast %cst_41 : f32 to vector<16x128xf32>
    %88 = arith.addf %86, %87 : vector<16x128xf32>
    %cst_42 = arith.constant 5.000000e-01 : f32
    %89 = vector.broadcast %cst_42 : f32 to vector<16x128xf32>
    %90 = arith.mulf %89, %88 : vector<16x128xf32>
    %91 = arith.mulf %80, %51 : vector<16x128xf32>
    %92 = arith.mulf %72, %82 : vector<16x128xf32>
    %93 = arith.addf %91, %92 : vector<16x128xf32>
    %94 = math.tanh %93 : vector<16x128xf32>
    %95 = arith.mulf %90, %94 : vector<16x128xf32>
    %96 = arith.truncf %95 : vector<16x128xf32> to vector<16x128xbf16>
    %97 = arith.index_cast %c1_i32 : i32 to index
    %c0_43 = arith.constant 0 : index
    %c0_44 = arith.constant 0 : index
    %98 = vector.load %arg8[%97, %c0_43, %c0_44] : memref<8x16x128xbf16, #tpu.memory_space<vmem>>, vector<1x16x128xbf16>
    %99 = vector.shape_cast %98 : vector<1x16x128xbf16> to vector<16x128xbf16>
    %100 = vector.shape_cast %96 : vector<16x128xbf16> to vector<1x16x128xbf16>
    tpu.vector_store %arg8[%97, %c0_43, %c0_44], %100 {strides = array<i32>} : memref<8x16x128xbf16, #tpu.memory_space<vmem>>, vector<1x16x128xbf16>,
    %c2_i32 = arith.constant 2 : i32
    %101 = arith.index_cast %c2_i32 : i32 to index
    %c0_45 = arith.constant 0 : index
    %c0_46 = arith.constant 0 : index
    %102 = vector.load %arg13[%101, %c0_45, %c0_46] : memref<8x16x512xbf16, #tpu.memory_space<vmem>>, vector<1x16x512xbf16>
    %103 = vector.shape_cast %102 : vector<1x16x512xbf16> to vector<16x512xbf16>
    %cst_47 = arith.constant dense<0.000000e+00> : vector<16x512xf32>
    %104 = tpu.matmul %96, %13, %cst_47 {dimension_numbers = #tpu.dot_dimension_numbers<[1], [0], [0], [1], [0, 0, 1, 1], [], []>} : vector<16x128xbf16>, vector<128x512xbf16>, vector<16x512xf32> -> vector<16x512xf32>
    %105 = arith.extf %103 : vector<16x512xbf16> to vector<16x512xf32>
    %106 = arith.addf %105, %104 : vector<16x512xf32>
    %107 = vector.extract_strided_slice %106 {offsets = [0, 0], sizes = [16, 128], strides = [1, 1]} : vector<16x512xf32> to vector<16x128xf32>
    %cst_48 = arith.constant 5.000000e-01 : f32
    %108 = vector.broadcast %cst_48 : f32 to vector<16x128xf32>
    %109 = arith.mulf %108, %107 : vector<16x128xf32>
    %110 = math.tanh %109 : vector<16x128xf32>
    %cst_49 = arith.constant 1.000000e+00 : f32
    %111 = vector.broadcast %cst_49 : f32 to vector<16x128xf32>
    %112 = arith.addf %110, %111 : vector<16x128xf32>
    %cst_50 = arith.constant 5.000000e-01 : f32
    %113 = vector.broadcast %cst_50 : f32 to vector<16x128xf32>
    %114 = arith.mulf %113, %112 : vector<16x128xf32>
    %115 = vector.extract_strided_slice %106 {offsets = [0, 128], sizes = [16, 128], strides = [1, 1]} : vector<16x512xf32> to vector<16x128xf32>
    %cst_51 = arith.constant 5.000000e-01 : f32
    %116 = vector.broadcast %cst_51 : f32 to vector<16x128xf32>
    %117 = arith.mulf %116, %115 : vector<16x128xf32>
    %118 = math.tanh %117 : vector<16x128xf32>
    %cst_52 = arith.constant 1.000000e+00 : f32
    %119 = vector.broadcast %cst_52 : f32 to vector<16x128xf32>
    %120 = arith.addf %118, %119 : vector<16x128xf32>
    %cst_53 = arith.constant 5.000000e-01 : f32
    %121 = vector.broadcast %cst_53 : f32 to vector<16x128xf32>
    %122 = arith.mulf %121, %120 : vector<16x128xf32>
    %123 = vector.extract_strided_slice %106 {offsets = [0, 256], sizes = [16, 128], strides = [1, 1]} : vector<16x512xf32> to vector<16x128xf32>
    %124 = math.tanh %123 : vector<16x128xf32>
    %125 = vector.extract_strided_slice %106 {offsets = [0, 384], sizes = [16, 128], strides = [1, 1]} : vector<16x512xf32> to vector<16x128xf32>
    %cst_54 = arith.constant 5.000000e-01 : f32
    %126 = vector.broadcast %cst_54 : f32 to vector<16x128xf32>
    %127 = arith.mulf %126, %125 : vector<16x128xf32>
    %128 = math.tanh %127 : vector<16x128xf32>
    %cst_55 = arith.constant 1.000000e+00 : f32
    %129 = vector.broadcast %cst_55 : f32 to vector<16x128xf32>
    %130 = arith.addf %128, %129 : vector<16x128xf32>
    %cst_56 = arith.constant 5.000000e-01 : f32
    %131 = vector.broadcast %cst_56 : f32 to vector<16x128xf32>
    %132 = arith.mulf %131, %130 : vector<16x128xf32>
    %133 = arith.mulf %122, %93 : vector<16x128xf32>
    %134 = arith.mulf %114, %124 : vector<16x128xf32>
    %135 = arith.addf %133, %134 : vector<16x128xf32>
    %136 = math.tanh %135 : vector<16x128xf32>
    %137 = arith.mulf %132, %136 : vector<16x128xf32>
    %138 = arith.truncf %137 : vector<16x128xf32> to vector<16x128xbf16>
    %139 = arith.index_cast %c2_i32 : i32 to index
    %c0_57 = arith.constant 0 : index
    %c0_58 = arith.constant 0 : index
    %140 = vector.load %arg8[%139, %c0_57, %c0_58] : memref<8x16x128xbf16, #tpu.memory_space<vmem>>, vector<1x16x128xbf16>
    %141 = vector.shape_cast %140 : vector<1x16x128xbf16> to vector<16x128xbf16>
    %142 = vector.shape_cast %138 : vector<16x128xbf16> to vector<1x16x128xbf16>
    tpu.vector_store %arg8[%139, %c0_57, %c0_58], %142 {strides = array<i32>} : memref<8x16x128xbf16, #tpu.memory_space<vmem>>, vector<1x16x128xbf16>,
    %c3_i32 = arith.constant 3 : i32
    %143 = arith.index_cast %c3_i32 : i32 to index
    %c0_59 = arith.constant 0 : index
    %c0_60 = arith.constant 0 : index
    %144 = vector.load %arg13[%143, %c0_59, %c0_60] : memref<8x16x512xbf16, #tpu.memory_space<vmem>>, vector<1x16x512xbf16>
    %145 = vector.shape_cast %144 : vector<1x16x512xbf16> to vector<16x512xbf16>
    %cst_61 = arith.constant dense<0.000000e+00> : vector<16x512xf32>
    %146 = tpu.matmul %138, %13, %cst_61 {dimension_numbers = #tpu.dot_dimension_numbers<[1], [0], [0], [1], [0, 0, 1, 1], [], []>} : vector<16x128xbf16>, vector<128x512xbf16>, vector<16x512xf32> -> vector<16x512xf32>
    %147 = arith.extf %145 : vector<16x512xbf16> to vector<16x512xf32>
    %148 = arith.addf %147, %146 : vector<16x512xf32>
    %149 = vector.extract_strided_slice %148 {offsets = [0, 0], sizes = [16, 128], strides = [1, 1]} : vector<16x512xf32> to vector<16x128xf32>
    %cst_62 = arith.constant 5.000000e-01 : f32
    %150 = vector.broadcast %cst_62 : f32 to vector<16x128xf32>
    %151 = arith.mulf %150, %149 : vector<16x128xf32>
    %152 = math.tanh %151 : vector<16x128xf32>
    %cst_63 = arith.constant 1.000000e+00 : f32
    %153 = vector.broadcast %cst_63 : f32 to vector<16x128xf32>
    %154 = arith.addf %152, %153 : vector<16x128xf32>
    %cst_64 = arith.constant 5.000000e-01 : f32
    %155 = vector.broadcast %cst_64 : f32 to vector<16x128xf32>
    %156 = arith.mulf %155, %154 : vector<16x128xf32>
    %157 = vector.extract_strided_slice %148 {offsets = [0, 128], sizes = [16, 128], strides = [1, 1]} : vector<16x512xf32> to vector<16x128xf32>
    %cst_65 = arith.constant 5.000000e-01 : f32
    %158 = vector.broadcast %cst_65 : f32 to vector<16x128xf32>
    %159 = arith.mulf %158, %157 : vector<16x128xf32>
    %160 = math.tanh %159 : vector<16x128xf32>
    %cst_66 = arith.constant 1.000000e+00 : f32
    %161 = vector.broadcast %cst_66 : f32 to vector<16x128xf32>
    %162 = arith.addf %160, %161 : vector<16x128xf32>
    %cst_67 = arith.constant 5.000000e-01 : f32
    %163 = vector.broadcast %cst_67 : f32 to vector<16x128xf32>
    %164 = arith.mulf %163, %162 : vector<16x128xf32>
    %165 = vector.extract_strided_slice %148 {offsets = [0, 256], sizes = [16, 128], strides = [1, 1]} : vector<16x512xf32> to vector<16x128xf32>
    %166 = math.tanh %165 : vector<16x128xf32>
    %167 = vector.extract_strided_slice %148 {offsets = [0, 384], sizes = [16, 128], strides = [1, 1]} : vector<16x512xf32> to vector<16x128xf32>
    %cst_68 = arith.constant 5.000000e-01 : f32
    %168 = vector.broadcast %cst_68 : f32 to vector<16x128xf32>
    %169 = arith.mulf %168, %167 : vector<16x128xf32>
    %170 = math.tanh %169 : vector<16x128xf32>
    %cst_69 = arith.constant 1.000000e+00 : f32
    %171 = vector.broadcast %cst_69 : f32 to vector<16x128xf32>
    %172 = arith.addf %170, %171 : vector<16x128xf32>
    %cst_70 = arith.constant 5.000000e-01 : f32
    %173 = vector.broadcast %cst_70 : f32 to vector<16x128xf32>
    %174 = arith.mulf %173, %172 : vector<16x128xf32>
    %175 = arith.mulf %164, %135 : vector<16x128xf32>
    %176 = arith.mulf %156, %166 : vector<16x128xf32>
    %177 = arith.addf %175, %176 : vector<16x128xf32>
    %178 = math.tanh %177 : vector<16x128xf32>
    %179 = arith.mulf %174, %178 : vector<16x128xf32>
    %180 = arith.truncf %179 : vector<16x128xf32> to vector<16x128xbf16>
    %181 = arith.index_cast %c3_i32 : i32 to index
    %c0_71 = arith.constant 0 : index
    %c0_72 = arith.constant 0 : index
    %182 = vector.load %arg8[%181, %c0_71, %c0_72] : memref<8x16x128xbf16, #tpu.memory_space<vmem>>, vector<1x16x128xbf16>
    %183 = vector.shape_cast %182 : vector<1x16x128xbf16> to vector<16x128xbf16>
    %184 = vector.shape_cast %180 : vector<16x128xbf16> to vector<1x16x128xbf16>
    tpu.vector_store %arg8[%181, %c0_71, %c0_72], %184 {strides = array<i32>} : memref<8x16x128xbf16, #tpu.memory_space<vmem>>, vector<1x16x128xbf16>,
    %c4_i32 = arith.constant 4 : i32
    %185 = arith.index_cast %c4_i32 : i32 to index
    %c0_73 = arith.constant 0 : index
    %c0_74 = arith.constant 0 : index
    %186 = vector.load %arg13[%185, %c0_73, %c0_74] : memref<8x16x512xbf16, #tpu.memory_space<vmem>>, vector<1x16x512xbf16>
    %187 = vector.shape_cast %186 : vector<1x16x512xbf16> to vector<16x512xbf16>
    %cst_75 = arith.constant dense<0.000000e+00> : vector<16x512xf32>
    %188 = tpu.matmul %180, %13, %cst_75 {dimension_numbers = #tpu.dot_dimension_numbers<[1], [0], [0], [1], [0, 0, 1, 1], [], []>} : vector<16x128xbf16>, vector<128x512xbf16>, vector<16x512xf32> -> vector<16x512xf32>
    %189 = arith.extf %187 : vector<16x512xbf16> to vector<16x512xf32>
    %190 = arith.addf %189, %188 : vector<16x512xf32>
    %191 = vector.extract_strided_slice %190 {offsets = [0, 0], sizes = [16, 128], strides = [1, 1]} : vector<16x512xf32> to vector<16x128xf32>
    %cst_76 = arith.constant 5.000000e-01 : f32
    %192 = vector.broadcast %cst_76 : f32 to vector<16x128xf32>
    %193 = arith.mulf %192, %191 : vector<16x128xf32>
    %194 = math.tanh %193 : vector<16x128xf32>
    %cst_77 = arith.constant 1.000000e+00 : f32
    %195 = vector.broadcast %cst_77 : f32 to vector<16x128xf32>
    %196 = arith.addf %194, %195 : vector<16x128xf32>
    %cst_78 = arith.constant 5.000000e-01 : f32
    %197 = vector.broadcast %cst_78 : f32 to vector<16x128xf32>
    %198 = arith.mulf %197, %196 : vector<16x128xf32>
    %199 = vector.extract_strided_slice %190 {offsets = [0, 128], sizes = [16, 128], strides = [1, 1]} : vector<16x512xf32> to vector<16x128xf32>
    %cst_79 = arith.constant 5.000000e-01 : f32
    %200 = vector.broadcast %cst_79 : f32 to vector<16x128xf32>
    %201 = arith.mulf %200, %199 : vector<16x128xf32>
    %202 = math.tanh %201 : vector<16x128xf32>
    %cst_80 = arith.constant 1.000000e+00 : f32
    %203 = vector.broadcast %cst_80 : f32 to vector<16x128xf32>
    %204 = arith.addf %202, %203 : vector<16x128xf32>
    %cst_81 = arith.constant 5.000000e-01 : f32
    %205 = vector.broadcast %cst_81 : f32 to vector<16x128xf32>
    %206 = arith.mulf %205, %204 : vector<16x128xf32>
    %207 = vector.extract_strided_slice %190 {offsets = [0, 256], sizes = [16, 128], strides = [1, 1]} : vector<16x512xf32> to vector<16x128xf32>
    %208 = math.tanh %207 : vector<16x128xf32>
    %209 = vector.extract_strided_slice %190 {offsets = [0, 384], sizes = [16, 128], strides = [1, 1]} : vector<16x512xf32> to vector<16x128xf32>
    %cst_82 = arith.constant 5.000000e-01 : f32
    %210 = vector.broadcast %cst_82 : f32 to vector<16x128xf32>
    %211 = arith.mulf %210, %209 : vector<16x128xf32>
    %212 = math.tanh %211 : vector<16x128xf32>
    %cst_83 = arith.constant 1.000000e+00 : f32
    %213 = vector.broadcast %cst_83 : f32 to vector<16x128xf32>
    %214 = arith.addf %212, %213 : vector<16x128xf32>
    %cst_84 = arith.constant 5.000000e-01 : f32
    %215 = vector.broadcast %cst_84 : f32 to vector<16x128xf32>
    %216 = arith.mulf %215, %214 : vector<16x128xf32>
    %217 = arith.mulf %206, %177 : vector<16x128xf32>
    %218 = arith.mulf %198, %208 : vector<16x128xf32>
    %219 = arith.addf %217, %218 : vector<16x128xf32>
    %220 = math.tanh %219 : vector<16x128xf32>
    %221 = arith.mulf %216, %220 : vector<16x128xf32>
    %222 = arith.truncf %221 : vector<16x128xf32> to vector<16x128xbf16>
    %223 = arith.index_cast %c4_i32 : i32 to index
    %c0_85 = arith.constant 0 : index
    %c0_86 = arith.constant 0 : index
    %224 = vector.load %arg8[%223, %c0_85, %c0_86] : memref<8x16x128xbf16, #tpu.memory_space<vmem>>, vector<1x16x128xbf16>
    %225 = vector.shape_cast %224 : vector<1x16x128xbf16> to vector<16x128xbf16>
    %226 = vector.shape_cast %222 : vector<16x128xbf16> to vector<1x16x128xbf16>
    tpu.vector_store %arg8[%223, %c0_85, %c0_86], %226 {strides = array<i32>} : memref<8x16x128xbf16, #tpu.memory_space<vmem>>, vector<1x16x128xbf16>,
    %c5_i32 = arith.constant 5 : i32
    %227 = arith.index_cast %c5_i32 : i32 to index
    %c0_87 = arith.constant 0 : index
    %c0_88 = arith.constant 0 : index
    %228 = vector.load %arg13[%227, %c0_87, %c0_88] : memref<8x16x512xbf16, #tpu.memory_space<vmem>>, vector<1x16x512xbf16>
    %229 = vector.shape_cast %228 : vector<1x16x512xbf16> to vector<16x512xbf16>
    %cst_89 = arith.constant dense<0.000000e+00> : vector<16x512xf32>
    %230 = tpu.matmul %222, %13, %cst_89 {dimension_numbers = #tpu.dot_dimension_numbers<[1], [0], [0], [1], [0, 0, 1, 1], [], []>} : vector<16x128xbf16>, vector<128x512xbf16>, vector<16x512xf32> -> vector<16x512xf32>
    %231 = arith.extf %229 : vector<16x512xbf16> to vector<16x512xf32>
    %232 = arith.addf %231, %230 : vector<16x512xf32>
    %233 = vector.extract_strided_slice %232 {offsets = [0, 0], sizes = [16, 128], strides = [1, 1]} : vector<16x512xf32> to vector<16x128xf32>
    %cst_90 = arith.constant 5.000000e-01 : f32
    %234 = vector.broadcast %cst_90 : f32 to vector<16x128xf32>
    %235 = arith.mulf %234, %233 : vector<16x128xf32>
    %236 = math.tanh %235 : vector<16x128xf32>
    %cst_91 = arith.constant 1.000000e+00 : f32
    %237 = vector.broadcast %cst_91 : f32 to vector<16x128xf32>
    %238 = arith.addf %236, %237 : vector<16x128xf32>
    %cst_92 = arith.constant 5.000000e-01 : f32
    %239 = vector.broadcast %cst_92 : f32 to vector<16x128xf32>
    %240 = arith.mulf %239, %238 : vector<16x128xf32>
    %241 = vector.extract_strided_slice %232 {offsets = [0, 128], sizes = [16, 128], strides = [1, 1]} : vector<16x512xf32> to vector<16x128xf32>
    %cst_93 = arith.constant 5.000000e-01 : f32
    %242 = vector.broadcast %cst_93 : f32 to vector<16x128xf32>
    %243 = arith.mulf %242, %241 : vector<16x128xf32>
    %244 = math.tanh %243 : vector<16x128xf32>
    %cst_94 = arith.constant 1.000000e+00 : f32
    %245 = vector.broadcast %cst_94 : f32 to vector<16x128xf32>
    %246 = arith.addf %244, %245 : vector<16x128xf32>
    %cst_95 = arith.constant 5.000000e-01 : f32
    %247 = vector.broadcast %cst_95 : f32 to vector<16x128xf32>
    %248 = arith.mulf %247, %246 : vector<16x128xf32>
    %249 = vector.extract_strided_slice %232 {offsets = [0, 256], sizes = [16, 128], strides = [1, 1]} : vector<16x512xf32> to vector<16x128xf32>
    %250 = math.tanh %249 : vector<16x128xf32>
    %251 = vector.extract_strided_slice %232 {offsets = [0, 384], sizes = [16, 128], strides = [1, 1]} : vector<16x512xf32> to vector<16x128xf32>
    %cst_96 = arith.constant 5.000000e-01 : f32
    %252 = vector.broadcast %cst_96 : f32 to vector<16x128xf32>
    %253 = arith.mulf %252, %251 : vector<16x128xf32>
    %254 = math.tanh %253 : vector<16x128xf32>
    %cst_97 = arith.constant 1.000000e+00 : f32
    %255 = vector.broadcast %cst_97 : f32 to vector<16x128xf32>
    %256 = arith.addf %254, %255 : vector<16x128xf32>
    %cst_98 = arith.constant 5.000000e-01 : f32
    %257 = vector.broadcast %cst_98 : f32 to vector<16x128xf32>
    %258 = arith.mulf %257, %256 : vector<16x128xf32>
    %259 = arith.mulf %248, %219 : vector<16x128xf32>
    %260 = arith.mulf %240, %250 : vector<16x128xf32>
    %261 = arith.addf %259, %260 : vector<16x128xf32>
    %262 = math.tanh %261 : vector<16x128xf32>
    %263 = arith.mulf %258, %262 : vector<16x128xf32>
    %264 = arith.truncf %263 : vector<16x128xf32> to vector<16x128xbf16>
    %265 = arith.index_cast %c5_i32 : i32 to index
    %c0_99 = arith.constant 0 : index
    %c0_100 = arith.constant 0 : index
    %266 = vector.load %arg8[%265, %c0_99, %c0_100] : memref<8x16x128xbf16, #tpu.memory_space<vmem>>, vector<1x16x128xbf16>
    %267 = vector.shape_cast %266 : vector<1x16x128xbf16> to vector<16x128xbf16>
    %268 = vector.shape_cast %264 : vector<16x128xbf16> to vector<1x16x128xbf16>
    tpu.vector_store %arg8[%265, %c0_99, %c0_100], %268 {strides = array<i32>} : memref<8x16x128xbf16, #tpu.memory_space<vmem>>, vector<1x16x128xbf16>,
    %c6_i32 = arith.constant 6 : i32
    %269 = arith.index_cast %c6_i32 : i32 to index
    %c0_101 = arith.constant 0 : index
    %c0_102 = arith.constant 0 : index
    %270 = vector.load %arg13[%269, %c0_101, %c0_102] : memref<8x16x512xbf16, #tpu.memory_space<vmem>>, vector<1x16x512xbf16>
    %271 = vector.shape_cast %270 : vector<1x16x512xbf16> to vector<16x512xbf16>
    %cst_103 = arith.constant dense<0.000000e+00> : vector<16x512xf32>
    %272 = tpu.matmul %264, %13, %cst_103 {dimension_numbers = #tpu.dot_dimension_numbers<[1], [0], [0], [1], [0, 0, 1, 1], [], []>} : vector<16x128xbf16>, vector<128x512xbf16>, vector<16x512xf32> -> vector<16x512xf32>
    %273 = arith.extf %271 : vector<16x512xbf16> to vector<16x512xf32>
    %274 = arith.addf %273, %272 : vector<16x512xf32>
    %275 = vector.extract_strided_slice %274 {offsets = [0, 0], sizes = [16, 128], strides = [1, 1]} : vector<16x512xf32> to vector<16x128xf32>
    %cst_104 = arith.constant 5.000000e-01 : f32
    %276 = vector.broadcast %cst_104 : f32 to vector<16x128xf32>
    %277 = arith.mulf %276, %275 : vector<16x128xf32>
    %278 = math.tanh %277 : vector<16x128xf32>
    %cst_105 = arith.constant 1.000000e+00 : f32
    %279 = vector.broadcast %cst_105 : f32 to vector<16x128xf32>
    %280 = arith.addf %278, %279 : vector<16x128xf32>
    %cst_106 = arith.constant 5.000000e-01 : f32
    %281 = vector.broadcast %cst_106 : f32 to vector<16x128xf32>
    %282 = arith.mulf %281, %280 : vector<16x128xf32>
    %283 = vector.extract_strided_slice %274 {offsets = [0, 128], sizes = [16, 128], strides = [1, 1]} : vector<16x512xf32> to vector<16x128xf32>
    %cst_107 = arith.constant 5.000000e-01 : f32
    %284 = vector.broadcast %cst_107 : f32 to vector<16x128xf32>
    %285 = arith.mulf %284, %283 : vector<16x128xf32>
    %286 = math.tanh %285 : vector<16x128xf32>
    %cst_108 = arith.constant 1.000000e+00 : f32
    %287 = vector.broadcast %cst_108 : f32 to vector<16x128xf32>
    %288 = arith.addf %286, %287 : vector<16x128xf32>
    %cst_109 = arith.constant 5.000000e-01 : f32
    %289 = vector.broadcast %cst_109 : f32 to vector<16x128xf32>
    %290 = arith.mulf %289, %288 : vector<16x128xf32>
    %291 = vector.extract_strided_slice %274 {offsets = [0, 256], sizes = [16, 128], strides = [1, 1]} : vector<16x512xf32> to vector<16x128xf32>
    %292 = math.tanh %291 : vector<16x128xf32>
    %293 = vector.extract_strided_slice %274 {offsets = [0, 384], sizes = [16, 128], strides = [1, 1]} : vector<16x512xf32> to vector<16x128xf32>
    %cst_110 = arith.constant 5.000000e-01 : f32
    %294 = vector.broadcast %cst_110 : f32 to vector<16x128xf32>
    %295 = arith.mulf %294, %293 : vector<16x128xf32>
    %296 = math.tanh %295 : vector<16x128xf32>
    %cst_111 = arith.constant 1.000000e+00 : f32
    %297 = vector.broadcast %cst_111 : f32 to vector<16x128xf32>
    %298 = arith.addf %296, %297 : vector<16x128xf32>
    %cst_112 = arith.constant 5.000000e-01 : f32
    %299 = vector.broadcast %cst_112 : f32 to vector<16x128xf32>
    %300 = arith.mulf %299, %298 : vector<16x128xf32>
    %301 = arith.mulf %290, %261 : vector<16x128xf32>
    %302 = arith.mulf %282, %292 : vector<16x128xf32>
    %303 = arith.addf %301, %302 : vector<16x128xf32>
    %304 = math.tanh %303 : vector<16x128xf32>
    %305 = arith.mulf %300, %304 : vector<16x128xf32>
    %306 = arith.truncf %305 : vector<16x128xf32> to vector<16x128xbf16>
    %307 = arith.index_cast %c6_i32 : i32 to index
    %c0_113 = arith.constant 0 : index
    %c0_114 = arith.constant 0 : index
    %308 = vector.load %arg8[%307, %c0_113, %c0_114] : memref<8x16x128xbf16, #tpu.memory_space<vmem>>, vector<1x16x128xbf16>
    %309 = vector.shape_cast %308 : vector<1x16x128xbf16> to vector<16x128xbf16>
    %310 = vector.shape_cast %306 : vector<16x128xbf16> to vector<1x16x128xbf16>
    tpu.vector_store %arg8[%307, %c0_113, %c0_114], %310 {strides = array<i32>} : memref<8x16x128xbf16, #tpu.memory_space<vmem>>, vector<1x16x128xbf16>,
    %c7_i32 = arith.constant 7 : i32
    %311 = arith.index_cast %c7_i32 : i32 to index
    %c0_115 = arith.constant 0 : index
    %c0_116 = arith.constant 0 : index
    %312 = vector.load %arg13[%311, %c0_115, %c0_116] : memref<8x16x512xbf16, #tpu.memory_space<vmem>>, vector<1x16x512xbf16>
    %313 = vector.shape_cast %312 : vector<1x16x512xbf16> to vector<16x512xbf16>
    %cst_117 = arith.constant dense<0.000000e+00> : vector<16x512xf32>
    %314 = tpu.matmul %306, %13, %cst_117 {dimension_numbers = #tpu.dot_dimension_numbers<[1], [0], [0], [1], [0, 0, 1, 1], [], []>} : vector<16x128xbf16>, vector<128x512xbf16>, vector<16x512xf32> -> vector<16x512xf32>
    %315 = arith.extf %313 : vector<16x512xbf16> to vector<16x512xf32>
    %316 = arith.addf %315, %314 : vector<16x512xf32>
    %317 = vector.extract_strided_slice %316 {offsets = [0, 0], sizes = [16, 128], strides = [1, 1]} : vector<16x512xf32> to vector<16x128xf32>
    %cst_118 = arith.constant 5.000000e-01 : f32
    %318 = vector.broadcast %cst_118 : f32 to vector<16x128xf32>
    %319 = arith.mulf %318, %317 : vector<16x128xf32>
    %320 = math.tanh %319 : vector<16x128xf32>
    %cst_119 = arith.constant 1.000000e+00 : f32
    %321 = vector.broadcast %cst_119 : f32 to vector<16x128xf32>
    %322 = arith.addf %320, %321 : vector<16x128xf32>
    %cst_120 = arith.constant 5.000000e-01 : f32
    %323 = vector.broadcast %cst_120 : f32 to vector<16x128xf32>
    %324 = arith.mulf %323, %322 : vector<16x128xf32>
    %325 = vector.extract_strided_slice %316 {offsets = [0, 128], sizes = [16, 128], strides = [1, 1]} : vector<16x512xf32> to vector<16x128xf32>
    %cst_121 = arith.constant 5.000000e-01 : f32
    %326 = vector.broadcast %cst_121 : f32 to vector<16x128xf32>
    %327 = arith.mulf %326, %325 : vector<16x128xf32>
    %328 = math.tanh %327 : vector<16x128xf32>
    %cst_122 = arith.constant 1.000000e+00 : f32
    %329 = vector.broadcast %cst_122 : f32 to vector<16x128xf32>
    %330 = arith.addf %328, %329 : vector<16x128xf32>
    %cst_123 = arith.constant 5.000000e-01 : f32
    %331 = vector.broadcast %cst_123 : f32 to vector<16x128xf32>
    %332 = arith.mulf %331, %330 : vector<16x128xf32>
    %333 = vector.extract_strided_slice %316 {offsets = [0, 256], sizes = [16, 128], strides = [1, 1]} : vector<16x512xf32> to vector<16x128xf32>
    %334 = math.tanh %333 : vector<16x128xf32>
    %335 = vector.extract_strided_slice %316 {offsets = [0, 384], sizes = [16, 128], strides = [1, 1]} : vector<16x512xf32> to vector<16x128xf32>
    %cst_124 = arith.constant 5.000000e-01 : f32
    %336 = vector.broadcast %cst_124 : f32 to vector<16x128xf32>
    %337 = arith.mulf %336, %335 : vector<16x128xf32>
    %338 = math.tanh %337 : vector<16x128xf32>
    %cst_125 = arith.constant 1.000000e+00 : f32
    %339 = vector.broadcast %cst_125 : f32 to vector<16x128xf32>
    %340 = arith.addf %338, %339 : vector<16x128xf32>
    %cst_126 = arith.constant 5.000000e-01 : f32
    %341 = vector.broadcast %cst_126 : f32 to vector<16x128xf32>
    %342 = arith.mulf %341, %340 : vector<16x128xf32>
    %343 = arith.mulf %332, %303 : vector<16x128xf32>
    %344 = arith.mulf %324, %334 : vector<16x128xf32>
    %345 = arith.addf %343, %344 : vector<16x128xf32>
    %346 = math.tanh %345 : vector<16x128xf32>
    %347 = arith.mulf %342, %346 : vector<16x128xf32>
    %348 = arith.truncf %347 : vector<16x128xf32> to vector<16x128xbf16>
    %349 = arith.index_cast %c7_i32 : i32 to index
    %c0_127 = arith.constant 0 : index
    %c0_128 = arith.constant 0 : index
    %350 = vector.load %arg8[%349, %c0_127, %c0_128] : memref<8x16x128xbf16, #tpu.memory_space<vmem>>, vector<1x16x128xbf16>
    %351 = vector.shape_cast %350 : vector<1x16x128xbf16> to vector<16x128xbf16>
    %352 = vector.shape_cast %348 : vector<16x128xbf16> to vector<1x16x128xbf16>
    tpu.vector_store %arg8[%349, %c0_127, %c0_128], %352 {strides = array<i32>} : memref<8x16x128xbf16, #tpu.memory_space<vmem>>, vector<1x16x128xbf16>,
    %c8_i32 = arith.constant 8 : i32
    %c0_129 = arith.constant 0 : index
    %c0_130 = arith.constant 0 : index
    %353 = vector.load %arg11[%c0_129, %c0_130] : memref<16x128xf32, #tpu.memory_space<vmem>>, vector<16x128xf32>
    tpu.vector_store %arg11[%c0_129, %c0_130], %347 {strides = array<i32>} : memref<16x128xf32, #tpu.memory_space<vmem>>, vector<16x128xf32>,
    %c0_131 = arith.constant 0 : index
    %c0_132 = arith.constant 0 : index
    %354 = vector.load %arg12[%c0_131, %c0_132] : memref<16x128xf32, #tpu.memory_space<vmem>>, vector<16x128xf32>
    tpu.vector_store %arg12[%c0_131, %c0_132], %345 {strides = array<i32>} : memref<16x128xf32, #tpu.memory_space<vmem>>, vector<16x128xf32>,
    %c0_i32_133 = arith.constant 0 : i32
    %355 = arith.cmpi eq, %arg1, %c0_i32_133 : i32
    %356 = arith.extui %355 : i1 to i32
    %c0_i32_134 = arith.constant 0 : i32
    %357 = arith.cmpi ne, %356, %c0_i32_134 : i32
    scf.if %357 {
      %c0_135 = arith.constant 0 : index
      %c0_136 = arith.constant 0 : index
      %358 = vector.load %arg9[%c0_135, %c0_136] : memref<16x128xf32, #tpu.memory_space<vmem>>, vector<16x128xf32>
      tpu.vector_store %arg9[%c0_135, %c0_136], %347 {strides = array<i32>} : memref<16x128xf32, #tpu.memory_space<vmem>>, vector<16x128xf32>,
      %c0_137 = arith.constant 0 : index
      %c0_138 = arith.constant 0 : index
      %359 = vector.load %arg10[%c0_137, %c0_138] : memref<16x128xf32, #tpu.memory_space<vmem>>, vector<16x128xf32>
      tpu.vector_store %arg10[%c0_137, %c0_138], %345 {strides = array<i32>} : memref<16x128xf32, #tpu.memory_space<vmem>>, vector<16x128xf32>,
    } else {
    }
    return
  }
  func.func @transform_0(%arg0: i32, %arg1: i32) -> (i32, i32, i32) {
    %c0_i32 = arith.constant 0 : i32
    %c0_i32_0 = arith.constant 0 : i32
    return %arg1, %arg0, %c0_i32 : i32, i32, i32
  }
  func.func @transform_1(%arg0: i32, %arg1: i32) -> (i32, i32) {
    %c0_i32 = arith.constant 0 : i32
    %c0_i32_0 = arith.constant 0 : i32
    %c0_i32_1 = arith.constant 0 : i32
    return %c0_i32, %c0_i32_0 : i32, i32
  }
  func.func @transform_2(%arg0: i32, %arg1: i32) -> (i32, i32) {
    %c0_i32 = arith.constant 0 : i32
    %c0_i32_0 = arith.constant 0 : i32
    %c0_i32_1 = arith.constant 0 : i32
    return %c0_i32, %c0_i32_0 : i32, i32
  }
  func.func @transform_3(%arg0: i32, %arg1: i32) -> (i32, i32) {
    %c0_i32 = arith.constant 0 : i32
    %c0_i32_0 = arith.constant 0 : i32
    %c0_i32_1 = arith.constant 0 : i32
    return %c0_i32, %c0_i32_0 : i32, i32
  }
  func.func @transform_4(%arg0: i32, %arg1: i32) -> (i32, i32) {
    %c0_i32 = arith.constant 0 : i32
    %c0_i32_0 = arith.constant 0 : i32
    return %arg0, %c0_i32 : i32, i32
  }
  func.func @transform_5(%arg0: i32, %arg1: i32) -> (i32, i32) {
    %c0_i32 = arith.constant 0 : i32
    %c0_i32_0 = arith.constant 0 : i32
    return %arg0, %c0_i32 : i32, i32
  }
  func.func @transform_6(%arg0: i32, %arg1: i32) -> (i32, i32, i32) {
    %c0_i32 = arith.constant 0 : i32
    %c0_i32_0 = arith.constant 0 : i32
    return %arg1, %arg0, %c0_i32 : i32, i32, i32
  }
  func.func @transform_7(%arg0: i32, %arg1: i32) -> (i32, i32) {
    %c0_i32 = arith.constant 0 : i32
    %c0_i32_0 = arith.constant 0 : i32
    return %arg0, %c0_i32 : i32, i32
  }
  func.func @transform_8(%arg0: i32, %arg1: i32) -> (i32, i32) {
    %c0_i32 = arith.constant 0 : i32
    %c0_i32_0 = arith.constant 0 : i32
    return %arg0, %c0_i32 : i32, i32
  }
}

</mosaic_0001>

<bundles_post_ra>
// kernel: lstm_network_forward.3
= control target key start
LH: loop header
LB: loop body
LE: loop exit
PB: predicated region body
PF: predicated region fallthrough
CT: control target
= control target key end

     0   :  { %8 = vsyncpa [#allocation3], 0  ;;  %s603_s0 = inlined_call_operand.hbm [shape: bf16[16,8,128], index: 0, kind: input, shape index: {}]   ;;  %s604_s1 = inlined_call_operand.hbm [shape: bf16[128,128], index: 1, kind: input, shape index: {}]   ;;  %s605_s2 = inlined_call_operand.hbm [shape: f32[1,128], index: 2, kind: input, shape index: {}]   ;;  %s606_s3 = inlined_call_operand.hbm [shape: f32[16,8,128], index: 3, kind: output, shape index: {}]  }
   0x1   :  { %9 = vsyncpa [#allocation6], 0 }
   0x2   :  { %10 = vsyncpa [#allocation4], 0  ;;  %s520_s12 = smov [#allocation5]   ;;  %s521_s14 = smov [#allocation2]  }
   0x3   :  { %s28_s13 = sshll.u32 %s520_s12, 4  ;;  %s16_s15 = sshll.u32 %s521_s14, 4  ;;  %s29_s13 = int_to_ptr.vmem [resolvable:$true] %s28_s13  ;;  %s548_s15 = int_to_ptr.vmem [resolvable:$true] %s16_s15 }
   0x4   :  { %s426_s18 = scalar_lea.hbm %s604_s1, 1024 }
   0x5   :  { %p427_p0 = scmp.ne.s32.totalorder %s604_s1, %s426_s18  ;;  %p430_p1 = scmp.lt.u32.totalorder %s426_s18, %s604_s1 }
   0x7   :  { %p432_p2 = pnand %p430_p1, %p427_p0 }
   0x9   :  { %435 = shalt.err (!%p432_p2)
}
   0xa   :  { %s436_s23 = scalar_lea.vmem %s29_s13, 1024  ;;  %p441_p4 = scmp.lt.s32.totalorder %s29_s13, %s29_s13 }
   0xb   :  { %p437_p3 = scmp.ne.s32.totalorder %s29_s13, %s436_s23  ;;  %p442_p5 = scmp.lt.s32.totalorder %s436_s23, %s436_s23 }
   0xd   :  { %p443_p6 = por %p442_p5, %p441_p4 }
   0xf   :  { %p444_p7 = pnand %p443_p6, %p437_p3 }
  0x11   :  { %447 = shalt.err (!%p444_p7)
}
  0x12   :  { %s522_s24 = smov 64   ;;  %s523_s25 = smov 4  }
  0x13   :  { %34 = dma.hbm_to_vmem [thread:$0]  %s604_s1, 1024, %s29_s13, [#allocation6], %s522_s24, %s522_s24, %s523_s25  }
  0x14   :  { %s448_s30 = scalar_lea.hbm %s603_s0, 1024 }
  0x15   :  { %p449_p8 = scmp.ne.s32.totalorder %s603_s0, %s448_s30  ;;  %p452_p9 = scmp.lt.u32.totalorder %s448_s30, %s603_s0 }
  0x17   :  { %p454_p10 = pnand %p452_p9, %p449_p8 }
  0x19   :  { %457 = shalt.err (!%p454_p10)
}
  0x1a   :  { %s458_s8 = scalar_lea.vmem %s548_s15, 1024  ;;  %p463_p12 = scmp.lt.s32.totalorder %s548_s15, %s548_s15 }
  0x1b   :  { %p459_p11 = scmp.ne.s32.totalorder %s548_s15, %s458_s8  ;;  %p464_p13 = scmp.lt.s32.totalorder %s458_s8, %s458_s8 }
  0x1d   :  { %p465_p0 = por %p464_p13, %p463_p12 }
  0x1f   :  { %p466_p1 = pnand %p465_p0, %p459_p11 }
  0x21   :  { %469 = shalt.err (!%p466_p1)
}
  0x22   :  { %22 = dma.hbm_to_vmem [thread:$0]  %s603_s0, 1024, %s548_s15, [#allocation3], %s522_s24, %s522_s24, %s523_s25  }
  0x23   :  { %s524_s10 = smov [#allocation7]   ;;  %s470_s14 = scalar_lea.hbm %s605_s2, 16 }
  0x24   :  { %s41_s11 = sshll.u32 %s524_s10, 4  ;;  %p471_p2 = scmp.ne.s32.totalorder %s605_s2, %s470_s14  ;;  %s42_s11 = int_to_ptr.vmem [resolvable:$true] %s41_s11 }
  0x25   :  { %p474_p3 = scmp.lt.u32.totalorder %s470_s14, %s605_s2 }
  0x27   :  { %p476_p4 = pnand %p474_p3, %p471_p2 }
  0x29   :  { %479 = shalt.err (!%p476_p4)
}
  0x2a   :  { %s480_s20 = scalar_lea.vmem %s42_s11, 16  ;;  %s484_s0 = scalar_lea.vmem %s42_s11, 32 }
  0x2b   :  { %p481_p5 = scmp.ne.s32.totalorder %s42_s11, %s480_s20  ;;  %p485_p6 = scmp.lt.s32.totalorder %s42_s11, %s42_s11 }
  0x2c   :  { %p486_p7 = scmp.lt.s32.totalorder %s484_s0, %s480_s20 }
  0x2e   :  { %p487_p8 = por %p486_p7, %p485_p6 }
  0x30   :  { %p488_p9 = pnand %p487_p8, %p481_p5 }
  0x32   :  { %491 = shalt.err (!%p488_p9)
}
  0x33   :  { %44 = dma.hbm_to_vmem [thread:$0]  %s605_s2, 16, %s42_s11, [#allocation6]  }
  0x34   :  { %514 = dma.done.wait [#allocation3], 1024  }
  0x35   :  { %515 = vsyncadd [#allocation3], 4294966272 }
  0x36   :  { %516 = dma.done.wait [#allocation6], 1040  }
  0x37   :  { %517 = vsyncadd [#allocation6], 4294966256  ;;  %v410_v0 = vld [vmem:[#allocation5] sm:$0xff]   ;;  %v411_v1 = vld [vmem:[#allocation5 + $0x8] sm:$0xff]   ;;  %s525_s2 = smov [#allocation8]  }
  0x38   :  { %354 = vmatprep.subr.bf16.mxu0 %v410_v0  ;;  %386 = vmatprep.subr.bf16.mxu1 %v410_v0  ;;  %v412_v2 = vld [vmem:[#allocation5 + $0x10] sm:$0xff]   ;;  %v413_v3 = vld [vmem:[#allocation5 + $0x18] sm:$0xff]   ;;  %v418_v4 = vld [vmem:[#allocation2] sm:$0xff]   ;;  %s308_s22 = sshll.u32 %s525_s2, 4  ;;  %s309_s22 = int_to_ptr.vmem [resolvable:$true] %s308_s22 }
  0x39   :  { %355 = vmatpush3.bf16.msra.mxu0 %v410_v0  ;;  %394 = vmatpush3.bf16.msra.mxu1 %v410_v0  ;;  %v419_v5 = vld [vmem:[#allocation2 + $0x20] sm:$0xff]   ;;  %v415_v7 = vld [vmem:[#allocation5 + $0x28] sm:$0xff]   ;;  %v416_v8 = vld [vmem:[#allocation5 + $0x30] sm:$0xff]   ;;  %s492_s23 = scalar_lea.vmem %s309_s22, 2048  ;;  %p497_p11 = scmp.lt.s32.totalorder %s309_s22, %s309_s22 }
  0x3a   :  { %356 = vmatprep.subr.bf16.mxu0 %v411_v1  ;;  %387 = vmatprep.subr.bf16.mxu1 %v411_v1  ;;  %v414_v6 = vld [vmem:[#allocation5 + $0x20] sm:$0xff]   ;;  %v417_v9 = vld [vmem:[#allocation5 + $0x38] sm:$0xff]   ;;  %v420_v10 = vld [vmem:[#allocation2 + $0x8] sm:$0xff]   ;;  %p493_p10 = scmp.ne.s32.totalorder %s309_s22, %s492_s23  ;;  %p498_p12 = scmp.lt.s32.totalorder %s492_s23, %s492_s23 }
  0x3b   :  { %370 = vmatprep.mubr.bf16.mxu0 %v418_v4  ;;  %378 = vmatprep.mubr.bf16.mxu1 %v419_v5  ;;  %v421_v11 = vld [vmem:[#allocation2 + $0x28] sm:$0xff]   ;;  %v422_v12 = vld [vmem:[#allocation2 + $0x10] sm:$0xff]   ;;  %v424_v14 = vld [vmem:[#allocation2 + $0x18] sm:$0xff]  }
  0x3c   :  { %v423_v13 = vld [vmem:[#allocation2 + $0x30] sm:$0xff]   ;;  %v425_v15 = vld [vmem:[#allocation2 + $0x38] sm:$0xff]   ;;  %v321_v16 = vld [vmem:[#allocation7] ss:$0 sm:$0xff]  ;;  %p499_p13 = por %p498_p12, %p497_p11 }
  0x3d   :  { %357 = vmatpush3.bf16.msra.mxu0 %v411_v1  ;;  %395 = vmatpush3.bf16.msra.mxu1 %v411_v1 }
  0x3e   :  { %358 = vmatprep.subr.bf16.mxu0 %v412_v2  ;;  %388 = vmatprep.subr.bf16.mxu1 %v412_v2  ;;  %p500_p0 = pnand %p499_p13, %p493_p10 }
  0x41   :  { %359 = vmatpush3.bf16.msra.mxu0 %v412_v2  ;;  %396 = vmatpush3.bf16.msra.mxu1 %v412_v2 }
  0x42   :  { %360 = vmatprep.subr.bf16.mxu0 %v413_v3  ;;  %389 = vmatprep.subr.bf16.mxu1 %v413_v3 }
  0x45   :  { %361 = vmatpush3.bf16.msra.mxu0 %v413_v3  ;;  %397 = vmatpush3.bf16.msra.mxu1 %v413_v3 }
  0x46   :  { %362 = vmatprep.subr.bf16.mxu0 %v414_v6  ;;  %390 = vmatprep.subr.bf16.mxu1 %v414_v6 }
  0x49   :  { %363 = vmatpush3.bf16.msra.mxu0 %v414_v6  ;;  %398 = vmatpush3.bf16.msra.mxu1 %v414_v6 }
  0x4a   :  { %364 = vmatprep.subr.bf16.mxu0 %v415_v7  ;;  %391 = vmatprep.subr.bf16.mxu1 %v415_v7 }
  0x4d   :  { %365 = vmatpush3.bf16.msra.mxu0 %v415_v7  ;;  %399 = vmatpush3.bf16.msra.mxu1 %v415_v7 }
  0x4e   :  { %366 = vmatprep.subr.bf16.mxu0 %v416_v8  ;;  %392 = vmatprep.subr.bf16.mxu1 %v416_v8 }
  0x51   :  { %367 = vmatpush3.bf16.msra.mxu0 %v416_v8  ;;  %400 = vmatpush3.bf16.msra.mxu1 %v416_v8 }
  0x52   :  { %368 = vmatprep.subr.bf16.mxu0 %v417_v9  ;;  %393 = vmatprep.subr.bf16.mxu1 %v417_v9 }
  0x55   :  { %369 = vmatpush3.bf16.msra.mxu0 %v417_v9  ;;  %401 = vmatpush3.bf16.msra.mxu1 %v417_v9 }
  0x58   :  { %371 = vmatmul.mubr.bf16.vlgmr.msra.gmra.mrb[0].mxu0 %v420_v10  ;;  %379 = vmatmul.mubr.bf16.vlgmr.msra.gmra.mrb[0].mxu1 %v421_v11 }
  0x59   :  { %374 = vmatprep.mubr.bf16.mxu0 %v422_v12  ;;  %382 = vmatprep.mubr.bf16.mxu1 %v423_v13 }
  0x60   :  { %375 = vmatmul.mubr.bf16.gmra.mrb[4].mxu0 %v424_v14  ;;  %383 = vmatmul.mubr.bf16.gmra.mrb[4].mxu1 %v425_v15 }
 0x12b   :  { %v372_v17 = vpop.f32.mrb[0].mxu0  ;;  %v380_v18 = vpop.f32.mrb[0].mxu1 }
 0x12c   :  { %v233_v19 = vadd.f32 %v372_v17, %v321_v16  ;;  %v265_v20 = vadd.f32 %v380_v18, %v321_v16  ;;  %v224_v21 = vpop.f32.mrb[1].mxu0  ;;  %v256_v22 = vpop.f32.mrb[1].mxu1 }
 0x12d   :  { %v225_v23 = vadd.f32 %v321_v16, %v224_v21  ;;  %v257_v24 = vadd.f32 %v321_v16, %v256_v22  ;;  %v373_v25 = vpop.f32.mrb[2].mxu0  ;;  %v381_v26 = vpop.f32.mrb[2].mxu1 }
 0x12e   :  { %289 = vst [vmem:[#allocation8 + $0x10] sm:$0xff] %v233_v19  ;;  %297 = vst [vmem:[#allocation8 + $0x50] sm:$0xff] %v265_v20  ;;  %v236_v27 = vadd.f32 %v373_v25, %v321_v16  ;;  %v268_v28 = vadd.f32 %v381_v26, %v321_v16  ;;  %v227_v29 = vpop.f32.mrb[3].mxu0  ;;  %v259_v30 = vpop.f32.mrb[3].mxu1 }
 0x12f   :  { %287 = vst [vmem:[#allocation8] sm:$0xff] %v225_v23  ;;  %295 = vst [vmem:[#allocation8 + $0x40] sm:$0xff] %v257_v24  ;;  %v228_v31 = vadd.f32 %v321_v16, %v227_v29  ;;  %v260_v32 = vadd.f32 %v321_v16, %v259_v30 }
 0x130   :  { %290 = vst [vmem:[#allocation8 + $0x18] sm:$0xff] %v236_v27  ;;  %298 = vst [vmem:[#allocation8 + $0x58] sm:$0xff] %v268_v28 }
 0x131   :  { %288 = vst [vmem:[#allocation8 + $0x8] sm:$0xff] %v228_v31  ;;  %296 = vst [vmem:[#allocation8 + $0x48] sm:$0xff] %v260_v32 }
 0x133   :  { %v376_v33 = vpop.f32.mrb[4].mxu0  ;;  %v384_v34 = vpop.f32.mrb[4].mxu1 }
 0x134   :  { %v249_v35 = vadd.f32 %v376_v33, %v321_v16  ;;  %v281_v36 = vadd.f32 %v384_v34, %v321_v16  ;;  %v240_v37 = vpop.f32.mrb[5].mxu0  ;;  %v272_v38 = vpop.f32.mrb[5].mxu1 }
 0x135   :  { %v241_v39 = vadd.f32 %v321_v16, %v240_v37  ;;  %v273_v40 = vadd.f32 %v321_v16, %v272_v38  ;;  %v377_v41 = vpop.f32.mrb[6].mxu0  ;;  %v385_v42 = vpop.f32.mrb[6].mxu1 }
 0x136   :  { %293 = vst [vmem:[#allocation8 + $0x30] sm:$0xff] %v249_v35  ;;  %301 = vst [vmem:[#allocation8 + $0x70] sm:$0xff] %v281_v36  ;;  %v252_v43 = vadd.f32 %v377_v41, %v321_v16  ;;  %v284_v44 = vadd.f32 %v385_v42, %v321_v16  ;;  %v243_v45 = vpop.f32.mrb[7].mxu0  ;;  %v275_v46 = vpop.f32.mrb[7].mxu1 }
 0x137   :  { %291 = vst [vmem:[#allocation8 + $0x20] sm:$0xff] %v241_v39  ;;  %299 = vst [vmem:[#allocation8 + $0x60] sm:$0xff] %v273_v40  ;;  %v244_v47 = vadd.f32 %v321_v16, %v243_v45  ;;  %v276_v48 = vadd.f32 %v321_v16, %v275_v46 }
 0x138   :  { %294 = vst [vmem:[#allocation8 + $0x38] sm:$0xff] %v252_v43  ;;  %302 = vst [vmem:[#allocation8 + $0x78] sm:$0xff] %v284_v44 }
 0x139   :  { %292 = vst [vmem:[#allocation8 + $0x28] sm:$0xff] %v244_v47  ;;  %300 = vst [vmem:[#allocation8 + $0x68] sm:$0xff] %v276_v48 }
 0x13a   :  { %503 = shalt.err (!%p500_p0)
}
 0x13b   :  { %s504_s26 = scalar_lea.hbm %s606_s3, 2048 }
 0x13c   :  { %p505_p1 = scmp.ne.s32.totalorder %s606_s3, %s504_s26  ;;  %p508_p2 = scmp.lt.u32.totalorder %s504_s26, %s606_s3 }
 0x13e   :  { %p510_p3 = pnand %p508_p2, %p505_p1 }
 0x140   :  { %513 = shalt.err (!%p510_p3)
}
 0x141   :  { %s526_s4 = smov 128   ;;  %s527_s5 = smov 8  }
 0x142   :  { %314 = dma.vmem_to_hbm [thread:$0]  %s309_s22, 2048, %s606_s3, [#allocation4], %s526_s4, %s526_s4, %s527_s5  }
 0x143   :  { %518 = dma.done.wait [#allocation4], 2048  }
 0x144   :  { %519 = vsyncadd [#allocation4], 4294965248 }
 0x145   :  { %318 = vsyncpa [#allocation3], 1 }
 0x146   :  { %319 = vsyncpa [#allocation6], 1 }
 0x147   :  { %320 = vsyncpa [#allocation4], 1 }

// kernel: lstm_network_forward.2
= control target key start
LH: loop header
LB: loop body
LE: loop exit
PB: predicated region body
PF: predicated region fallthrough
CT: control target
= control target key end

     0   :  { %14 = vsyncpa [#allocation6], 0  ;;  %s3723_s0 = inlined_call_operand.hbm [shape: bf16[8,16,128], index: 0, kind: input, shape index: {}]   ;;  %s3724_s1 = inlined_call_operand.hbm [shape: bf16[128,512], index: 1, kind: input, shape index: {}]   ;;  %s3725_s2 = inlined_call_operand.hbm [shape: bf16[128,512], index: 2, kind: input, shape index: {}]   ;;  %s3726_s3 = inlined_call_operand.hbm [shape: f32[1,512], index: 3, kind: input, shape index: {}]   ;;  %s3727_s4 = inlined_call_operand.hbm [shape: f32[16,128], index: 4, kind: input, shape index: {}]   ;;  %s3728_s5 = inlined_call_operand.hbm [shape: f32[16,128], index: 5, kind: input, shape index: {}]   ;;  %s3729_s6 = inlined_call_operand.hbm [shape: bf16[8,16,128], index: 6, kind: output, shape index: {0}]   ;;  %s3730_s7 = inlined_call_operand.hbm [shape: f32[16,128], index: 7, kind: output, shape index: {1}]   ;;  %s3731_s8 = inlined_call_operand.hbm [shape: f32[16,128], index: 8, kind: output, shape index: {2}]  }
   0x1   :  { %15 = vsyncpa [#allocation9], 0 }
   0x2   :  { %16 = vsyncpa [#allocation12], 0 }
   0x3   :  { %17 = vsyncpa [#allocation15], 0 }
   0x4   :  { %18 = vsyncpa [#allocation7], 0 }
   0x5   :  { %19 = vsyncpa [#allocation18], 0  ;;  %s2844_s27 = smov [#allocation8]   ;;  %s2634_s9 = scalar_lea.hbm %s3724_s1, 4096 }
   0x6   :  { %s37_s28 = sshll.u32 %s2844_s27, 4  ;;  %p2635_p0 = scmp.ne.s32.totalorder %s3724_s1, %s2634_s9  ;;  %s38_s28 = int_to_ptr.vmem [resolvable:$true] %s37_s28 }
   0x7   :  { %p2638_p1 = scmp.lt.u32.totalorder %s2634_s9, %s3724_s1 }
   0x9   :  { %p2640_p2 = pnand %p2638_p1, %p2635_p0 }
   0xb   :  { %2643 = shalt.err (!%p2640_p2)
}
   0xc   :  { %s2644_s14 = scalar_lea.vmem %s38_s28, 4096  ;;  %p2649_p4 = scmp.lt.s32.totalorder %s38_s28, %s38_s28 }
   0xd   :  { %p2645_p3 = scmp.ne.s32.totalorder %s38_s28, %s2644_s14  ;;  %p2650_p5 = scmp.lt.s32.totalorder %s2644_s14, %s2644_s14 }
   0xf   :  { %p2651_p6 = por %p2650_p5, %p2649_p4 }
  0x11   :  { %p2652_p7 = pnand %p2651_p6, %p2645_p3 }
  0x13   :  { %2655 = shalt.err (!%p2652_p7)
}
  0x14   :  { %s2845_s15 = smov 256   ;;  %s2846_s16 = smov 16  }
  0x15   :  { %43 = dma.hbm_to_vmem [thread:$0]  %s3724_s1, 4096, %s38_s28, [#allocation9], %s2845_s15, %s2845_s15, %s2846_s16  }
  0x16   :  { %s2847_s19 = smov [#allocation11]   ;;  %s2848_s21 = smov [#allocation5]  }
  0x17   :  { %s62_s20 = sshll.u32 %s2847_s19, 4  ;;  %s25_s22 = sshll.u32 %s2848_s21, 4  ;;  %s63_s20 = int_to_ptr.vmem [resolvable:$true] %s62_s20  ;;  %s26_s22 = int_to_ptr.vmem [resolvable:$true] %s25_s22 }
  0x18   :  { %s2656_s25 = scalar_lea.hbm %s3726_s3, 64 }
  0x19   :  { %p2657_p8 = scmp.ne.s32.totalorder %s3726_s3, %s2656_s25  ;;  %p2660_p9 = scmp.lt.u32.totalorder %s2656_s25, %s3726_s3 }
  0x1b   :  { %p2662_p10 = pnand %p2660_p9, %p2657_p8 }
  0x1d   :  { %2665 = shalt.err (!%p2662_p10)
}
  0x1e   :  { %s2666_s1 = scalar_lea.vmem %s63_s20, 64  ;;  %p2671_p12 = scmp.lt.s32.totalorder %s63_s20, %s63_s20 }
  0x1f   :  { %p2667_p11 = scmp.ne.s32.totalorder %s63_s20, %s2666_s1  ;;  %p2672_p13 = scmp.lt.s32.totalorder %s2666_s1, %s2666_s1 }
  0x21   :  { %p2673_p0 = por %p2672_p13, %p2671_p12 }
  0x23   :  { %p2674_p1 = pnand %p2673_p0, %p2667_p11 }
  0x25   :  { %2677 = shalt.err (!%p2674_p1)
}
  0x26   :  { %65 = dma.hbm_to_vmem [thread:$0]  %s3726_s3, 64, %s63_s20, [#allocation12]  }
  0x27   :  { %s2678_s12 = scalar_lea.hbm %s3723_s0, 1024 }
  0x28   :  { %p2679_p2 = scmp.ne.s32.totalorder %s3723_s0, %s2678_s12  ;;  %p2682_p3 = scmp.lt.u32.totalorder %s2678_s12, %s3723_s0 }
  0x2a   :  { %p2684_p4 = pnand %p2682_p3, %p2679_p2 }
  0x2c   :  { %2687 = shalt.err (!%p2684_p4)
}
  0x2d   :  { %s2688_s19 = scalar_lea.vmem %s26_s22, 1024  ;;  %p2693_p6 = scmp.lt.s32.totalorder %s26_s22, %s26_s22 }
  0x2e   :  { %p2689_p5 = scmp.ne.s32.totalorder %s26_s22, %s2688_s19  ;;  %p2694_p7 = scmp.lt.s32.totalorder %s2688_s19, %s2688_s19 }
  0x30   :  { %p2695_p8 = por %p2694_p7, %p2693_p6 }
  0x32   :  { %p2696_p9 = pnand %p2695_p8, %p2689_p5 }
  0x34   :  { %2699 = shalt.err (!%p2696_p9)
}
  0x35   :  { %s2849_s3 = smov 64   ;;  %s2850_s20 = smov 4  }
  0x36   :  { %31 = dma.hbm_to_vmem [thread:$0]  %s3723_s0, 1024, %s26_s22, [#allocation6], %s2849_s3, %s2849_s3, %s2850_s20  }
  0x37   :  { %s2851_s24 = smov [#allocation10]   ;;  %s2852_s26 = smov [#allocation13]  }
  0x38   :  { %s49_s25 = sshll.u32 %s2851_s24, 4  ;;  %s71_s27 = sshll.u32 %s2852_s26, 4  ;;  %s50_s25 = int_to_ptr.vmem [resolvable:$true] %s49_s25  ;;  %s72_s27 = int_to_ptr.vmem [resolvable:$true] %s71_s27 }
  0x39   :  { %s2700_s1 = scalar_lea.hbm %s3725_s2, 4096 }
  0x3a   :  { %p2701_p10 = scmp.ne.s32.totalorder %s3725_s2, %s2700_s1  ;;  %p2704_p11 = scmp.lt.u32.totalorder %s2700_s1, %s3725_s2 }
  0x3c   :  { %p2706_p12 = pnand %p2704_p11, %p2701_p10 }
  0x3e   :  { %2709 = shalt.err (!%p2706_p12)
}
  0x3f   :  { %s2710_s0 = scalar_lea.vmem %s50_s25, 4096  ;;  %p2715_p0 = scmp.lt.s32.totalorder %s50_s25, %s50_s25 }
  0x40   :  { %p2711_p13 = scmp.ne.s32.totalorder %s50_s25, %s2710_s0  ;;  %p2716_p1 = scmp.lt.s32.totalorder %s2710_s0, %s2710_s0 }
  0x42   :  { %p2717_p2 = por %p2716_p1, %p2715_p0 }
  0x44   :  { %p2718_p3 = pnand %p2717_p2, %p2711_p13 }
  0x46   :  { %2721 = shalt.err (!%p2718_p3)
}
  0x47   :  { %55 = dma.hbm_to_vmem [thread:$0]  %s3725_s2, 4096, %s50_s25, [#allocation9], %s2845_s15, %s2845_s15, %s2846_s16  }
  0x48   :  { %s2722_s17 = scalar_lea.hbm %s3727_s4, 256 }
  0x49   :  { %p2723_p4 = scmp.ne.s32.totalorder %s3727_s4, %s2722_s17  ;;  %p2726_p5 = scmp.lt.u32.totalorder %s2722_s17, %s3727_s4 }
  0x4b   :  { %p2728_p6 = pnand %p2726_p5, %p2723_p4 }
  0x4d   :  { %2731 = shalt.err (!%p2728_p6)
}
  0x4e   :  { %s2732_s24 = scalar_lea.vmem %s72_s27, 256  ;;  %p2737_p8 = scmp.lt.s32.totalorder %s72_s27, %s72_s27 }
  0x4f   :  { %p2733_p7 = scmp.ne.s32.totalorder %s72_s27, %s2732_s24  ;;  %p2738_p9 = scmp.lt.s32.totalorder %s2732_s24, %s2732_s24 }
  0x51   :  { %p2739_p10 = por %p2738_p9, %p2737_p8 }
  0x53   :  { %p2740_p11 = pnand %p2739_p10, %p2733_p7 }
  0x55   :  { %2743 = shalt.err (!%p2740_p11)
}
  0x56   :  { %s2853_s2 = smov 128   ;;  %s2854_s15 = smov 8  }
  0x57   :  { %77 = dma.hbm_to_vmem [thread:$0]  %s3727_s4, 256, %s72_s27, [#allocation12], %s2853_s2, %s2853_s2, %s2854_s15  }
  0x58   :  { %s2855_s26 = smov [#allocation14]   ;;  %s2744_s28 = scalar_lea.hbm %s3728_s5, 256 }
  0x59   :  { %s83_s29 = sshll.u32 %s2855_s26, 4  ;;  %p2745_p12 = scmp.ne.s32.totalorder %s3728_s5, %s2744_s28  ;;  %s84_s29 = int_to_ptr.vmem [resolvable:$true] %s83_s29 }
  0x5a   :  { %p2748_p13 = scmp.lt.u32.totalorder %s2744_s28, %s3728_s5 }
  0x5c   :  { %p2750_p0 = pnand %p2748_p13, %p2745_p12 }
  0x5e   :  { %2753 = shalt.err (!%p2750_p0)
}
  0x5f   :  { %s2754_s22 = scalar_lea.vmem %s84_s29, 256  ;;  %p2759_p2 = scmp.lt.s32.totalorder %s84_s29, %s84_s29 }
  0x60   :  { %p2755_p1 = scmp.ne.s32.totalorder %s84_s29, %s2754_s22  ;;  %p2760_p3 = scmp.lt.s32.totalorder %s2754_s22, %s2754_s22 }
  0x62   :  { %p2761_p4 = por %p2760_p3, %p2759_p2 }
  0x64   :  { %p2762_p5 = pnand %p2761_p4, %p2755_p1 }
  0x66   :  { %2765 = shalt.err (!%p2762_p5)
}
  0x67   :  { %89 = dma.hbm_to_vmem [thread:$0]  %s3728_s5, 256, %s84_s29, [#allocation15], %s2853_s2, %s2853_s2, %s2854_s15  }
  0x68   :  { %2832 = dma.done.wait [#allocation6], 1024  }
  0x69   :  { %2833 = vsyncadd [#allocation6], 4294966272 }
  0x6a   :  { %2834 = dma.done.wait [#allocation9], 8192  }
  0x6b   :  { %2835 = vsyncadd [#allocation9], 4294959104 }
  0x6c   :  { %2836 = dma.done.wait [#allocation12], 320  }
  0x6d   :  { %2837 = vsyncadd [#allocation12], 4294966976 }
  0x6e   :  { %2838 = dma.done.wait [#allocation15], 256  }
  0x6f   :  { %2839 = vsyncadd [#allocation15], 4294967040  ;;  %v3732_v0 = vmov 0   ;;  %v2338_v1 = vld [vmem:[#allocation8 + $0x4] ss:$16 sps:$4 sm:$0xff]   ;;  %v2392_v43 = vld [vmem:[#allocation5 + $0x8] sm:$0xff]  }
  0x70   :  { %431 = vmatprep.mubr.bf16.mxu0 %v3732_v0  ;;  %544 = vmatprep.mubr.bf16.mxu1 %v3732_v0  ;;  %v2340_v2 = vld [vmem:[#allocation8 + $0xc] ss:$16 sps:$4 sm:$0xff]   ;;  %v2342_v3 = vld [vmem:[#allocation8] ss:$16 sps:$4 sm:$0xff]   ;;  %v2343_v4 = vld [vmem:[#allocation8 + $0x8] ss:$16 sps:$4 sm:$0xff]  }
  0x71   :  { %399 = vmatprep.subr.bf16.mxu0 %v2338_v1  ;;  %512 = vmatprep.subr.bf16.mxu1 %v2340_v2  ;;  %v2344_v5 = vld [vmem:[#allocation8 + $0x24] ss:$16 sps:$4 sm:$0xff]   ;;  %v2346_v6 = vld [vmem:[#allocation8 + $0x2c] ss:$16 sps:$4 sm:$0xff]   ;;  %v2348_v7 = vld [vmem:[#allocation8 + $0x20] ss:$16 sps:$4 sm:$0xff]  }
  0x72   :  { %400 = vmatpush1.bf16.msra.mxu0 %v2342_v3  ;;  %513 = vmatpush1.bf16.msra.mxu1 %v2343_v4  ;;  %v2349_v8 = vld [vmem:[#allocation8 + $0x28] ss:$16 sps:$4 sm:$0xff]   ;;  %v2350_v9 = vld [vmem:[#allocation8 + $0x44] ss:$16 sps:$4 sm:$0xff]   ;;  %v2352_v10 = vld [vmem:[#allocation8 + $0x4c] ss:$16 sps:$4 sm:$0xff]  }
  0x73   :  { %401 = vmatprep.subr.bf16.mxu0 %v2344_v5  ;;  %514 = vmatprep.subr.bf16.mxu1 %v2346_v6  ;;  %v2354_v11 = vld [vmem:[#allocation8 + $0x40] ss:$16 sps:$4 sm:$0xff]   ;;  %v2355_v12 = vld [vmem:[#allocation8 + $0x48] ss:$16 sps:$4 sm:$0xff]   ;;  %v2356_v13 = vld [vmem:[#allocation8 + $0x64] ss:$16 sps:$4 sm:$0xff]  }
  0x74   :  { %v2358_v14 = vld [vmem:[#allocation8 + $0x6c] ss:$16 sps:$4 sm:$0xff]   ;;  %v2360_v15 = vld [vmem:[#allocation8 + $0x60] ss:$16 sps:$4 sm:$0xff]   ;;  %v2361_v16 = vld [vmem:[#allocation8 + $0x68] ss:$16 sps:$4 sm:$0xff]  }
  0x75   :  { %v2362_v17 = vld [vmem:[#allocation8 + $0x84] ss:$16 sps:$4 sm:$0xff]   ;;  %v2364_v18 = vld [vmem:[#allocation8 + $0x8c] ss:$16 sps:$4 sm:$0xff]   ;;  %v2366_v19 = vld [vmem:[#allocation8 + $0x80] ss:$16 sps:$4 sm:$0xff]  }
  0x76   :  { %402 = vmatpush1.bf16.msra.mxu0 %v2348_v7  ;;  %515 = vmatpush1.bf16.msra.mxu1 %v2349_v8  ;;  %v2367_v20 = vld [vmem:[#allocation8 + $0x88] ss:$16 sps:$4 sm:$0xff]   ;;  %v2368_v21 = vld [vmem:[#allocation8 + $0xa4] ss:$16 sps:$4 sm:$0xff]   ;;  %v2370_v22 = vld [vmem:[#allocation8 + $0xac] ss:$16 sps:$4 sm:$0xff]  }
  0x77   :  { %403 = vmatprep.subr.bf16.mxu0 %v2350_v9  ;;  %516 = vmatprep.subr.bf16.mxu1 %v2352_v10  ;;  %v2372_v23 = vld [vmem:[#allocation8 + $0xa0] ss:$16 sps:$4 sm:$0xff]   ;;  %v2373_v24 = vld [vmem:[#allocation8 + $0xa8] ss:$16 sps:$4 sm:$0xff]   ;;  %v2374_v25 = vld [vmem:[#allocation8 + $0xc4] ss:$16 sps:$4 sm:$0xff]  }
  0x78   :  { %v2376_v26 = vld [vmem:[#allocation8 + $0xcc] ss:$16 sps:$4 sm:$0xff]   ;;  %v2378_v27 = vld [vmem:[#allocation8 + $0xc0] ss:$16 sps:$4 sm:$0xff]   ;;  %v2379_v28 = vld [vmem:[#allocation8 + $0xc8] ss:$16 sps:$4 sm:$0xff]  }
  0x79   :  { %v2380_v29 = vld [vmem:[#allocation8 + $0xe4] ss:$16 sps:$4 sm:$0xff]   ;;  %v2382_v30 = vld [vmem:[#allocation8 + $0xec] ss:$16 sps:$4 sm:$0xff]   ;;  %v2384_v31 = vld [vmem:[#allocation8 + $0xe0] ss:$16 sps:$4 sm:$0xff]  }
  0x7a   :  { %404 = vmatpush1.bf16.msra.mxu0 %v2354_v11  ;;  %517 = vmatpush1.bf16.msra.mxu1 %v2355_v12  ;;  %v2385_v32 = vld [vmem:[#allocation8 + $0xe8] ss:$16 sps:$4 sm:$0xff]   ;;  %v2994_v33 = vld [vmem:[#allocation10 + $0x4] ss:$16 sps:$4 sm:$0xff]   ;;  %v2996_v34 = vld [vmem:[#allocation10 + $0xc] ss:$16 sps:$4 sm:$0xff]  }
  0x7b   :  { %405 = vmatprep.subr.bf16.mxu0 %v2356_v13  ;;  %518 = vmatprep.subr.bf16.mxu1 %v2358_v14  ;;  %v2386_v35 = vld [vmem:[#allocation5] sm:$0xff]   ;;  %v3004_v38 = vld [vmem:[#allocation10 + $0x8] ss:$16 sps:$4 sm:$0xff]   ;;  %v3006_v39 = vld [vmem:[#allocation10 + $0x2c] ss:$16 sps:$4 sm:$0xff]   ;;  %v171_v13 = vlaneseq  ;;  %s2857_s5 = smov [#allocation17]  }
  0x7c   :  { %v2998_v36 = vld [vmem:[#allocation10] ss:$16 sps:$4 sm:$0xff]   ;;  %v3002_v37 = vld [vmem:[#allocation10 + $0x24] ss:$16 sps:$4 sm:$0xff]   ;;  %v3017_v42 = vld [vmem:[#allocation10 + $0x28] ss:$16 sps:$4 sm:$0xff]  }
  0x7d   :  { %v3010_v40 = vld [vmem:[#allocation10 + $0x20] ss:$16 sps:$4 sm:$0xff]   ;;  %v3014_v41 = vld [vmem:[#allocation10 + $0x44] ss:$16 sps:$4 sm:$0xff]   ;;  %v3024_v45 = vld [vmem:[#allocation10 + $0x4c] ss:$16 sps:$4 sm:$0xff]  }
  0x7e   :  { %406 = vmatpush1.bf16.msra.mxu0 %v2360_v15  ;;  %519 = vmatpush1.bf16.msra.mxu1 %v2361_v16  ;;  %v3022_v44 = vld [vmem:[#allocation10 + $0x40] ss:$16 sps:$4 sm:$0xff]   ;;  %v3026_v46 = vld [vmem:[#allocation10 + $0x64] ss:$16 sps:$4 sm:$0xff]   ;;  %v3029_v47 = vld [vmem:[#allocation10 + $0x48] ss:$16 sps:$4 sm:$0xff]  }
  0x7f   :  { %407 = vmatprep.subr.bf16.mxu0 %v2362_v17  ;;  %520 = vmatprep.subr.bf16.mxu1 %v2364_v18  ;;  %v3031_v48 = vld [vmem:[#allocation10 + $0x6c] ss:$16 sps:$4 sm:$0xff]   ;;  %v3037_v49 = vld [vmem:[#allocation10 + $0x60] ss:$16 sps:$4 sm:$0xff]   ;;  %v3039_v50 = vld [vmem:[#allocation10 + $0x84] ss:$16 sps:$4 sm:$0xff]  }
  0x80   :  { %v3043_v51 = vld [vmem:[#allocation10 + $0x68] ss:$16 sps:$4 sm:$0xff]   ;;  %v2399_v52 = vld [vmem:[#allocation5 + $0x10] sm:$0xff]   ;;  %v3049_v54 = vld [vmem:[#allocation10 + $0x8c] ss:$16 sps:$4 sm:$0xff]   ;;  %v172_v14 = vshrl.u32 %v171_v13, 7 }
  0x81   :  { %v3046_v53 = vld [vmem:[#allocation10 + $0x80] ss:$16 sps:$4 sm:$0xff]   ;;  %v3053_v55 = vld [vmem:[#allocation10 + $0xa4] ss:$16 sps:$4 sm:$0xff]   ;;  %v3055_v56 = vld [vmem:[#allocation10 + $0x88] ss:$16 sps:$4 sm:$0xff]  }
  0x82   :  { %408 = vmatpush1.bf16.msra.mxu0 %v2366_v19  ;;  %521 = vmatpush1.bf16.msra.mxu1 %v2367_v20  ;;  %v3057_v57 = vld [vmem:[#allocation10 + $0xac] ss:$16 sps:$4 sm:$0xff]   ;;  %v3063_v58 = vld [vmem:[#allocation10 + $0xa0] ss:$16 sps:$4 sm:$0xff]   ;;  %v3067_v59 = vld [vmem:[#allocation10 + $0xc4] ss:$16 sps:$4 sm:$0xff]  }
  0x83   :  { %409 = vmatprep.subr.bf16.mxu0 %v2368_v21  ;;  %522 = vmatprep.subr.bf16.mxu1 %v2370_v22  ;;  %v3069_v60 = vld [vmem:[#allocation10 + $0xa8] ss:$16 sps:$4 sm:$0xff]   ;;  %v3073_v62 = vld [vmem:[#allocation10 + $0xc0] ss:$16 sps:$4 sm:$0xff]   ;;  %v3075_v63 = vld [vmem:[#allocation10 + $0xcc] ss:$16 sps:$4 sm:$0xff]  }
  0x84   :  { %v2406_v61 = vld [vmem:[#allocation5 + $0x18] sm:$0xff]   ;;  %v3079_v1 = vld [vmem:[#allocation10 + $0xe4] ss:$16 sps:$4 sm:$0xff]   ;;  %v3089_v4 = vld [vmem:[#allocation10 + $0xe0] ss:$16 sps:$4 sm:$0xff]   ;;  %v181_v15 = vsub.s32 2, %v172_v14 }
  0x85   :  { %v3081_v2 = vld [vmem:[#allocation10 + $0xc8] ss:$16 sps:$4 sm:$0xff]   ;;  %v3083_v3 = vld [vmem:[#allocation10 + $0xec] ss:$16 sps:$4 sm:$0xff]   ;;  %v2413_v6 = vld [vmem:[#allocation5 + $0x20] sm:$0xff]   ;;  %v185_v16 = vsub.s32 3, %v172_v14 }
  0x86   :  { %410 = vmatpush1.bf16.msra.mxu0 %v2372_v23  ;;  %523 = vmatpush1.bf16.msra.mxu1 %v2373_v24  ;;  %v3093_v5 = vld [vmem:[#allocation10 + $0xe8] ss:$16 sps:$4 sm:$0xff]   ;;  %v2427_v8 = vld [vmem:[#allocation5 + $0x30] sm:$0xff]   ;;  %v173_v17 = vsub.s32 0, %v172_v14  ;;  %v169_v18 = vld [vmem:[#allocation11] sm:$0xf] }
  0x87   :  { %411 = vmatprep.subr.bf16.mxu0 %v2374_v25  ;;  %524 = vmatprep.subr.bf16.mxu1 %v2376_v26  ;;  %v2420_v7 = vld [vmem:[#allocation5 + $0x28] sm:$0xff]   ;;  %v2434_v9 = vld [vmem:[#allocation5 + $0x38] sm:$0xff]   ;;  %v177_v19 = vsub.s32 1, %v172_v14  ;;  %v3142_v20 = vrot.slane %v169_v18, %v181_v15  ;;  %v3144_v21 = vrot.slane %v169_v18, %v185_v16  ;;  %s2144_s12 = sshll.u32 %s2857_s5, 4  ;;  %s2858_s13 = smov [#allocation19]   ;;  %s2145_s12 = int_to_ptr.vmem [resolvable:$true] %s2144_s12 }
  0x88   :  { %v113_v10 = vld [vmem:[#allocation13] sm:$0xff]  ;;  %v114_v11 = vld [vmem:[#allocation13 + $0x8] sm:$0xff]  ;;  %v3146_v22 = vrot.slane %v169_v18, %v173_v17  ;;  %s2156_s14 = sshll.u32 %s2858_s13, 4  ;;  %s2859_s17 = smov [#allocation16]   ;;  %s3664_s14 = int_to_ptr.vmem [resolvable:$true] %s2156_s14 }
  0x89   :  { %v723_v12 = vpack.c.bf16 %v114_v11, %v113_v10  ;;  %v3148_v24 = vrot.slane %v169_v18, %v177_v19  ;;  %s2132_s18 = sshll.u32 %s2859_s17, 4  ;;  %s2766_s19 = scalar_lea.vmem %s2145_s12, 256  ;;  %s3666_s18 = int_to_ptr.vmem [resolvable:$true] %s2132_s18 }
  0x8a   :  { %412 = vmatpush1.bf16.msra.mxu0 %v2378_v27  ;;  %525 = vmatpush1.bf16.msra.mxu1 %v2379_v28  ;;  %p2767_p6 = scmp.ne.s32.totalorder %s2145_s12, %s2766_s19  ;;  %p2771_p7 = scmp.lt.s32.totalorder %s2145_s12, %s2145_s12 }
  0x8b   :  { %413 = vmatprep.subr.bf16.mxu0 %v2380_v29  ;;  %526 = vmatprep.subr.bf16.mxu1 %v2382_v30  ;;  %p2772_p8 = scmp.lt.s32.totalorder %s2766_s19, %s2766_s19 }
  0x8d   :  { %p2773_p9 = por %p2772_p8, %p2771_p7 }
  0x8e   :  { %414 = vmatpush1.bf16.msra.mxu0 %v2384_v31  ;;  %527 = vmatpush1.bf16.msra.mxu1 %v2385_v32 }
  0x8f   :  { %890 = vmatprep.subr.bf16.mxu0 %v2994_v33  ;;  %933 = vmatprep.subr.bf16.mxu1 %v2996_v34  ;;  %p2774_p10 = pnand %p2773_p9, %p2767_p6 }
  0x91   :  { %432 = vmatmul.mubr.bf16.vlgmr.msra.gmra.mrb[0].mxu0 %v2386_v35  ;;  %545 = vmatmul.mubr.bf16.vlgmr.msra.gmra.mrb[0].mxu1 %v2386_v35 }
  0x92   :  { %891 = vmatpush1.bf16.msra.mxu0 %v2998_v36  ;;  %441 = vmatprep.mubr.bf16.mxu0 %v3732_v0 }
  0x93   :  { %554 = vmatprep.mubr.bf16.mxu1 %v3732_v0  ;;  %892 = vmatprep.subr.bf16.mxu0 %v3002_v37 }
  0x94   :  { %934 = vmatpush1.bf16.msra.mxu1 %v3004_v38 }
  0x95   :  { %935 = vmatprep.subr.bf16.mxu1 %v3006_v39 }
  0x96   :  { %893 = vmatpush1.bf16.msra.mxu0 %v3010_v40 }
  0x97   :  { %894 = vmatprep.subr.bf16.mxu0 %v3014_v41 }
  0x98   :  { %936 = vmatpush1.bf16.msra.mxu1 %v3017_v42 }
  0x99   :  { %442 = vmatmul.mubr.bf16.gmra.mrb[4].mxu0 %v2392_v43  ;;  %555 = vmatmul.mubr.bf16.gmra.mrb[4].mxu1 %v2392_v43 }
  0x9a   :  { %451 = vmatprep.mubr.bf16.mxu0 %v3732_v0  ;;  %564 = vmatprep.mubr.bf16.mxu1 %v3732_v0 }
  0x9b   :  { %895 = vmatpush1.bf16.msra.mxu0 %v3022_v44  ;;  %937 = vmatprep.subr.bf16.mxu1 %v3024_v45 }
  0x9c   :  { %896 = vmatprep.subr.bf16.mxu0 %v3026_v46  ;;  %938 = vmatpush1.bf16.msra.mxu1 %v3029_v47 }
  0x9d   :  { %939 = vmatprep.subr.bf16.mxu1 %v3031_v48 }
  0x9f   :  { %897 = vmatpush1.bf16.msra.mxu0 %v3037_v49 }
  0xa0   :  { %898 = vmatprep.subr.bf16.mxu0 %v3039_v50  ;;  %940 = vmatpush1.bf16.msra.mxu1 %v3043_v51 }
  0xa1   :  { %452 = vmatmul.mubr.bf16.gmra.mrb[8].mxu0 %v2399_v52  ;;  %565 = vmatmul.mubr.bf16.gmra.mrb[8].mxu1 %v2399_v52 }
  0xa2   :  { %461 = vmatprep.mubr.bf16.mxu0 %v3732_v0  ;;  %574 = vmatprep.mubr.bf16.mxu1 %v3732_v0 }
  0xa3   :  { %899 = vmatpush1.bf16.msra.mxu0 %v3046_v53  ;;  %941 = vmatprep.subr.bf16.mxu1 %v3049_v54 }
  0xa4   :  { %900 = vmatprep.subr.bf16.mxu0 %v3053_v55  ;;  %942 = vmatpush1.bf16.msra.mxu1 %v3055_v56 }
  0xa5   :  { %943 = vmatprep.subr.bf16.mxu1 %v3057_v57 }
  0xa7   :  { %901 = vmatpush1.bf16.msra.mxu0 %v3063_v58 }
  0xa8   :  { %902 = vmatprep.subr.bf16.mxu0 %v3067_v59  ;;  %944 = vmatpush1.bf16.msra.mxu1 %v3069_v60 }
  0xa9   :  { %462 = vmatmul.mubr.bf16.gmra.mrb[12].mxu0 %v2406_v61  ;;  %575 = vmatmul.mubr.bf16.gmra.mrb[12].mxu1 %v2406_v61 }
  0xaa   :  { %471 = vmatprep.mubr.bf16.mxu0 %v3732_v0  ;;  %584 = vmatprep.mubr.bf16.mxu1 %v3732_v0 }
  0xab   :  { %903 = vmatpush1.bf16.msra.mxu0 %v3073_v62  ;;  %945 = vmatprep.subr.bf16.mxu1 %v3075_v63 }
  0xac   :  { %904 = vmatprep.subr.bf16.mxu0 %v3079_v1  ;;  %946 = vmatpush1.bf16.msra.mxu1 %v3081_v2 }
  0xad   :  { %947 = vmatprep.subr.bf16.mxu1 %v3083_v3 }
  0xaf   :  { %905 = vmatpush1.bf16.msra.mxu0 %v3089_v4 }
  0xb0   :  { %948 = vmatpush1.bf16.msra.mxu1 %v3093_v5  ;;  %1043 = vmatprep.subr.bf16.mxu0 %v2994_v33 }
  0xb1   :  { %472 = vmatmul.mubr.bf16.gmra.mrb[16].mxu0 %v2413_v6  ;;  %585 = vmatmul.mubr.bf16.gmra.mrb[16].mxu1 %v2413_v6 }
  0xb2   :  { %481 = vmatprep.mubr.bf16.mxu0 %v3732_v0  ;;  %594 = vmatprep.mubr.bf16.mxu1 %v3732_v0 }
  0xb3   :  { %1086 = vmatprep.subr.bf16.mxu1 %v2996_v34 }
  0xb9   :  { %482 = vmatmul.mubr.bf16.gmra.mrb[20].mxu0 %v2420_v7  ;;  %595 = vmatmul.mubr.bf16.gmra.mrb[20].mxu1 %v2420_v7 }
  0xba   :  { %491 = vmatprep.mubr.bf16.mxu0 %v3732_v0  ;;  %604 = vmatprep.mubr.bf16.mxu1 %v3732_v0 }
  0xc1   :  { %492 = vmatmul.mubr.bf16.gmra.mrb[24].mxu0 %v2427_v8  ;;  %605 = vmatmul.mubr.bf16.gmra.mrb[24].mxu1 %v2427_v8 }
  0xc2   :  { %501 = vmatprep.mubr.bf16.mxu0 %v3732_v0  ;;  %614 = vmatprep.mubr.bf16.mxu1 %v3732_v0 }
  0xc9   :  { %502 = vmatmul.mubr.bf16.gmra.mrb[28].mxu0 %v2434_v9  ;;  %615 = vmatmul.mubr.bf16.gmra.mrb[28].mxu1 %v2434_v9 }
  0xca   :  { %922 = vmatprep.mubr.bf16.mxu0 %v3732_v0  ;;  %965 = vmatprep.mubr.bf16.mxu1 %v3732_v0 }
  0xd1   :  { %923 = vmatmul.mubr.bf16.vlgmr.msra.gmra.mrb[32].mxu0 %v723_v12  ;;  %966 = vmatmul.mubr.bf16.vlgmr.msra.gmra.mrb[32].mxu1 %v723_v12 }
  0xd2   :  { %1044 = vmatpush1.bf16.msra.mxu0 %v2998_v36  ;;  %1087 = vmatpush1.bf16.msra.mxu1 %v3004_v38 }
  0xd3   :  { %1045 = vmatprep.subr.bf16.mxu0 %v3002_v37  ;;  %1088 = vmatprep.subr.bf16.mxu1 %v3006_v39 }
  0xd4   :  { %1075 = vmatprep.mubr.bf16.mxu0 %v3732_v0  ;;  %1118 = vmatprep.mubr.bf16.mxu1 %v3732_v0 }
  0xd6   :  { %1046 = vmatpush1.bf16.msra.mxu0 %v3010_v40  ;;  %1089 = vmatpush1.bf16.msra.mxu1 %v3017_v42 }
  0xd7   :  { %1047 = vmatprep.subr.bf16.mxu0 %v3014_v41  ;;  %1090 = vmatprep.subr.bf16.mxu1 %v3024_v45 }
  0xda   :  { %1048 = vmatpush1.bf16.msra.mxu0 %v3022_v44  ;;  %1091 = vmatpush1.bf16.msra.mxu1 %v3029_v47 }
  0xdb   :  { %1049 = vmatprep.subr.bf16.mxu0 %v3026_v46  ;;  %1092 = vmatprep.subr.bf16.mxu1 %v3031_v48 }
  0xde   :  { %1050 = vmatpush1.bf16.msra.mxu0 %v3037_v49  ;;  %1093 = vmatpush1.bf16.msra.mxu1 %v3043_v51 }
  0xdf   :  { %1051 = vmatprep.subr.bf16.mxu0 %v3039_v50  ;;  %1094 = vmatprep.subr.bf16.mxu1 %v3049_v54 }
  0xe2   :  { %1052 = vmatpush1.bf16.msra.mxu0 %v3046_v53  ;;  %1095 = vmatpush1.bf16.msra.mxu1 %v3055_v56 }
  0xe3   :  { %1053 = vmatprep.subr.bf16.mxu0 %v3053_v55  ;;  %1096 = vmatprep.subr.bf16.mxu1 %v3057_v57 }
  0xe6   :  { %1054 = vmatpush1.bf16.msra.mxu0 %v3063_v58  ;;  %1097 = vmatpush1.bf16.msra.mxu1 %v3069_v60 }
  0xe7   :  { %1055 = vmatprep.subr.bf16.mxu0 %v3067_v59  ;;  %1098 = vmatprep.subr.bf16.mxu1 %v3075_v63 }
  0xea   :  { %1056 = vmatpush1.bf16.msra.mxu0 %v3073_v62  ;;  %1099 = vmatpush1.bf16.msra.mxu1 %v3081_v2 }
  0xeb   :  { %1057 = vmatprep.subr.bf16.mxu0 %v3079_v1  ;;  %1100 = vmatprep.subr.bf16.mxu1 %v3083_v3 }
  0xee   :  { %1058 = vmatpush1.bf16.msra.mxu0 %v3089_v4  ;;  %1101 = vmatpush1.bf16.msra.mxu1 %v3093_v5 }
  0xef   :  { %1197 = vmatprep.subr.bf16.mxu0 %v2994_v33  ;;  %1240 = vmatprep.subr.bf16.mxu1 %v2996_v34 }
 0x164   :  { %v433_v23 = vpop.f32.mrb[0].mxu0  ;;  %v546_v25 = vpop.f32.mrb[0].mxu1 }
 0x165   :  { %v435_v26 = vpop.f32.mrb[1].mxu0  ;;  %v547_v27 = vadd.f32 %v546_v25, %v3142_v20  ;;  %v548_v28 = vpop.f32.mrb[1].mxu1  ;;  %v434_v32 = vadd.f32 %v433_v23, %v3146_v22 }
 0x166   :  { %v437_v29 = vpop.f32.mrb[2].mxu0  ;;  %v549_v30 = vadd.f32 %v548_v28, %v3144_v21  ;;  %v550_v31 = vpop.f32.mrb[2].mxu1  ;;  %v436_v6 = vadd.f32 %v435_v26, %v3148_v24 }
 0x167   :  { %v438_v35 = vadd.f32 %v437_v29, %v3146_v22  ;;  %v439_v43 = vpop.f32.mrb[3].mxu0  ;;  %v551_v52 = vadd.f32 %v550_v31, %v3142_v20  ;;  %v552_v61 = vpop.f32.mrb[3].mxu1 }
 0x168   :  { %v440_v7 = vadd.f32 %v439_v43, %v3148_v24  ;;  %v553_v8 = vadd.f32 %v552_v61, %v3144_v21 }
 0x169   :  { %v3158_v9 = vpack.c.bf16 %v438_v35, %v434_v32  ;;  %v3160_v10 = vpack.c.bf16 %v551_v52, %v547_v27 }
 0x16a   :  { %v3162_v11 = vpack.c.bf16 %v440_v7, %v436_v6  ;;  %v3164_v12 = vpack.c.bf16 %v553_v8, %v549_v30 }
 0x16c   :  { %v443_v13 = vpop.f32.mrb[4].mxu0  ;;  %v556_v14 = vpop.f32.mrb[4].mxu1 }
 0x16d   :  { %v444_v15 = vadd.f32 %v443_v13, %v3146_v22  ;;  %v445_v16 = vpop.f32.mrb[5].mxu0  ;;  %v557_v17 = vadd.f32 %v556_v14, %v3142_v20  ;;  %v558_v18 = vpop.f32.mrb[5].mxu1 }
 0x16e   :  { %v446_v19 = vadd.f32 %v445_v16, %v3148_v24  ;;  %v447_v23 = vpop.f32.mrb[6].mxu0  ;;  %v559_v25 = vadd.f32 %v558_v18, %v3144_v21  ;;  %v560_v26 = vpop.f32.mrb[6].mxu1 }
 0x16f   :  { %v448_v27 = vadd.f32 %v447_v23, %v3146_v22  ;;  %v449_v28 = vpop.f32.mrb[7].mxu0  ;;  %v561_v29 = vadd.f32 %v560_v26, %v3142_v20  ;;  %v562_v30 = vpop.f32.mrb[7].mxu1 }
 0x170   :  { %v450_v31 = vadd.f32 %v449_v28, %v3148_v24  ;;  %v563_v32 = vadd.f32 %v562_v30, %v3144_v21 }
 0x171   :  { %v3174_v35 = vpack.c.bf16 %v448_v27, %v444_v15  ;;  %v3176_v43 = vpack.c.bf16 %v561_v29, %v557_v17 }
 0x172   :  { %v3178_v52 = vpack.c.bf16 %v450_v31, %v446_v19  ;;  %v3180_v61 = vpack.c.bf16 %v563_v32, %v559_v25 }
 0x174   :  { %3756 = vst [vmem:[#allocation26_spill] sm:$0xff] %v3180_v61  ;;  %v453_v6 = vpop.f32.mrb[8].mxu0  ;;  %v566_v7 = vpop.f32.mrb[8].mxu1 }
 0x175   :  { %v454_v8 = vadd.f32 %v453_v6, %v3146_v22  ;;  %v455_v13 = vpop.f32.mrb[9].mxu0  ;;  %v567_v14 = vadd.f32 %v566_v7, %v3142_v20  ;;  %v568_v16 = vpop.f32.mrb[9].mxu1 }
 0x176   :  { %v456_v18 = vadd.f32 %v455_v13, %v3148_v24  ;;  %v457_v23 = vpop.f32.mrb[10].mxu0  ;;  %v569_v15 = vadd.f32 %v568_v16, %v3144_v21  ;;  %v570_v26 = vpop.f32.mrb[10].mxu1 }
 0x177   :  { %v458_v17 = vadd.f32 %v457_v23, %v3146_v22  ;;  %v459_v19 = vpop.f32.mrb[11].mxu0  ;;  %v571_v25 = vadd.f32 %v570_v26, %v3142_v20  ;;  %v572_v27 = vpop.f32.mrb[11].mxu1 }
 0x178   :  { %v460_v28 = vadd.f32 %v459_v19, %v3148_v24  ;;  %v573_v29 = vadd.f32 %v572_v27, %v3144_v21 }
 0x179   :  { %v3190_v30 = vpack.c.bf16 %v458_v17, %v454_v8  ;;  %v3192_v31 = vpack.c.bf16 %v571_v25, %v567_v14 }
 0x17a   :  { %v3194_v32 = vpack.c.bf16 %v460_v28, %v456_v18  ;;  %v3196_v6 = vpack.c.bf16 %v573_v29, %v569_v15 }
 0x17b   :  { %3757 = vst [vmem:[#allocation27_spill] sm:$0xff] %v3190_v30  ;;  %3758 = vst [vmem:[#allocation28_spill] sm:$0xff] %v3192_v31 }
 0x17c   :  { %3759 = vst [vmem:[#allocation29_spill] sm:$0xff] %v3194_v32  ;;  %3760 = vst [vmem:[#allocation30_spill] sm:$0xff] %v3196_v6  ;;  %v463_v7 = vpop.f32.mrb[12].mxu0  ;;  %v576_v13 = vpop.f32.mrb[12].mxu1 }
 0x17d   :  { %v464_v16 = vadd.f32 %v463_v7, %v3146_v22  ;;  %v465_v23 = vpop.f32.mrb[13].mxu0  ;;  %v577_v26 = vadd.f32 %v576_v13, %v3142_v20  ;;  %v578_v0 = vpop.f32.mrb[13].mxu1 }
 0x17e   :  { %v466_v19 = vadd.f32 %v465_v23, %v3148_v24  ;;  %v467_v61 = vpop.f32.mrb[14].mxu0  ;;  %v579_v8 = vadd.f32 %v578_v0, %v3144_v21  ;;  %v580_v17 = vpop.f32.mrb[14].mxu1 }
 0x17f   :  { %v468_v14 = vadd.f32 %v467_v61, %v3146_v22  ;;  %v469_v18 = vpop.f32.mrb[15].mxu0  ;;  %v581_v15 = vadd.f32 %v580_v17, %v3142_v20  ;;  %v582_v25 = vpop.f32.mrb[15].mxu1 }
 0x180   :  { %v470_v27 = vadd.f32 %v469_v18, %v3148_v24  ;;  %v583_v28 = vadd.f32 %v582_v25, %v3144_v21 }
 0x181   :  { %v3206_v29 = vpack.c.bf16 %v468_v14, %v464_v16  ;;  %v3208_v7 = vpack.c.bf16 %v581_v15, %v577_v26 }
 0x182   :  { %v3210_v13 = vpack.c.bf16 %v470_v27, %v466_v19  ;;  %v3212_v23 = vpack.c.bf16 %v583_v28, %v579_v8 }
 0x183   :  { %3761 = vst [vmem:[#allocation31_spill] sm:$0xff] %v3206_v29  ;;  %3762 = vst [vmem:[#allocation32_spill] sm:$0xff] %v3208_v7 }
 0x184   :  { %3763 = vst [vmem:[#allocation33_spill] sm:$0xff] %v3210_v13  ;;  %3764 = vst [vmem:[#allocation34_spill] sm:$0xff] %v3212_v23  ;;  %v473_v0 = vpop.f32.mrb[16].mxu0  ;;  %v586_v6 = vpop.f32.mrb[16].mxu1 }
 0x185   :  { %v474_v61 = vadd.f32 %v473_v0, %v3146_v22  ;;  %v475_v32 = vpop.f32.mrb[17].mxu0  ;;  %v587_v17 = vadd.f32 %v586_v6, %v3142_v20  ;;  %v588_v31 = vpop.f32.mrb[17].mxu1 }
 0x186   :  { %v476_v18 = vadd.f32 %v475_v32, %v3148_v24  ;;  %v477_v30 = vpop.f32.mrb[18].mxu0  ;;  %v589_v16 = vadd.f32 %v588_v31, %v3144_v21  ;;  %v590_v14 = vpop.f32.mrb[18].mxu1 }
 0x187   :  { %v478_v26 = vadd.f32 %v477_v30, %v3146_v22  ;;  %v479_v19 = vpop.f32.mrb[19].mxu0  ;;  %v591_v8 = vadd.f32 %v590_v14, %v3142_v20  ;;  %v592_v15 = vpop.f32.mrb[19].mxu1 }
 0x188   :  { %v480_v25 = vadd.f32 %v479_v19, %v3148_v24  ;;  %v593_v27 = vadd.f32 %v592_v15, %v3144_v21 }
 0x189   :  { %v3222_v28 = vpack.c.bf16 %v478_v26, %v474_v61  ;;  %v3224_v6 = vpack.c.bf16 %v591_v8, %v587_v17 }
 0x18a   :  { %v3226_v0 = vpack.c.bf16 %v480_v25, %v476_v18  ;;  %v3228_v32 = vpack.c.bf16 %v593_v27, %v589_v16 }
 0x18b   :  { %3765 = vst [vmem:[#allocation35_spill] sm:$0xff] %v3222_v28  ;;  %3766 = vst [vmem:[#allocation36_spill] sm:$0xff] %v3224_v6 }
 0x18c   :  { %3767 = vst [vmem:[#allocation37_spill] sm:$0xff] %v3226_v0  ;;  %3768 = vst [vmem:[#allocation38_spill] sm:$0xff] %v3228_v32  ;;  %v483_v31 = vpop.f32.mrb[20].mxu0  ;;  %v596_v23 = vpop.f32.mrb[20].mxu1 }
 0x18d   :  { %v484_v30 = vadd.f32 %v483_v31, %v3146_v22  ;;  %v485_v13 = vpop.f32.mrb[21].mxu0  ;;  %v597_v14 = vadd.f32 %v596_v23, %v3142_v20  ;;  %v598_v7 = vpop.f32.mrb[21].mxu1 }
 0x18e   :  { %v486_v19 = vadd.f32 %v485_v13, %v3148_v24  ;;  %v487_v29 = vpop.f32.mrb[22].mxu0  ;;  %v599_v61 = vadd.f32 %v598_v7, %v3144_v21  ;;  %v600_v26 = vpop.f32.mrb[22].mxu1 }
 0x18f   :  { %v488_v17 = vadd.f32 %v487_v29, %v3146_v22  ;;  %v489_v18 = vpop.f32.mrb[23].mxu0  ;;  %v601_v16 = vadd.f32 %v600_v26, %v3142_v20  ;;  %v602_v8 = vpop.f32.mrb[23].mxu1 }
 0x190   :  { %v490_v15 = vadd.f32 %v489_v18, %v3148_v24  ;;  %v603_v25 = vadd.f32 %v602_v8, %v3144_v21 }
 0x191   :  { %v3238_v27 = vpack.c.bf16 %v488_v17, %v484_v30  ;;  %v3240_v23 = vpack.c.bf16 %v601_v16, %v597_v14 }
 0x192   :  { %v3242_v31 = vpack.c.bf16 %v490_v15, %v486_v19  ;;  %v3244_v13 = vpack.c.bf16 %v603_v25, %v599_v61 }
 0x193   :  { %3769 = vst [vmem:[#allocation39_spill] sm:$0xff] %v3238_v27  ;;  %3770 = vst [vmem:[#allocation40_spill] sm:$0xff] %v3240_v23 }
 0x194   :  { %3771 = vst [vmem:[#allocation41_spill] sm:$0xff] %v3242_v31  ;;  %3772 = vst [vmem:[#allocation42_spill] sm:$0xff] %v3244_v13  ;;  %v493_v7 = vpop.f32.mrb[24].mxu0  ;;  %v606_v32 = vpop.f32.mrb[24].mxu1 }
 0x195   :  { %v494_v29 = vadd.f32 %v493_v7, %v3146_v22  ;;  %v495_v0 = vpop.f32.mrb[25].mxu0  ;;  %v607_v26 = vadd.f32 %v606_v32, %v3142_v20  ;;  %v608_v6 = vpop.f32.mrb[25].mxu1 }
 0x196   :  { %v496_v18 = vadd.f32 %v495_v0, %v3148_v24  ;;  %v497_v28 = vpop.f32.mrb[26].mxu0  ;;  %v609_v30 = vadd.f32 %v608_v6, %v3144_v21  ;;  %v610_v17 = vpop.f32.mrb[26].mxu1 }
 0x197   :  { %v498_v14 = vadd.f32 %v497_v28, %v3146_v22  ;;  %v499_v19 = vpop.f32.mrb[27].mxu0  ;;  %v611_v61 = vadd.f32 %v610_v17, %v3142_v20  ;;  %v612_v16 = vpop.f32.mrb[27].mxu1 }
 0x198   :  { %v500_v8 = vadd.f32 %v499_v19, %v3148_v24  ;;  %v613_v15 = vadd.f32 %v612_v16, %v3144_v21 }
 0x199   :  { %v3254_v25 = vpack.c.bf16 %v498_v14, %v494_v29  ;;  %v3256_v32 = vpack.c.bf16 %v611_v61, %v607_v26 }
 0x19a   :  { %v3258_v7 = vpack.c.bf16 %v500_v8, %v496_v18  ;;  %v3260_v0 = vpack.c.bf16 %v613_v15, %v609_v30 }
 0x19c   :  { %3773 = vst [vmem:[#allocation43_spill] sm:$0xff] %v3260_v0  ;;  %v503_v6 = vpop.f32.mrb[28].mxu0  ;;  %v616_v13 = vpop.f32.mrb[28].mxu1 }
 0x19d   :  { %v504_v28 = vadd.f32 %v503_v6, %v3146_v22  ;;  %v505_v31 = vpop.f32.mrb[29].mxu0  ;;  %v617_v17 = vadd.f32 %v616_v13, %v3142_v20  ;;  %v618_v23 = vpop.f32.mrb[29].mxu1 }
 0x19e   :  { %v506_v19 = vadd.f32 %v505_v31, %v3148_v24  ;;  %v507_v27 = vpop.f32.mrb[30].mxu0  ;;  %v619_v29 = vadd.f32 %v618_v23, %v3144_v21  ;;  %v620_v14 = vpop.f32.mrb[30].mxu1  ;;  %v976_v23 = vunpack.c.l.bf16 %v3158_v9 }
 0x19f   :  { %v508_v26 = vadd.f32 %v507_v27, %v3146_v22  ;;  %v509_v18 = vpop.f32.mrb[31].mxu0  ;;  %v621_v30 = vadd.f32 %v620_v14, %v3142_v20  ;;  %v622_v61 = vpop.f32.mrb[31].mxu1  ;;  %v978_v22 = vunpack.c.l.bf16 %v3160_v10  ;;  %v977_v20 = vunpack.c.l.bf16 %v3162_v11 }
 0x1a0   :  { %v510_v16 = vadd.f32 %v509_v18, %v3148_v24  ;;  %v623_v8 = vadd.f32 %v622_v61, %v3144_v21  ;;  %v979_v24 = vunpack.c.l.bf16 %v3164_v12 }
 0x1a1   :  { %v3270_v15 = vpack.c.bf16 %v508_v26, %v504_v28  ;;  %v3272_v13 = vpack.c.bf16 %v621_v30, %v617_v17  ;;  %v980_v17 = vunpack.c.h.bf16 %v3158_v9 }
 0x1a2   :  { %v3274_v6 = vpack.c.bf16 %v510_v16, %v506_v19  ;;  %v3276_v31 = vpack.c.bf16 %v623_v8, %v619_v29  ;;  %v982_v19 = vunpack.c.h.bf16 %v3160_v10  ;;  %v981_v16 = vunpack.c.h.bf16 %v3162_v11 }
 0x1a3   :  { %3774 = vst [vmem:[#allocation44_spill] sm:$0xff] %v3270_v15  ;;  %3775 = vst [vmem:[#allocation45_spill] sm:$0xff] %v3272_v13  ;;  %v983_v8 = vunpack.c.h.bf16 %v3164_v12 }
 0x1a4   :  { %3776 = vst [vmem:[#allocation46_spill] sm:$0xff] %v3274_v6  ;;  %3777 = vst [vmem:[#allocation47_spill] sm:$0xff] %v3276_v31  ;;  %v924_v27 = vpop.f32.mrb[32].mxu0  ;;  %v967_v0 = vpop.f32.mrb[32].mxu1 }
 0x1a5   :  { %v984_v14 = vadd.f32 %v976_v23, %v924_v27  ;;  %v986_v21 = vadd.f32 %v978_v22, %v967_v0  ;;  %v926_v28 = vpop.f32.mrb[33].mxu0  ;;  %v969_v26 = vpop.f32.mrb[33].mxu1 }
 0x1a6   :  { %v985_v29 = vadd.f32 %v977_v20, %v926_v28  ;;  %v987_v18 = vadd.f32 %v979_v24, %v969_v26  ;;  %v928_v30 = vpop.f32.mrb[34].mxu0  ;;  %v971_v61 = vpop.f32.mrb[34].mxu1 }
 0x1a7   :  { %v992_v31 = vmul.f32 0.5, %v984_v14  ;;  %v988_v6 = vadd.f32 %v980_v17, %v928_v30  ;;  %v990_v13 = vadd.f32 %v982_v19, %v971_v61  ;;  %v930_v15 = vpop.f32.mrb[35].mxu0  ;;  %v973_v23 = vpop.f32.mrb[35].mxu1  ;;  %v117_v19 = vld [vmem:[#allocation14] sm:$0xff] }
 0x1a8   :  { %v1000_v0 = vmul.f32 0.5, %v985_v29  ;;  %v989_v22 = vadd.f32 %v981_v16, %v930_v15  ;;  %v991_v27 = vadd.f32 %v983_v8, %v973_v23  ;;  %v1010_v12 = vmul.f32 0.5, %v987_v18  ;;  %v118_v8 = vld [vmem:[#allocation14 + $0x8] sm:$0xff] }
 0x1a9   :  { %2442 = vtanh.f32 %v992_v31  ;;  %v993_v9 = vmul.f32 0.5, %v988_v6 }
 0x1aa   :  { %2444 = vtanh.f32 %v1000_v0  ;;  %v1001_v10 = vmul.f32 0.5, %v989_v22  ;;  %v1011_v28 = vmul.f32 0.5, %v991_v27 }
 0x1ab   :  { %2446 = vtanh.f32 %v993_v9 }
 0x1ac   :  { %2448 = vtanh.f32 %v986_v21 }
 0x1ad   :  { %2450 = vtanh.f32 %v1001_v10 }
 0x1ae   :  { %2452 = vtanh.f32 %v990_v13 }
 0x1af   :  { %2454 = vtanh.f32 %v1010_v12 }
 0x1b0   :  { %2456 = vtanh.f32 %v1011_v28 }
 0x1b3   :  { %v2443_v20 = vpop.eup %2442 }
 0x1b4   :  { %v2445_v11 = vpop.eup %2444  ;;  %v996_v24 = vadd.f32 1.0, %v2443_v20 }
 0x1b5   :  { %v1004_v14 = vadd.f32 1.0, %v2445_v11  ;;  %v2447_v26 = vpop.eup %2446 }
 0x1b6   :  { %v998_v17 = vmul.f32 0.5, %v996_v24  ;;  %v2449_v29 = vpop.eup %2448  ;;  %v997_v30 = vadd.f32 1.0, %v2447_v26 }
 0x1b7   :  { %v1006_v15 = vmul.f32 0.5, %v1004_v14  ;;  %v2451_v31 = vpop.eup %2450 }
 0x1b8   :  { %v1020_v6 = vmul.f32 %v2449_v29, %v998_v17  ;;  %v999_v16 = vmul.f32 0.5, %v997_v30  ;;  %v1005_v21 = vadd.f32 1.0, %v2451_v31  ;;  %v2453_v13 = vpop.eup %2452  ;;  %v3778_v29 = vmov 0  }
 0x1b9   :  { %v1018_v61 = vmul.f32 %v1006_v15, %v117_v19  ;;  %v2455_v9 = vpop.eup %2454 }
 0x1ba   :  { %v1007_v18 = vmul.f32 0.5, %v1005_v21  ;;  %v1021_v0 = vmul.f32 %v2453_v13, %v999_v16  ;;  %v2457_v10 = vpop.eup %2456  ;;  %v1014_v20 = vadd.f32 1.0, %v2455_v9  ;;  %v1133_v16 = vunpack.c.h.bf16 %v3174_v35 }
 0x1bb   :  { %v3286_v23 = vadd.f32 %v1020_v6, %v1018_v61  ;;  %v1015_v11 = vadd.f32 1.0, %v2457_v10 }
 0x1bc   :  { %v1019_v22 = vmul.f32 %v1007_v18, %v118_v8  ;;  %v1016_v12 = vmul.f32 0.5, %v1014_v20  ;;  %v1134_v18 = vunpack.c.h.bf16 %v3178_v52 }
 0x1bd   :  { %2458 = vtanh.f32 %v3286_v23  ;;  %v1017_v14 = vmul.f32 0.5, %v1015_v11 }
 0x1be   :  { %v3289_v27 = vadd.f32 %v1021_v0, %v1019_v22 }
 0x1c0   :  { %2460 = vtanh.f32 %v3289_v27 }
 0x1c7   :  { %v2459_v24 = vpop.eup %2458 }
 0x1c8   :  { %v1026_v26 = vmul.f32 %v2459_v24, %v1016_v12 }
 0x1ca   :  { %v2461_v28 = vpop.eup %2460 }
 0x1cb   :  { %v1027_v17 = vmul.f32 %v2461_v28, %v1017_v14 }
 0x1cd   :  { %v1028_v19 = vpack.c.bf16 %v1027_v17, %v1026_v26 }
 0x1cf   :  { %2286 = vst [vmem:[#allocation16] sm:$0xff] %v1028_v19   ;;  %1076 = vmatmul.mubr.bf16.vlgmr.msra.gmra.mrb[36].mxu0 %v1028_v19  ;;  %1119 = vmatmul.mubr.bf16.vlgmr.msra.gmra.mrb[36].mxu1 %v1028_v19 }
 0x1d0   :  { %1198 = vmatpush1.bf16.msra.mxu0 %v2998_v36  ;;  %1241 = vmatpush1.bf16.msra.mxu1 %v3004_v38  ;;  %v1129_v36 = vunpack.c.l.bf16 %v3174_v35 }
 0x1d1   :  { %1199 = vmatprep.subr.bf16.mxu0 %v3002_v37  ;;  %1242 = vmatprep.subr.bf16.mxu1 %v3006_v39  ;;  %v1131_v37 = vunpack.c.l.bf16 %v3176_v43 }
 0x1d2   :  { %1229 = vmatprep.mubr.bf16.mxu0 %v3778_v29  ;;  %1272 = vmatprep.mubr.bf16.mxu1 %v3778_v29 }
 0x1d4   :  { %1200 = vmatpush1.bf16.msra.mxu0 %v3010_v40  ;;  %1243 = vmatpush1.bf16.msra.mxu1 %v3017_v42  ;;  %v1130_v40 = vunpack.c.l.bf16 %v3178_v52 }
 0x1d5   :  { %1201 = vmatprep.subr.bf16.mxu0 %v3014_v41  ;;  %1244 = vmatprep.subr.bf16.mxu1 %v3024_v45  ;;  %v3779_v41 = vld [vmem:[#allocation26_spill] sm:$0xff] }
 0x1d6   :  { %v1132_v15 = vunpack.c.l.bf16 %v3779_v41  ;;  %v1136_v0 = vunpack.c.h.bf16 %v3779_v41 }
 0x1d8   :  { %1202 = vmatpush1.bf16.msra.mxu0 %v3022_v44  ;;  %1245 = vmatpush1.bf16.msra.mxu1 %v3029_v47 }
 0x1d9   :  { %1203 = vmatprep.subr.bf16.mxu0 %v3026_v46  ;;  %1246 = vmatprep.subr.bf16.mxu1 %v3031_v48 }
 0x1dc   :  { %1204 = vmatpush1.bf16.msra.mxu0 %v3037_v49  ;;  %1247 = vmatpush1.bf16.msra.mxu1 %v3043_v51 }
 0x1dd   :  { %1205 = vmatprep.subr.bf16.mxu0 %v3039_v50  ;;  %1248 = vmatprep.subr.bf16.mxu1 %v3049_v54 }
 0x1e0   :  { %1206 = vmatpush1.bf16.msra.mxu0 %v3046_v53  ;;  %1249 = vmatpush1.bf16.msra.mxu1 %v3055_v56 }
 0x1e1   :  { %1207 = vmatprep.subr.bf16.mxu0 %v3053_v55  ;;  %1250 = vmatprep.subr.bf16.mxu1 %v3057_v57 }
 0x1e4   :  { %1208 = vmatpush1.bf16.msra.mxu0 %v3063_v58  ;;  %1251 = vmatpush1.bf16.msra.mxu1 %v3069_v60 }
 0x1e5   :  { %1209 = vmatprep.subr.bf16.mxu0 %v3067_v59  ;;  %1252 = vmatprep.subr.bf16.mxu1 %v3075_v63 }
 0x1e8   :  { %1210 = vmatpush1.bf16.msra.mxu0 %v3073_v62  ;;  %1253 = vmatpush1.bf16.msra.mxu1 %v3081_v2 }
 0x1e9   :  { %1211 = vmatprep.subr.bf16.mxu0 %v3079_v1  ;;  %1254 = vmatprep.subr.bf16.mxu1 %v3083_v3 }
 0x1ec   :  { %1212 = vmatpush1.bf16.msra.mxu0 %v3089_v4  ;;  %1255 = vmatpush1.bf16.msra.mxu1 %v3093_v5 }
 0x1ed   :  { %1351 = vmatprep.subr.bf16.mxu0 %v2994_v33  ;;  %1394 = vmatprep.subr.bf16.mxu1 %v2996_v34  ;;  %v1135_v33 = vunpack.c.h.bf16 %v3176_v43 }
 0x2a2   :  { %v1077_v38 = vpop.f32.mrb[36].mxu0  ;;  %v1120_v39 = vpop.f32.mrb[36].mxu1 }
 0x2a3   :  { %v1137_v30 = vadd.f32 %v1129_v36, %v1077_v38  ;;  %v1139_v31 = vadd.f32 %v1131_v37, %v1120_v39  ;;  %v1079_v6 = vpop.f32.mrb[37].mxu0  ;;  %v1122_v61 = vpop.f32.mrb[37].mxu1 }
 0x2a4   :  { %v1138_v21 = vadd.f32 %v1130_v40, %v1079_v6  ;;  %v1140_v34 = vadd.f32 %v1132_v15, %v1122_v61  ;;  %v1081_v13 = vpop.f32.mrb[38].mxu0  ;;  %v1124_v8 = vpop.f32.mrb[38].mxu1 }
 0x2a5   :  { %v1145_v22 = vmul.f32 0.5, %v1137_v30  ;;  %v1141_v9 = vadd.f32 %v1133_v16, %v1081_v13  ;;  %v1143_v10 = vadd.f32 %v1135_v33, %v1124_v8  ;;  %v1083_v20 = vpop.f32.mrb[39].mxu0  ;;  %v1126_v11 = vpop.f32.mrb[39].mxu1 }
 0x2a6   :  { %v1153_v24 = vmul.f32 0.5, %v1138_v21  ;;  %v1142_v12 = vadd.f32 %v1134_v18, %v1083_v20  ;;  %v1144_v14 = vadd.f32 %v1136_v0, %v1126_v11  ;;  %v1163_v17 = vmul.f32 0.5, %v1140_v34 }
 0x2a7   :  { %2462 = vtanh.f32 %v1145_v22  ;;  %v1146_v35 = vmul.f32 0.5, %v1141_v9 }
 0x2a8   :  { %2464 = vtanh.f32 %v1153_v24  ;;  %v1154_v43 = vmul.f32 0.5, %v1142_v12  ;;  %v1164_v36 = vmul.f32 0.5, %v1144_v14 }
 0x2a9   :  { %2466 = vtanh.f32 %v1146_v35  ;;  %v3345_v35 = vld [vmem:[#allocation10 + $0x8] ss:$16 sps:$4 sm:$0xff]  }
 0x2aa   :  { %2468 = vtanh.f32 %v1139_v31 }
 0x2ab   :  { %2470 = vtanh.f32 %v1154_v43  ;;  %v3348_v43 = vld [vmem:[#allocation10 + $0x24] ss:$16 sps:$4 sm:$0xff]  }
 0x2ac   :  { %2472 = vtanh.f32 %v1143_v10 }
 0x2ad   :  { %2474 = vtanh.f32 %v1163_v17 }
 0x2ae   :  { %2476 = vtanh.f32 %v1164_v36 }
 0x2b1   :  { %v2463_v28 = vpop.eup %2462 }
 0x2b2   :  { %v2465_v52 = vpop.eup %2464  ;;  %v1149_v26 = vadd.f32 1.0, %v2463_v28  ;;  %v3351_v28 = vld [vmem:[#allocation10 + $0x2c] ss:$16 sps:$4 sm:$0xff]  }
 0x2b3   :  { %v1157_v19 = vadd.f32 1.0, %v2465_v52  ;;  %v2467_v37 = vpop.eup %2466  ;;  %v3356_v52 = vld [vmem:[#allocation10 + $0x20] ss:$16 sps:$4 sm:$0xff]  }
 0x2b4   :  { %v1151_v38 = vmul.f32 0.5, %v1149_v26  ;;  %v2469_v39 = vpop.eup %2468  ;;  %v1150_v41 = vadd.f32 1.0, %v2467_v37  ;;  %v3360_v26 = vld [vmem:[#allocation10 + $0x44] ss:$16 sps:$4 sm:$0xff]  }
 0x2b5   :  { %v1159_v40 = vmul.f32 0.5, %v1157_v19  ;;  %v2471_v15 = vpop.eup %2470 }
 0x2b6   :  { %v1173_v30 = vmul.f32 %v2469_v39, %v1151_v38  ;;  %v1152_v61 = vmul.f32 0.5, %v1150_v41  ;;  %v1158_v31 = vadd.f32 1.0, %v2471_v15  ;;  %v2473_v16 = vpop.eup %2472 }
 0x2b7   :  { %v1171_v6 = vmul.f32 %v1159_v40, %v3286_v23  ;;  %v2475_v18 = vpop.eup %2474 }
 0x2b8   :  { %v1160_v21 = vmul.f32 0.5, %v1158_v31  ;;  %v1174_v34 = vmul.f32 %v2473_v16, %v1152_v61  ;;  %v2477_v0 = vpop.eup %2476  ;;  %v1167_v22 = vadd.f32 1.0, %v2475_v18 }
 0x2b9   :  { %v3335_v33 = vadd.f32 %v1173_v30, %v1171_v6  ;;  %v1168_v23 = vadd.f32 1.0, %v2477_v0 }
 0x2ba   :  { %v1172_v13 = vmul.f32 %v1160_v21, %v3289_v27  ;;  %v1169_v10 = vmul.f32 0.5, %v1167_v22  ;;  %v3342_v27 = vld [vmem:[#allocation10] ss:$16 sps:$4 sm:$0xff]  }
 0x2bb   :  { %2478 = vtanh.f32 %v3335_v33  ;;  %v1170_v20 = vmul.f32 0.5, %v1168_v23 }
 0x2bc   :  { %v3339_v8 = vadd.f32 %v1174_v34, %v1172_v13 }
 0x2be   :  { %2480 = vtanh.f32 %v3339_v8 }
 0x2c5   :  { %v2479_v9 = vpop.eup %2478 }
 0x2c6   :  { %v1179_v24 = vmul.f32 %v2479_v9, %v1169_v10 }
 0x2c8   :  { %v2481_v11 = vpop.eup %2480 }
 0x2c9   :  { %v1180_v12 = vmul.f32 %v2481_v11, %v1170_v20 }
 0x2cb   :  { %v1181_v14 = vpack.c.bf16 %v1180_v12, %v1179_v24 }
 0x2cd   :  { %2291 = vst [vmem:[#allocation16 + $0x8] sm:$0xff] %v1181_v14   ;;  %1230 = vmatmul.mubr.bf16.vlgmr.msra.gmra.mrb[40].mxu0 %v1181_v14  ;;  %1273 = vmatmul.mubr.bf16.vlgmr.msra.gmra.mrb[40].mxu1 %v1181_v14 }
 0x2ce   :  { %1352 = vmatpush1.bf16.msra.mxu0 %v3342_v27  ;;  %1395 = vmatpush1.bf16.msra.mxu1 %v3345_v35 }
 0x2cf   :  { %1353 = vmatprep.subr.bf16.mxu0 %v3348_v43  ;;  %1396 = vmatprep.subr.bf16.mxu1 %v3351_v28 }
 0x2d0   :  { %1383 = vmatprep.mubr.bf16.mxu0 %v3778_v29  ;;  %1426 = vmatprep.mubr.bf16.mxu1 %v3778_v29 }
 0x2d2   :  { %1354 = vmatpush1.bf16.msra.mxu0 %v3356_v52  ;;  %1397 = vmatpush1.bf16.msra.mxu1 %v3017_v42  ;;  %v3386_v42 = vld [vmem:[#allocation10 + $0x4] ss:$16 sps:$4 sm:$0xff]  }
 0x2d3   :  { %1355 = vmatprep.subr.bf16.mxu0 %v3360_v26  ;;  %1398 = vmatprep.subr.bf16.mxu1 %v3024_v45  ;;  %v3780_v45 = vld [vmem:[#allocation27_spill] sm:$0xff] }
 0x2d6   :  { %1356 = vmatpush1.bf16.msra.mxu0 %v3022_v44  ;;  %1399 = vmatpush1.bf16.msra.mxu1 %v3029_v47  ;;  %v3389_v44 = vld [vmem:[#allocation10 + $0xc] ss:$16 sps:$4 sm:$0xff]   ;;  %v3781_v47 = vld [vmem:[#allocation28_spill] sm:$0xff] }
 0x2d7   :  { %1357 = vmatprep.subr.bf16.mxu0 %v3026_v46  ;;  %1400 = vmatprep.subr.bf16.mxu1 %v3031_v48  ;;  %v1283_v46 = vunpack.c.l.bf16 %v3780_v45  ;;  %v1285_v48 = vunpack.c.l.bf16 %v3781_v47 }
 0x2da   :  { %1358 = vmatpush1.bf16.msra.mxu0 %v3037_v49  ;;  %1401 = vmatpush1.bf16.msra.mxu1 %v3043_v51  ;;  %v3782_v51 = vld [vmem:[#allocation29_spill] sm:$0xff] }
 0x2db   :  { %1359 = vmatprep.subr.bf16.mxu0 %v3039_v50  ;;  %1402 = vmatprep.subr.bf16.mxu1 %v3049_v54  ;;  %v3783_v54 = vld [vmem:[#allocation30_spill] sm:$0xff] }
 0x2de   :  { %1360 = vmatpush1.bf16.msra.mxu0 %v3046_v53  ;;  %1403 = vmatpush1.bf16.msra.mxu1 %v3055_v56  ;;  %v1284_v53 = vunpack.c.l.bf16 %v3782_v51 }
 0x2df   :  { %1361 = vmatprep.subr.bf16.mxu0 %v3053_v55  ;;  %1404 = vmatprep.subr.bf16.mxu1 %v3057_v57  ;;  %v1286_v55 = vunpack.c.l.bf16 %v3783_v54 }
 0x2e2   :  { %1362 = vmatpush1.bf16.msra.mxu0 %v3063_v58  ;;  %1405 = vmatpush1.bf16.msra.mxu1 %v3069_v60  ;;  %v1287_v60 = vunpack.c.h.bf16 %v3780_v45 }
 0x2e3   :  { %1363 = vmatprep.subr.bf16.mxu0 %v3067_v59  ;;  %1406 = vmatprep.subr.bf16.mxu1 %v3075_v63 }
 0x2e6   :  { %1364 = vmatpush1.bf16.msra.mxu0 %v3073_v62  ;;  %1407 = vmatpush1.bf16.msra.mxu1 %v3081_v2  ;;  %v1289_v62 = vunpack.c.h.bf16 %v3781_v47 }
 0x2e7   :  { %1365 = vmatprep.subr.bf16.mxu0 %v3079_v1  ;;  %1408 = vmatprep.subr.bf16.mxu1 %v3083_v3 }
 0x2ea   :  { %1366 = vmatpush1.bf16.msra.mxu0 %v3089_v4  ;;  %1409 = vmatpush1.bf16.msra.mxu1 %v3093_v5  ;;  %v1288_v4 = vunpack.c.h.bf16 %v3782_v51  ;;  %v1290_v5 = vunpack.c.h.bf16 %v3783_v54 }
 0x2eb   :  { %1505 = vmatprep.subr.bf16.mxu0 %v3386_v42  ;;  %1548 = vmatprep.subr.bf16.mxu1 %v3389_v44 }
 0x3a0   :  { %v1231_v49 = vpop.f32.mrb[40].mxu0  ;;  %v1274_v50 = vpop.f32.mrb[40].mxu1 }
 0x3a1   :  { %v1291_v56 = vadd.f32 %v1283_v46, %v1231_v49  ;;  %v1293_v57 = vadd.f32 %v1285_v48, %v1274_v50  ;;  %v1233_v58 = vpop.f32.mrb[41].mxu0  ;;  %v1276_v59 = vpop.f32.mrb[41].mxu1 }
 0x3a2   :  { %v1292_v63 = vadd.f32 %v1284_v53, %v1233_v58  ;;  %v1294_v1 = vadd.f32 %v1286_v55, %v1276_v59  ;;  %v1235_v2 = vpop.f32.mrb[42].mxu0  ;;  %v1278_v3 = vpop.f32.mrb[42].mxu1 }
 0x3a3   :  { %v1299_v17 = vmul.f32 0.5, %v1291_v56  ;;  %v1295_v19 = vadd.f32 %v1287_v60, %v1235_v2  ;;  %v1297_v36 = vadd.f32 %v1289_v62, %v1278_v3  ;;  %v1237_v37 = vpop.f32.mrb[43].mxu0  ;;  %v1280_v38 = vpop.f32.mrb[43].mxu1  ;;  %v3419_v60 = vld [vmem:[#allocation10 + $0x4c] ss:$16 sps:$4 sm:$0xff]  }
 0x3a4   :  { %v1307_v39 = vmul.f32 0.5, %v1292_v63  ;;  %v1296_v40 = vadd.f32 %v1288_v4, %v1237_v37  ;;  %v1298_v41 = vadd.f32 %v1290_v5, %v1280_v38  ;;  %v1317_v16 = vmul.f32 0.5, %v1294_v1  ;;  %v3422_v62 = vld [vmem:[#allocation10 + $0x40] ss:$16 sps:$4 sm:$0xff]   ;;  %v3425_v63 = vld [vmem:[#allocation10 + $0x48] ss:$16 sps:$4 sm:$0xff]  }
 0x3a5   :  { %2482 = vtanh.f32 %v1299_v17  ;;  %v1300_v15 = vmul.f32 0.5, %v1295_v19  ;;  %v3428_v1 = vld [vmem:[#allocation10 + $0x64] ss:$16 sps:$4 sm:$0xff]   ;;  %v3431_v2 = vld [vmem:[#allocation10 + $0x6c] ss:$16 sps:$4 sm:$0xff]  }
 0x3a6   :  { %2484 = vtanh.f32 %v1307_v39  ;;  %v1308_v30 = vmul.f32 0.5, %v1296_v40  ;;  %v1318_v34 = vmul.f32 0.5, %v1298_v41  ;;  %v3434_v3 = vld [vmem:[#allocation10 + $0x60] ss:$16 sps:$4 sm:$0xff]   ;;  %v3437_v4 = vld [vmem:[#allocation10 + $0x68] ss:$16 sps:$4 sm:$0xff]  }
 0x3a7   :  { %2486 = vtanh.f32 %v1300_v15  ;;  %v3440_v5 = vld [vmem:[#allocation10 + $0x84] ss:$16 sps:$4 sm:$0xff]   ;;  %v3443_v17 = vld [vmem:[#allocation10 + $0x8c] ss:$16 sps:$4 sm:$0xff]   ;;  %v3446_v19 = vld [vmem:[#allocation10 + $0x80] ss:$16 sps:$4 sm:$0xff]  }
 0x3a8   :  { %2488 = vtanh.f32 %v1293_v57  ;;  %v3452_v37 = vld [vmem:[#allocation10 + $0xa4] ss:$16 sps:$4 sm:$0xff]   ;;  %v3455_v38 = vld [vmem:[#allocation10 + $0xac] ss:$16 sps:$4 sm:$0xff]   ;;  %v3458_v39 = vld [vmem:[#allocation10 + $0xa0] ss:$16 sps:$4 sm:$0xff]  }
 0x3a9   :  { %2490 = vtanh.f32 %v1308_v30  ;;  %v3461_v40 = vld [vmem:[#allocation10 + $0xa8] ss:$16 sps:$4 sm:$0xff]   ;;  %v3464_v41 = vld [vmem:[#allocation10 + $0xc4] ss:$16 sps:$4 sm:$0xff]   ;;  %v3467_v15 = vld [vmem:[#allocation10 + $0xcc] ss:$16 sps:$4 sm:$0xff]  }
 0x3aa   :  { %2492 = vtanh.f32 %v1297_v36  ;;  %v3449_v36 = vld [vmem:[#allocation10 + $0x88] ss:$16 sps:$4 sm:$0xff]   ;;  %v3470_v30 = vld [vmem:[#allocation10 + $0xc0] ss:$16 sps:$4 sm:$0xff]  }
 0x3ab   :  { %2494 = vtanh.f32 %v1317_v16  ;;  %v3482_v16 = vld [vmem:[#allocation10 + $0xe0] ss:$16 sps:$4 sm:$0xff]  }
 0x3ac   :  { %2496 = vtanh.f32 %v1318_v34  ;;  %v3784_v34 = vld [vmem:[#allocation31_spill] sm:$0xff] }
 0x3af   :  { %v2483_v6 = vpop.eup %2482 }
 0x3b0   :  { %v2485_v61 = vpop.eup %2484  ;;  %v1303_v31 = vadd.f32 1.0, %v2483_v6  ;;  %v3473_v6 = vld [vmem:[#allocation10 + $0xc8] ss:$16 sps:$4 sm:$0xff]  }
 0x3b1   :  { %v1311_v21 = vadd.f32 1.0, %v2485_v61  ;;  %v2487_v13 = vpop.eup %2486  ;;  %v3476_v61 = vld [vmem:[#allocation10 + $0xe4] ss:$16 sps:$4 sm:$0xff]  }
 0x3b2   :  { %v1305_v18 = vmul.f32 0.5, %v1303_v31  ;;  %v2489_v0 = vpop.eup %2488  ;;  %v1304_v23 = vadd.f32 1.0, %v2487_v13  ;;  %v3479_v31 = vld [vmem:[#allocation10 + $0xec] ss:$16 sps:$4 sm:$0xff]   ;;  %v1437_v13 = vunpack.c.l.bf16 %v3784_v34 }
 0x3b3   :  { %v1313_v22 = vmul.f32 0.5, %v1311_v21  ;;  %v2491_v9 = vpop.eup %2490  ;;  %v3485_v21 = vld [vmem:[#allocation10 + $0xe8] ss:$16 sps:$4 sm:$0xff]  }
 0x3b4   :  { %v1327_v10 = vmul.f32 %v2489_v0, %v1305_v18  ;;  %v1306_v11 = vmul.f32 0.5, %v1304_v23  ;;  %v1312_v24 = vadd.f32 1.0, %v2491_v9  ;;  %v2493_v12 = vpop.eup %2492  ;;  %v3785_v18 = vld [vmem:[#allocation32_spill] sm:$0xff]  ;;  %v3786_v9 = vld [vmem:[#allocation33_spill] sm:$0xff] }
 0x3b5   :  { %v1325_v20 = vmul.f32 %v1313_v22, %v3335_v33  ;;  %v2495_v49 = vpop.eup %2494  ;;  %v1439_v0 = vunpack.c.l.bf16 %v3785_v18 }
 0x3b6   :  { %v1314_v45 = vmul.f32 0.5, %v1312_v24  ;;  %v1328_v46 = vmul.f32 %v2493_v12, %v1306_v11  ;;  %v2497_v50 = vpop.eup %2496  ;;  %v1321_v51 = vadd.f32 1.0, %v2495_v49  ;;  %v1443_v49 = vunpack.c.h.bf16 %v3785_v18 }
 0x3b7   :  { %v3401_v14 = vadd.f32 %v1327_v10, %v1325_v20  ;;  %v1322_v33 = vadd.f32 1.0, %v2497_v50  ;;  %v1438_v10 = vunpack.c.l.bf16 %v3786_v9  ;;  %v3787_v20 = vld [vmem:[#allocation34_spill] sm:$0xff] }
 0x3b8   :  { %v1326_v47 = vmul.f32 %v1314_v45, %v3339_v8  ;;  %v1323_v54 = vmul.f32 0.5, %v1321_v51  ;;  %v3415_v8 = vld [vmem:[#allocation10 + $0x28] ss:$16 sps:$4 sm:$0xff]   ;;  %v1440_v11 = vunpack.c.l.bf16 %v3787_v20 }
 0x3b9   :  { %2498 = vtanh.f32 %v3401_v14  ;;  %v1324_v55 = vmul.f32 0.5, %v1322_v33 }
 0x3ba   :  { %v3405_v48 = vadd.f32 %v1328_v46, %v1326_v47  ;;  %v1441_v47 = vunpack.c.h.bf16 %v3784_v34 }
 0x3bc   :  { %2500 = vtanh.f32 %v3405_v48 }
 0x3c3   :  { %v2499_v53 = vpop.eup %2498 }
 0x3c4   :  { %v1333_v57 = vmul.f32 %v2499_v53, %v1323_v54  ;;  %v1442_v54 = vunpack.c.h.bf16 %v3786_v9 }
 0x3c6   :  { %v2501_v56 = vpop.eup %2500 }
 0x3c7   :  { %v1334_v58 = vmul.f32 %v2501_v56, %v1324_v55  ;;  %v1444_v55 = vunpack.c.h.bf16 %v3787_v20 }
 0x3c9   :  { %v1335_v59 = vpack.c.bf16 %v1334_v58, %v1333_v57 }
 0x3cb   :  { %2296 = vst [vmem:[#allocation16 + $0x10] sm:$0xff] %v1335_v59   ;;  %1384 = vmatmul.mubr.bf16.vlgmr.msra.gmra.mrb[44].mxu0 %v1335_v59  ;;  %1427 = vmatmul.mubr.bf16.vlgmr.msra.gmra.mrb[44].mxu1 %v1335_v59 }
 0x3cc   :  { %1506 = vmatpush1.bf16.msra.mxu0 %v3342_v27  ;;  %1549 = vmatpush1.bf16.msra.mxu1 %v3345_v35 }
 0x3cd   :  { %1507 = vmatprep.subr.bf16.mxu0 %v3348_v43  ;;  %1550 = vmatprep.subr.bf16.mxu1 %v3351_v28 }
 0x3ce   :  { %1537 = vmatprep.mubr.bf16.mxu0 %v3778_v29  ;;  %1580 = vmatprep.mubr.bf16.mxu1 %v3778_v29 }
 0x3d0   :  { %1508 = vmatpush1.bf16.msra.mxu0 %v3356_v52  ;;  %1551 = vmatpush1.bf16.msra.mxu1 %v3415_v8 }
 0x3d1   :  { %1509 = vmatprep.subr.bf16.mxu0 %v3360_v26  ;;  %1552 = vmatprep.subr.bf16.mxu1 %v3419_v60 }
 0x3d4   :  { %1510 = vmatpush1.bf16.msra.mxu0 %v3422_v62  ;;  %1553 = vmatpush1.bf16.msra.mxu1 %v3425_v63 }
 0x3d5   :  { %1511 = vmatprep.subr.bf16.mxu0 %v3428_v1  ;;  %1554 = vmatprep.subr.bf16.mxu1 %v3431_v2 }
 0x3d8   :  { %1512 = vmatpush1.bf16.msra.mxu0 %v3434_v3  ;;  %1555 = vmatpush1.bf16.msra.mxu1 %v3437_v4 }
 0x3d9   :  { %1513 = vmatprep.subr.bf16.mxu0 %v3440_v5  ;;  %1556 = vmatprep.subr.bf16.mxu1 %v3443_v17 }
 0x3dc   :  { %1514 = vmatpush1.bf16.msra.mxu0 %v3446_v19  ;;  %1557 = vmatpush1.bf16.msra.mxu1 %v3449_v36 }
 0x3dd   :  { %1515 = vmatprep.subr.bf16.mxu0 %v3452_v37  ;;  %1558 = vmatprep.subr.bf16.mxu1 %v3455_v38 }
 0x3e0   :  { %1516 = vmatpush1.bf16.msra.mxu0 %v3458_v39  ;;  %1559 = vmatpush1.bf16.msra.mxu1 %v3461_v40 }
 0x3e1   :  { %1517 = vmatprep.subr.bf16.mxu0 %v3464_v41  ;;  %1560 = vmatprep.subr.bf16.mxu1 %v3467_v15 }
 0x3e4   :  { %1518 = vmatpush1.bf16.msra.mxu0 %v3470_v30  ;;  %1561 = vmatpush1.bf16.msra.mxu1 %v3473_v6 }
 0x3e5   :  { %1519 = vmatprep.subr.bf16.mxu0 %v3476_v61  ;;  %1562 = vmatprep.subr.bf16.mxu1 %v3479_v31 }
 0x3e8   :  { %1520 = vmatpush1.bf16.msra.mxu0 %v3482_v16  ;;  %1563 = vmatpush1.bf16.msra.mxu1 %v3485_v21 }
 0x3e9   :  { %1659 = vmatprep.subr.bf16.mxu0 %v3386_v42  ;;  %1702 = vmatprep.subr.bf16.mxu1 %v3389_v44 }
 0x49e   :  { %v1385_v22 = vpop.f32.mrb[44].mxu0  ;;  %v1428_v23 = vpop.f32.mrb[44].mxu1 }
 0x49f   :  { %v1445_v24 = vadd.f32 %v1437_v13, %v1385_v22  ;;  %v1447_v12 = vadd.f32 %v1439_v0, %v1428_v23  ;;  %v1387_v45 = vpop.f32.mrb[45].mxu0  ;;  %v1430_v46 = vpop.f32.mrb[45].mxu1 }
 0x4a0   :  { %v1446_v50 = vadd.f32 %v1438_v10, %v1387_v45  ;;  %v1448_v51 = vadd.f32 %v1440_v11, %v1430_v46  ;;  %v1389_v33 = vpop.f32.mrb[46].mxu0  ;;  %v1432_v53 = vpop.f32.mrb[46].mxu1 }
 0x4a1   :  { %v1453_v56 = vmul.f32 0.5, %v1445_v24  ;;  %v1449_v57 = vadd.f32 %v1441_v47, %v1389_v33  ;;  %v1451_v58 = vadd.f32 %v1443_v49, %v1432_v53  ;;  %v1391_v59 = vpop.f32.mrb[47].mxu0  ;;  %v1434_v13 = vpop.f32.mrb[47].mxu1 }
 0x4a2   :  { %v1461_v0 = vmul.f32 0.5, %v1446_v50  ;;  %v1450_v22 = vadd.f32 %v1442_v54, %v1391_v59  ;;  %v1452_v23 = vadd.f32 %v1444_v55, %v1434_v13  ;;  %v1471_v20 = vmul.f32 0.5, %v1448_v51 }
 0x4a3   :  { %2502 = vtanh.f32 %v1453_v56  ;;  %v1454_v34 = vmul.f32 0.5, %v1449_v57 }
 0x4a4   :  { %2504 = vtanh.f32 %v1461_v0  ;;  %v1462_v18 = vmul.f32 0.5, %v1450_v22  ;;  %v1472_v45 = vmul.f32 0.5, %v1452_v23 }
 0x4a5   :  { %2506 = vtanh.f32 %v1454_v34 }
 0x4a6   :  { %2508 = vtanh.f32 %v1447_v12 }
 0x4a7   :  { %2510 = vtanh.f32 %v1462_v18 }
 0x4a8   :  { %2512 = vtanh.f32 %v1451_v58 }
 0x4a9   :  { %2514 = vtanh.f32 %v1471_v20 }
 0x4aa   :  { %2516 = vtanh.f32 %v1472_v45 }
 0x4ad   :  { %v2503_v10 = vpop.eup %2502 }
 0x4ae   :  { %v2505_v9 = vpop.eup %2504  ;;  %v1457_v11 = vadd.f32 1.0, %v2503_v10 }
 0x4af   :  { %v1465_v24 = vadd.f32 1.0, %v2505_v9  ;;  %v2507_v46 = vpop.eup %2506 }
 0x4b0   :  { %v1459_v47 = vmul.f32 0.5, %v1457_v11  ;;  %v2509_v49 = vpop.eup %2508  ;;  %v1458_v33 = vadd.f32 1.0, %v2507_v46 }
 0x4b1   :  { %v1467_v50 = vmul.f32 0.5, %v1465_v24  ;;  %v2511_v53 = vpop.eup %2510 }
 0x4b2   :  { %v1481_v54 = vmul.f32 %v2509_v49, %v1459_v47  ;;  %v1460_v56 = vmul.f32 0.5, %v1458_v33  ;;  %v1466_v12 = vadd.f32 1.0, %v2511_v53  ;;  %v2513_v57 = vpop.eup %2512  ;;  %v3789_v47 = vld [vmem:[#allocation36_spill] sm:$0xff]  ;;  %v3790_v53 = vld [vmem:[#allocation37_spill] sm:$0xff] }
 0x4b3   :  { %v1479_v55 = vmul.f32 %v1467_v50, %v3401_v14  ;;  %v2515_v22 = vpop.eup %2514  ;;  %v1593_v49 = vunpack.c.l.bf16 %v3789_v47 }
 0x4b4   :  { %v1468_v59 = vmul.f32 0.5, %v1466_v12  ;;  %v1482_v51 = vmul.f32 %v2513_v57, %v1460_v56  ;;  %v2517_v23 = vpop.eup %2516  ;;  %v1475_v34 = vadd.f32 1.0, %v2515_v22  ;;  %v1597_v22 = vunpack.c.h.bf16 %v3789_v47 }
 0x4b5   :  { %v3499_v58 = vadd.f32 %v1481_v54, %v1479_v55  ;;  %v1476_v14 = vadd.f32 1.0, %v2517_v23  ;;  %v1592_v54 = vunpack.c.l.bf16 %v3790_v53  ;;  %v3791_v55 = vld [vmem:[#allocation38_spill] sm:$0xff] }
 0x4b6   :  { %v1480_v13 = vmul.f32 %v1468_v59, %v3405_v48  ;;  %v1477_v10 = vmul.f32 0.5, %v1475_v34  ;;  %v3788_v48 = vld [vmem:[#allocation35_spill] sm:$0xff]  ;;  %v1594_v56 = vunpack.c.l.bf16 %v3791_v55 }
 0x4b7   :  { %2518 = vtanh.f32 %v3499_v58  ;;  %v1478_v9 = vmul.f32 0.5, %v1476_v14  ;;  %v1591_v46 = vunpack.c.l.bf16 %v3788_v48 }
 0x4b8   :  { %v3503_v0 = vadd.f32 %v1482_v51, %v1480_v13  ;;  %v1595_v13 = vunpack.c.h.bf16 %v3788_v48 }
 0x4ba   :  { %2520 = vtanh.f32 %v3503_v0 }
 0x4c1   :  { %v2519_v18 = vpop.eup %2518 }
 0x4c2   :  { %v1487_v20 = vmul.f32 %v2519_v18, %v1477_v10  ;;  %v1596_v10 = vunpack.c.h.bf16 %v3790_v53 }
 0x4c4   :  { %v2521_v11 = vpop.eup %2520 }
 0x4c5   :  { %v1488_v24 = vmul.f32 %v2521_v11, %v1478_v9  ;;  %v1598_v9 = vunpack.c.h.bf16 %v3791_v55 }
 0x4c7   :  { %v1489_v45 = vpack.c.bf16 %v1488_v24, %v1487_v20 }
 0x4c9   :  { %2301 = vst [vmem:[#allocation16 + $0x18] sm:$0xff] %v1489_v45   ;;  %1538 = vmatmul.mubr.bf16.vlgmr.msra.gmra.mrb[48].mxu0 %v1489_v45  ;;  %1581 = vmatmul.mubr.bf16.vlgmr.msra.gmra.mrb[48].mxu1 %v1489_v45 }
 0x4ca   :  { %1660 = vmatpush1.bf16.msra.mxu0 %v3342_v27  ;;  %1703 = vmatpush1.bf16.msra.mxu1 %v3345_v35 }
 0x4cb   :  { %1661 = vmatprep.subr.bf16.mxu0 %v3348_v43  ;;  %1704 = vmatprep.subr.bf16.mxu1 %v3351_v28 }
 0x4cc   :  { %1691 = vmatprep.mubr.bf16.mxu0 %v3778_v29  ;;  %1734 = vmatprep.mubr.bf16.mxu1 %v3778_v29 }
 0x4ce   :  { %1662 = vmatpush1.bf16.msra.mxu0 %v3356_v52  ;;  %1705 = vmatpush1.bf16.msra.mxu1 %v3415_v8 }
 0x4cf   :  { %1663 = vmatprep.subr.bf16.mxu0 %v3360_v26  ;;  %1706 = vmatprep.subr.bf16.mxu1 %v3419_v60 }
 0x4d2   :  { %1664 = vmatpush1.bf16.msra.mxu0 %v3422_v62  ;;  %1707 = vmatpush1.bf16.msra.mxu1 %v3425_v63 }
 0x4d3   :  { %1665 = vmatprep.subr.bf16.mxu0 %v3428_v1  ;;  %1708 = vmatprep.subr.bf16.mxu1 %v3431_v2 }
 0x4d6   :  { %1666 = vmatpush1.bf16.msra.mxu0 %v3434_v3  ;;  %1709 = vmatpush1.bf16.msra.mxu1 %v3437_v4 }
 0x4d7   :  { %1667 = vmatprep.subr.bf16.mxu0 %v3440_v5  ;;  %1710 = vmatprep.subr.bf16.mxu1 %v3443_v17 }
 0x4da   :  { %1668 = vmatpush1.bf16.msra.mxu0 %v3446_v19  ;;  %1711 = vmatpush1.bf16.msra.mxu1 %v3449_v36 }
 0x4db   :  { %1669 = vmatprep.subr.bf16.mxu0 %v3452_v37  ;;  %1712 = vmatprep.subr.bf16.mxu1 %v3455_v38 }
 0x4de   :  { %1670 = vmatpush1.bf16.msra.mxu0 %v3458_v39  ;;  %1713 = vmatpush1.bf16.msra.mxu1 %v3461_v40 }
 0x4df   :  { %1671 = vmatprep.subr.bf16.mxu0 %v3464_v41  ;;  %1714 = vmatprep.subr.bf16.mxu1 %v3467_v15 }
 0x4e2   :  { %1672 = vmatpush1.bf16.msra.mxu0 %v3470_v30  ;;  %1715 = vmatpush1.bf16.msra.mxu1 %v3473_v6 }
 0x4e3   :  { %1673 = vmatprep.subr.bf16.mxu0 %v3476_v61  ;;  %1716 = vmatprep.subr.bf16.mxu1 %v3479_v31 }
 0x4e6   :  { %1674 = vmatpush1.bf16.msra.mxu0 %v3482_v16  ;;  %1717 = vmatpush1.bf16.msra.mxu1 %v3485_v21 }
 0x4e7   :  { %1813 = vmatprep.subr.bf16.mxu0 %v3386_v42  ;;  %1856 = vmatprep.subr.bf16.mxu1 %v3389_v44 }
 0x59c   :  { %v1539_v50 = vpop.f32.mrb[48].mxu0  ;;  %v1582_v33 = vpop.f32.mrb[48].mxu1 }
 0x59d   :  { %v1599_v12 = vadd.f32 %v1591_v46, %v1539_v50  ;;  %v1601_v57 = vadd.f32 %v1593_v49, %v1582_v33  ;;  %v1541_v59 = vpop.f32.mrb[49].mxu0  ;;  %v1584_v51 = vpop.f32.mrb[49].mxu1 }
 0x59e   :  { %v1600_v23 = vadd.f32 %v1592_v54, %v1541_v59  ;;  %v1602_v34 = vadd.f32 %v1594_v56, %v1584_v51  ;;  %v1543_v14 = vpop.f32.mrb[50].mxu0  ;;  %v1586_v18 = vpop.f32.mrb[50].mxu1 }
 0x59f   :  { %v1607_v11 = vmul.f32 0.5, %v1599_v12  ;;  %v1603_v20 = vadd.f32 %v1595_v13, %v1543_v14  ;;  %v1605_v24 = vadd.f32 %v1597_v22, %v1586_v18  ;;  %v1545_v45 = vpop.f32.mrb[51].mxu0  ;;  %v1588_v46 = vpop.f32.mrb[51].mxu1 }
 0x5a0   :  { %v1615_v49 = vmul.f32 0.5, %v1600_v23  ;;  %v1604_v50 = vadd.f32 %v1596_v10, %v1545_v45  ;;  %v1606_v33 = vadd.f32 %v1598_v9, %v1588_v46  ;;  %v1625_v55 = vmul.f32 0.5, %v1602_v34 }
 0x5a1   :  { %2522 = vtanh.f32 %v1607_v11  ;;  %v1608_v48 = vmul.f32 0.5, %v1603_v20 }
 0x5a2   :  { %2524 = vtanh.f32 %v1615_v49  ;;  %v1616_v47 = vmul.f32 0.5, %v1604_v50  ;;  %v1626_v59 = vmul.f32 0.5, %v1606_v33 }
 0x5a3   :  { %2526 = vtanh.f32 %v1608_v48 }
 0x5a4   :  { %2528 = vtanh.f32 %v1601_v57 }
 0x5a5   :  { %2530 = vtanh.f32 %v1616_v47 }
 0x5a6   :  { %2532 = vtanh.f32 %v1605_v24 }
 0x5a7   :  { %2534 = vtanh.f32 %v1625_v55 }
 0x5a8   :  { %2536 = vtanh.f32 %v1626_v59 }
 0x5ab   :  { %v2523_v54 = vpop.eup %2522 }
 0x5ac   :  { %v2525_v53 = vpop.eup %2524  ;;  %v1611_v56 = vadd.f32 1.0, %v2523_v54 }
 0x5ad   :  { %v1619_v12 = vadd.f32 1.0, %v2525_v53  ;;  %v2527_v51 = vpop.eup %2526 }
 0x5ae   :  { %v1613_v13 = vmul.f32 0.5, %v1611_v56  ;;  %v2529_v22 = vpop.eup %2528  ;;  %v1612_v14 = vadd.f32 1.0, %v2527_v51 }
 0x5af   :  { %v1621_v23 = vmul.f32 0.5, %v1619_v12  ;;  %v2531_v18 = vpop.eup %2530 }
 0x5b0   :  { %v1635_v10 = vmul.f32 %v2529_v22, %v1613_v13  ;;  %v1614_v11 = vmul.f32 0.5, %v1612_v14  ;;  %v1620_v57 = vadd.f32 1.0, %v2531_v18  ;;  %v2533_v20 = vpop.eup %2532  ;;  %v3793_v13 = vld [vmem:[#allocation40_spill] sm:$0xff]  ;;  %v3794_v18 = vld [vmem:[#allocation41_spill] sm:$0xff] }
 0x5b1   :  { %v1633_v9 = vmul.f32 %v1621_v23, %v3499_v58  ;;  %v2535_v50 = vpop.eup %2534  ;;  %v1747_v22 = vunpack.c.l.bf16 %v3793_v13 }
 0x5b2   :  { %v1622_v45 = vmul.f32 0.5, %v1620_v57  ;;  %v1636_v34 = vmul.f32 %v2533_v20, %v1614_v11  ;;  %v2537_v33 = vpop.eup %2536  ;;  %v1629_v48 = vadd.f32 1.0, %v2535_v50 }
 0x5b3   :  { %v3549_v24 = vadd.f32 %v1635_v10, %v1633_v9  ;;  %v1630_v58 = vadd.f32 1.0, %v2537_v33  ;;  %v1746_v10 = vunpack.c.l.bf16 %v3794_v18  ;;  %v3795_v9 = vld [vmem:[#allocation42_spill] sm:$0xff] }
 0x5b4   :  { %v1634_v46 = vmul.f32 %v1622_v45, %v3503_v0  ;;  %v1631_v54 = vmul.f32 0.5, %v1629_v48  ;;  %v3792_v0 = vld [vmem:[#allocation39_spill] sm:$0xff]  ;;  %v1748_v11 = vunpack.c.l.bf16 %v3795_v9 }
 0x5b5   :  { %2538 = vtanh.f32 %v3549_v24  ;;  %v1632_v53 = vmul.f32 0.5, %v1630_v58  ;;  %v1745_v51 = vunpack.c.l.bf16 %v3792_v0  ;;  %v1750_v58 = vunpack.c.h.bf16 %v3794_v18 }
 0x5b6   :  { %v3553_v49 = vadd.f32 %v1636_v34, %v1634_v46  ;;  %v1749_v46 = vunpack.c.h.bf16 %v3792_v0 }
 0x5b8   :  { %2540 = vtanh.f32 %v3553_v49 }
 0x5bf   :  { %v2539_v47 = vpop.eup %2538 }
 0x5c0   :  { %v1641_v55 = vmul.f32 %v2539_v47, %v1631_v54  ;;  %v1752_v47 = vunpack.c.h.bf16 %v3795_v9 }
 0x5c2   :  { %v2541_v56 = vpop.eup %2540 }
 0x5c3   :  { %v1642_v12 = vmul.f32 %v2541_v56, %v1632_v53 }
 0x5c5   :  { %v1643_v59 = vpack.c.bf16 %v1642_v12, %v1641_v55 }
 0x5c7   :  { %2306 = vst [vmem:[#allocation16 + $0x20] sm:$0xff] %v1643_v59   ;;  %1692 = vmatmul.mubr.bf16.vlgmr.msra.gmra.mrb[52].mxu0 %v1643_v59  ;;  %1735 = vmatmul.mubr.bf16.vlgmr.msra.gmra.mrb[52].mxu1 %v1643_v59 }
 0x5c8   :  { %1814 = vmatpush1.bf16.msra.mxu0 %v3342_v27  ;;  %1857 = vmatpush1.bf16.msra.mxu1 %v3345_v35 }
 0x5c9   :  { %1815 = vmatprep.subr.bf16.mxu0 %v3348_v43  ;;  %1858 = vmatprep.subr.bf16.mxu1 %v3351_v28 }
 0x5ca   :  { %1845 = vmatprep.mubr.bf16.mxu0 %v3778_v29  ;;  %1888 = vmatprep.mubr.bf16.mxu1 %v3778_v29 }
 0x5cc   :  { %1816 = vmatpush1.bf16.msra.mxu0 %v3356_v52  ;;  %1859 = vmatpush1.bf16.msra.mxu1 %v3415_v8 }
 0x5cd   :  { %1817 = vmatprep.subr.bf16.mxu0 %v3360_v26  ;;  %1860 = vmatprep.subr.bf16.mxu1 %v3419_v60 }
 0x5d0   :  { %1818 = vmatpush1.bf16.msra.mxu0 %v3422_v62  ;;  %1861 = vmatpush1.bf16.msra.mxu1 %v3425_v63 }
 0x5d1   :  { %1819 = vmatprep.subr.bf16.mxu0 %v3428_v1  ;;  %1862 = vmatprep.subr.bf16.mxu1 %v3431_v2 }
 0x5d4   :  { %1820 = vmatpush1.bf16.msra.mxu0 %v3434_v3  ;;  %1863 = vmatpush1.bf16.msra.mxu1 %v3437_v4 }
 0x5d5   :  { %1821 = vmatprep.subr.bf16.mxu0 %v3440_v5  ;;  %1864 = vmatprep.subr.bf16.mxu1 %v3443_v17 }
 0x5d8   :  { %1822 = vmatpush1.bf16.msra.mxu0 %v3446_v19  ;;  %1865 = vmatpush1.bf16.msra.mxu1 %v3449_v36 }
 0x5d9   :  { %1823 = vmatprep.subr.bf16.mxu0 %v3452_v37  ;;  %1866 = vmatprep.subr.bf16.mxu1 %v3455_v38 }
 0x5dc   :  { %1824 = vmatpush1.bf16.msra.mxu0 %v3458_v39  ;;  %1867 = vmatpush1.bf16.msra.mxu1 %v3461_v40 }
 0x5dd   :  { %1825 = vmatprep.subr.bf16.mxu0 %v3464_v41  ;;  %1868 = vmatprep.subr.bf16.mxu1 %v3467_v15 }
 0x5e0   :  { %1826 = vmatpush1.bf16.msra.mxu0 %v3470_v30  ;;  %1869 = vmatpush1.bf16.msra.mxu1 %v3473_v6 }
 0x5e1   :  { %1827 = vmatprep.subr.bf16.mxu0 %v3476_v61  ;;  %1870 = vmatprep.subr.bf16.mxu1 %v3479_v31 }
 0x5e4   :  { %1828 = vmatpush1.bf16.msra.mxu0 %v3482_v16  ;;  %1871 = vmatpush1.bf16.msra.mxu1 %v3485_v21 }
 0x5e5   :  { %1967 = vmatprep.subr.bf16.mxu0 %v3386_v42  ;;  %2010 = vmatprep.subr.bf16.mxu1 %v3389_v44  ;;  %v1751_v42 = vunpack.c.h.bf16 %v3793_v13 }
 0x69a   :  { %v1693_v23 = vpop.f32.mrb[52].mxu0  ;;  %v1736_v14 = vpop.f32.mrb[52].mxu1 }
 0x69b   :  { %v1753_v57 = vadd.f32 %v1745_v51, %v1693_v23  ;;  %v1755_v20 = vadd.f32 %v1747_v22, %v1736_v14  ;;  %v1695_v45 = vpop.f32.mrb[53].mxu0  ;;  %v1738_v34 = vpop.f32.mrb[53].mxu1 }
 0x69c   :  { %v1754_v50 = vadd.f32 %v1746_v10, %v1695_v45  ;;  %v1756_v44 = vadd.f32 %v1748_v11, %v1738_v34  ;;  %v1697_v33 = vpop.f32.mrb[54].mxu0  ;;  %v1740_v48 = vpop.f32.mrb[54].mxu1 }
 0x69d   :  { %v1761_v54 = vmul.f32 0.5, %v1753_v57  ;;  %v1757_v53 = vadd.f32 %v1749_v46, %v1697_v33  ;;  %v1759_v56 = vadd.f32 %v1751_v42, %v1740_v48  ;;  %v1699_v55 = vpop.f32.mrb[55].mxu0  ;;  %v1742_v12 = vpop.f32.mrb[55].mxu1 }
 0x69e   :  { %v1769_v59 = vmul.f32 0.5, %v1754_v50  ;;  %v1758_v51 = vadd.f32 %v1750_v58, %v1699_v55  ;;  %v1760_v22 = vadd.f32 %v1752_v47, %v1742_v12  ;;  %v1779_v10 = vmul.f32 0.5, %v1756_v44 }
 0x69f   :  { %2542 = vtanh.f32 %v1761_v54  ;;  %v1762_v0 = vmul.f32 0.5, %v1757_v53 }
 0x6a0   :  { %2544 = vtanh.f32 %v1769_v59  ;;  %v1770_v13 = vmul.f32 0.5, %v1758_v51  ;;  %v1780_v11 = vmul.f32 0.5, %v1760_v22 }
 0x6a1   :  { %2546 = vtanh.f32 %v1762_v0 }
 0x6a2   :  { %2548 = vtanh.f32 %v1755_v20 }
 0x6a3   :  { %2550 = vtanh.f32 %v1770_v13 }
 0x6a4   :  { %2552 = vtanh.f32 %v1759_v56 }
 0x6a5   :  { %2554 = vtanh.f32 %v1779_v10 }
 0x6a6   :  { %2556 = vtanh.f32 %v1780_v11 }
 0x6a9   :  { %v2543_v23 = vpop.eup %2542 }
 0x6aa   :  { %v2545_v14 = vpop.eup %2544  ;;  %v1765_v18 = vadd.f32 1.0, %v2543_v23 }
 0x6ab   :  { %v1773_v9 = vadd.f32 1.0, %v2545_v14  ;;  %v2547_v57 = vpop.eup %2546 }
 0x6ac   :  { %v1767_v45 = vmul.f32 0.5, %v1765_v18  ;;  %v2549_v34 = vpop.eup %2548  ;;  %v1766_v42 = vadd.f32 1.0, %v2547_v57 }
 0x6ad   :  { %v1775_v46 = vmul.f32 0.5, %v1773_v9  ;;  %v2551_v50 = vpop.eup %2550 }
 0x6ae   :  { %v1789_v33 = vmul.f32 %v2549_v34, %v1767_v45  ;;  %v1768_v58 = vmul.f32 0.5, %v1766_v42  ;;  %v1774_v20 = vadd.f32 1.0, %v2551_v50  ;;  %v2553_v47 = vpop.eup %2552 }
 0x6af   :  { %v1787_v48 = vmul.f32 %v1775_v46, %v3549_v24  ;;  %v2555_v12 = vpop.eup %2554 }
 0x6b0   :  { %v1776_v53 = vmul.f32 0.5, %v1774_v20  ;;  %v1790_v44 = vmul.f32 %v2553_v47, %v1768_v58  ;;  %v2557_v59 = vpop.eup %2556  ;;  %v1783_v51 = vadd.f32 1.0, %v2555_v12 }
 0x6b1   :  { %v3599_v54 = vadd.f32 %v1789_v33, %v1787_v48  ;;  %v1784_v24 = vadd.f32 1.0, %v2557_v59 }
 0x6b2   :  { %v1788_v56 = vmul.f32 %v1776_v53, %v3553_v49  ;;  %v1785_v0 = vmul.f32 0.5, %v1783_v51 }
 0x6b3   :  { %2558 = vtanh.f32 %v3599_v54  ;;  %v1786_v13 = vmul.f32 0.5, %v1784_v24 }
 0x6b4   :  { %v3603_v55 = vadd.f32 %v1790_v44, %v1788_v56 }
 0x6b6   :  { %2560 = vtanh.f32 %v3603_v55 }
 0x6bd   :  { %v2559_v22 = vpop.eup %2558 }
 0x6be   :  { %v1795_v14 = vmul.f32 %v2559_v22, %v1785_v0 }
 0x6c0   :  { %v2561_v23 = vpop.eup %2560 }
 0x6c1   :  { %v1796_v18 = vmul.f32 %v2561_v23, %v1786_v13 }
 0x6c3   :  { %v1797_v10 = vpack.c.bf16 %v1796_v18, %v1795_v14 }
 0x6c5   :  { %2311 = vst [vmem:[#allocation16 + $0x28] sm:$0xff] %v1797_v10   ;;  %1846 = vmatmul.mubr.bf16.vlgmr.msra.gmra.mrb[56].mxu0 %v1797_v10  ;;  %1889 = vmatmul.mubr.bf16.vlgmr.msra.gmra.mrb[56].mxu1 %v1797_v10 }
 0x6c6   :  { %1968 = vmatpush1.bf16.msra.mxu0 %v3342_v27  ;;  %2011 = vmatpush1.bf16.msra.mxu1 %v3345_v35  ;;  %v1901_v27 = vunpack.c.l.bf16 %v3256_v32 }
 0x6c7   :  { %1969 = vmatprep.subr.bf16.mxu0 %v3348_v43  ;;  %2012 = vmatprep.subr.bf16.mxu1 %v3351_v28  ;;  %v1900_v28 = vunpack.c.l.bf16 %v3258_v7 }
 0x6c8   :  { %1999 = vmatprep.mubr.bf16.mxu0 %v3778_v29  ;;  %2042 = vmatprep.mubr.bf16.mxu1 %v3778_v29  ;;  %v1899_v29 = vunpack.c.l.bf16 %v3254_v25 }
 0x6ca   :  { %1970 = vmatpush1.bf16.msra.mxu0 %v3356_v52  ;;  %2013 = vmatpush1.bf16.msra.mxu1 %v3415_v8  ;;  %v3796_v52 = vld [vmem:[#allocation43_spill] sm:$0xff] }
 0x6cb   :  { %1971 = vmatprep.subr.bf16.mxu0 %v3360_v26  ;;  %2014 = vmatprep.subr.bf16.mxu1 %v3419_v60  ;;  %v1902_v26 = vunpack.c.l.bf16 %v3796_v52 }
 0x6ce   :  { %1972 = vmatpush1.bf16.msra.mxu0 %v3422_v62  ;;  %2015 = vmatpush1.bf16.msra.mxu1 %v3425_v63 }
 0x6cf   :  { %1973 = vmatprep.subr.bf16.mxu0 %v3428_v1  ;;  %2016 = vmatprep.subr.bf16.mxu1 %v3431_v2  ;;  %v1903_v1 = vunpack.c.h.bf16 %v3254_v25  ;;  %v1905_v2 = vunpack.c.h.bf16 %v3256_v32 }
 0x6d2   :  { %1974 = vmatpush1.bf16.msra.mxu0 %v3434_v3  ;;  %2017 = vmatpush1.bf16.msra.mxu1 %v3437_v4 }
 0x6d3   :  { %1975 = vmatprep.subr.bf16.mxu0 %v3440_v5  ;;  %2018 = vmatprep.subr.bf16.mxu1 %v3443_v17 }
 0x6d6   :  { %1976 = vmatpush1.bf16.msra.mxu0 %v3446_v19  ;;  %2019 = vmatpush1.bf16.msra.mxu1 %v3449_v36  ;;  %v1904_v19 = vunpack.c.h.bf16 %v3258_v7  ;;  %v1906_v36 = vunpack.c.h.bf16 %v3796_v52 }
 0x6d7   :  { %1977 = vmatprep.subr.bf16.mxu0 %v3452_v37  ;;  %2020 = vmatprep.subr.bf16.mxu1 %v3455_v38 }
 0x6da   :  { %1978 = vmatpush1.bf16.msra.mxu0 %v3458_v39  ;;  %2021 = vmatpush1.bf16.msra.mxu1 %v3461_v40 }
 0x6db   :  { %1979 = vmatprep.subr.bf16.mxu0 %v3464_v41  ;;  %2022 = vmatprep.subr.bf16.mxu1 %v3467_v15 }
 0x6de   :  { %1980 = vmatpush1.bf16.msra.mxu0 %v3470_v30  ;;  %2023 = vmatpush1.bf16.msra.mxu1 %v3473_v6 }
 0x6df   :  { %1981 = vmatprep.subr.bf16.mxu0 %v3476_v61  ;;  %2024 = vmatprep.subr.bf16.mxu1 %v3479_v31 }
 0x6e2   :  { %1982 = vmatpush1.bf16.msra.mxu0 %v3482_v16  ;;  %2025 = vmatpush1.bf16.msra.mxu1 %v3485_v21 }
 0x798   :  { %v1847_v35 = vpop.f32.mrb[56].mxu0  ;;  %v1890_v43 = vpop.f32.mrb[56].mxu1 }
 0x799   :  { %v1907_v8 = vadd.f32 %v1899_v29, %v1847_v35  ;;  %v1909_v60 = vadd.f32 %v1901_v27, %v1890_v43  ;;  %v1849_v62 = vpop.f32.mrb[57].mxu0  ;;  %v1892_v63 = vpop.f32.mrb[57].mxu1  ;;  %v3798_v29 = vld [vmem:[#allocation45_spill] sm:$0xff] }
 0x79a   :  { %v1908_v3 = vadd.f32 %v1900_v28, %v1849_v62  ;;  %v1910_v4 = vadd.f32 %v1902_v26, %v1892_v63  ;;  %v1851_v5 = vpop.f32.mrb[58].mxu0  ;;  %v1894_v17 = vpop.f32.mrb[58].mxu1  ;;  %v2055_v27 = vunpack.c.l.bf16 %v3798_v29  ;;  %v3799_v28 = vld [vmem:[#allocation46_spill] sm:$0xff]  ;;  %v3800_v26 = vld [vmem:[#allocation47_spill] sm:$0xff] }
 0x79b   :  { %v1915_v37 = vmul.f32 0.5, %v1907_v8  ;;  %v1911_v38 = vadd.f32 %v1903_v1, %v1851_v5  ;;  %v1913_v39 = vadd.f32 %v1905_v2, %v1894_v17  ;;  %v1853_v40 = vpop.f32.mrb[59].mxu0  ;;  %v1896_v41 = vpop.f32.mrb[59].mxu1  ;;  %v2054_v52 = vunpack.c.l.bf16 %v3799_v28 }
 0x79c   :  { %v1923_v15 = vmul.f32 0.5, %v1908_v3  ;;  %v1912_v30 = vadd.f32 %v1904_v19, %v1853_v40  ;;  %v1914_v6 = vadd.f32 %v1906_v36, %v1896_v41  ;;  %v1933_v16 = vmul.f32 0.5, %v1910_v4 }
 0x79d   :  { %2562 = vtanh.f32 %v1915_v37  ;;  %v1916_v25 = vmul.f32 0.5, %v1911_v38  ;;  %v2056_v8 = vunpack.c.l.bf16 %v3800_v26  ;;  %v2059_v3 = vunpack.c.h.bf16 %v3798_v29 }
 0x79e   :  { %2564 = vtanh.f32 %v1923_v15  ;;  %v1924_v32 = vmul.f32 0.5, %v1912_v30  ;;  %v1934_v49 = vmul.f32 0.5, %v1914_v6  ;;  %v2058_v36 = vunpack.c.h.bf16 %v3799_v28 }
 0x79f   :  { %2566 = vtanh.f32 %v1916_v25  ;;  %v2060_v37 = vunpack.c.h.bf16 %v3800_v26 }
 0x7a0   :  { %2568 = vtanh.f32 %v1909_v60 }
 0x7a1   :  { %2570 = vtanh.f32 %v1924_v32 }
 0x7a2   :  { %2572 = vtanh.f32 %v1913_v39 }
 0x7a3   :  { %2574 = vtanh.f32 %v1933_v16 }
 0x7a4   :  { %2576 = vtanh.f32 %v1934_v49 }
 0x7a7   :  { %v2563_v61 = vpop.eup %2562 }
 0x7a8   :  { %v2565_v7 = vpop.eup %2564  ;;  %v1919_v31 = vadd.f32 1.0, %v2563_v61 }
 0x7a9   :  { %v1927_v21 = vadd.f32 1.0, %v2565_v7  ;;  %v2567_v9 = vpop.eup %2566 }
 0x7aa   :  { %v1921_v11 = vmul.f32 0.5, %v1919_v31  ;;  %v2569_v57 = vpop.eup %2568  ;;  %v1920_v34 = vadd.f32 1.0, %v2567_v9 }
 0x7ab   :  { %v1929_v45 = vmul.f32 0.5, %v1927_v21  ;;  %v2571_v46 = vpop.eup %2570 }
 0x7ac   :  { %v1943_v42 = vmul.f32 %v2569_v57, %v1921_v11  ;;  %v1922_v33 = vmul.f32 0.5, %v1920_v34  ;;  %v1928_v48 = vadd.f32 1.0, %v2571_v46  ;;  %v2573_v58 = vpop.eup %2572 }
 0x7ad   :  { %v1941_v50 = vmul.f32 %v1929_v45, %v3599_v54  ;;  %v2575_v12 = vpop.eup %2574 }
 0x7ae   :  { %v1930_v47 = vmul.f32 0.5, %v1928_v48  ;;  %v1944_v53 = vmul.f32 %v2573_v58, %v1922_v33  ;;  %v2577_v59 = vpop.eup %2576  ;;  %v1937_v51 = vadd.f32 1.0, %v2575_v12 }
 0x7af   :  { %v3647_v20 = vadd.f32 %v1943_v42, %v1941_v50  ;;  %v1938_v54 = vadd.f32 1.0, %v2577_v59 }
 0x7b0   :  { %v1942_v44 = vmul.f32 %v1930_v47, %v3603_v55  ;;  %v1939_v22 = vmul.f32 0.5, %v1937_v51  ;;  %v3797_v55 = vld [vmem:[#allocation44_spill] sm:$0xff] }
 0x7b1   :  { %2578 = vtanh.f32 %v3647_v20  ;;  %v1940_v0 = vmul.f32 0.5, %v1938_v54  ;;  %v2053_v10 = vunpack.c.l.bf16 %v3797_v55  ;;  %v2057_v2 = vunpack.c.h.bf16 %v3797_v55 }
 0x7b2   :  { %v3651_v56 = vadd.f32 %v1944_v53, %v1942_v44 }
 0x7b4   :  { %2580 = vtanh.f32 %v3651_v56 }
 0x7bb   :  { %v2579_v24 = vpop.eup %2578 }
 0x7bc   :  { %v1949_v23 = vmul.f32 %v2579_v24, %v1939_v22 }
 0x7be   :  { %v2581_v13 = vpop.eup %2580 }
 0x7bf   :  { %v1950_v14 = vmul.f32 %v2581_v13, %v1940_v0 }
 0x7c1   :  { %v1951_v18 = vpack.c.bf16 %v1950_v14, %v1949_v23 }
 0x7c3   :  { %2316 = vst [vmem:[#allocation16 + $0x30] sm:$0xff] %v1951_v18   ;;  %2000 = vmatmul.mubr.bf16.vlgmr.msra.gmra.mrb[60].mxu0 %v1951_v18  ;;  %2043 = vmatmul.mubr.bf16.vlgmr.msra.gmra.mrb[60].mxu1 %v1951_v18 }
 0x896   :  { %v2001_v35 = vpop.f32.mrb[60].mxu0  ;;  %v2044_v43 = vpop.f32.mrb[60].mxu1 }
 0x897   :  { %v2061_v60 = vadd.f32 %v2053_v10, %v2001_v35  ;;  %v2063_v62 = vadd.f32 %v2055_v27, %v2044_v43  ;;  %v2003_v63 = vpop.f32.mrb[61].mxu0  ;;  %v2046_v1 = vpop.f32.mrb[61].mxu1 }
 0x898   :  { %v2062_v4 = vadd.f32 %v2054_v52, %v2003_v63  ;;  %v2064_v5 = vadd.f32 %v2056_v8, %v2046_v1  ;;  %v2005_v17 = vpop.f32.mrb[62].mxu0  ;;  %v2048_v19 = vpop.f32.mrb[62].mxu1 }
 0x899   :  { %v2069_v38 = vmul.f32 0.5, %v2061_v60  ;;  %v2065_v39 = vadd.f32 %v2057_v2, %v2005_v17  ;;  %v2067_v40 = vadd.f32 %v2059_v3, %v2048_v19  ;;  %v2007_v41 = vpop.f32.mrb[63].mxu0  ;;  %v2050_v15 = vpop.f32.mrb[63].mxu1 }
 0x89a   :  { %v2077_v30 = vmul.f32 0.5, %v2062_v4  ;;  %v2066_v6 = vadd.f32 %v2058_v36, %v2007_v41  ;;  %v2068_v25 = vadd.f32 %v2060_v37, %v2050_v15  ;;  %v2087_v7 = vmul.f32 0.5, %v2064_v5 }
 0x89b   :  { %2582 = vtanh.f32 %v2069_v38  ;;  %v2070_v32 = vmul.f32 0.5, %v2065_v39 }
 0x89c   :  { %2584 = vtanh.f32 %v2077_v30  ;;  %v2078_v61 = vmul.f32 0.5, %v2066_v6  ;;  %v2088_v9 = vmul.f32 0.5, %v2068_v25 }
 0x89d   :  { %2586 = vtanh.f32 %v2070_v32 }
 0x89e   :  { %2588 = vtanh.f32 %v2063_v62 }
 0x89f   :  { %2590 = vtanh.f32 %v2078_v61 }
 0x8a0   :  { %2592 = vtanh.f32 %v2067_v40 }
 0x8a1   :  { %2594 = vtanh.f32 %v2087_v7 }
 0x8a2   :  { %2596 = vtanh.f32 %v2088_v9 }
 0x8a5   :  { %v2583_v31 = vpop.eup %2582 }
 0x8a6   :  { %v2585_v16 = vpop.eup %2584  ;;  %v2073_v21 = vadd.f32 1.0, %v2583_v31 }
 0x8a7   :  { %v2081_v49 = vadd.f32 1.0, %v2585_v16  ;;  %v2587_v11 = vpop.eup %2586 }
 0x8a8   :  { %v2075_v57 = vmul.f32 0.5, %v2073_v21  ;;  %v2589_v45 = vpop.eup %2588  ;;  %v2074_v46 = vadd.f32 1.0, %v2587_v11 }
 0x8a9   :  { %v2083_v34 = vmul.f32 0.5, %v2081_v49  ;;  %v2591_v42 = vpop.eup %2590 }
 0x8aa   :  { %v2097_v50 = vmul.f32 %v2589_v45, %v2075_v57  ;;  %v2076_v48 = vmul.f32 0.5, %v2074_v46  ;;  %v2082_v58 = vadd.f32 1.0, %v2591_v42  ;;  %v2593_v47 = vpop.eup %2592 }
 0x8ab   :  { %v2095_v33 = vmul.f32 %v2083_v34, %v3647_v20  ;;  %v2595_v51 = vpop.eup %2594 }
 0x8ac   :  { %v2084_v44 = vmul.f32 0.5, %v2082_v58  ;;  %v2098_v12 = vmul.f32 %v2593_v47, %v2076_v48  ;;  %v2091_v24 = vadd.f32 1.0, %v2595_v51  ;;  %v2597_v22 = vpop.eup %2596 }
 0x8ad   :  { %v2099_v53 = vadd.f32 %v2097_v50, %v2095_v33  ;;  %v2092_v13 = vadd.f32 1.0, %v2597_v22 }
 0x8ae   :  { %v2096_v59 = vmul.f32 %v2084_v44, %v3651_v56  ;;  %v2093_v0 = vmul.f32 0.5, %v2091_v24 }
 0x8af   :  { %2598 = vtanh.f32 %v2099_v53  ;;  %2125 = vst [vmem:[#allocation19] sm:$0xff] %v2099_v53  ;;  %v2094_v14 = vmul.f32 0.5, %v2092_v13 }
 0x8b0   :  { %v2100_v54 = vadd.f32 %v2098_v12, %v2096_v59 }
 0x8b2   :  { %2600 = vtanh.f32 %v2100_v54  ;;  %2126 = vst [vmem:[#allocation19 + $0x8] sm:$0xff] %v2100_v54 }
 0x8b9   :  { %v2599_v20 = vpop.eup %2598 }
 0x8ba   :  { %v2103_v23 = vmul.f32 %v2599_v20, %v2093_v0 }
 0x8bc   :  { %2123 = vst [vmem:[#allocation17] sm:$0xff] %v2103_v23  ;;  %v2601_v18 = vpop.eup %2600 }
 0x8bd   :  { %v2104_v56 = vmul.f32 %v2601_v18, %v2094_v14 }
 0x8bf   :  { %v2320_v55 = vpack.c.bf16 %v2104_v56, %v2103_v23  ;;  %2124 = vst [vmem:[#allocation17 + $0x8] sm:$0xff] %v2104_v56 }
 0x8c0   :  { %2777 = shalt.err (!%p2774_p10)
}
 0x8c1   :  { %s2778_s24 = scalar_lea.hbm %s3730_s7, 256 }
 0x8c2   :  { %p2779_p11 = scmp.ne.s32.totalorder %s3730_s7, %s2778_s24  ;;  %p2782_p12 = scmp.lt.u32.totalorder %s2778_s24, %s3730_s7 }
 0x8c4   :  { %p2784_p13 = pnand %p2782_p12, %p2779_p11 }
 0x8c6   :  { %2787 = shalt.err (!%p2784_p13)
}
 0x8c7   :  { %2150 = dma.vmem_to_hbm [thread:$0]  %s2145_s12, 256, %s3730_s7, [#allocation18], %s2853_s2, %s2853_s2, %s2854_s15   ;;  %2321 = vst [vmem:[#allocation16 + $0x38] sm:$0xff] %v2320_v55  }
 0x8c8   :  { %s2788_s28 = scalar_lea.vmem %s3664_s14, 256  ;;  %p2793_p1 = scmp.lt.s32.totalorder %s3664_s14, %s3664_s14 }
 0x8c9   :  { %p2789_p0 = scmp.ne.s32.totalorder %s3664_s14, %s2788_s28  ;;  %p2794_p2 = scmp.lt.s32.totalorder %s2788_s28, %s2788_s28 }
 0x8cb   :  { %p2795_p3 = por %p2794_p2, %p2793_p1 }
 0x8cd   :  { %p2796_p4 = pnand %p2795_p3, %p2789_p0 }
 0x8cf   :  { %2799 = shalt.err (!%p2796_p4)
}
 0x8d0   :  { %s2800_s11 = scalar_lea.hbm %s3731_s8, 256 }
 0x8d1   :  { %p2801_p5 = scmp.ne.s32.totalorder %s3731_s8, %s2800_s11  ;;  %p2804_p6 = scmp.lt.u32.totalorder %s2800_s11, %s3731_s8 }
 0x8d3   :  { %p2806_p7 = pnand %p2804_p6, %p2801_p5 }
 0x8d5   :  { %2809 = shalt.err (!%p2806_p7)
}
 0x8d6   :  { %2162 = dma.vmem_to_hbm [thread:$0]  %s3664_s14, 256, %s3731_s8, [#allocation18], %s2853_s2, %s2853_s2, %s2854_s15  }
 0x8d7   :  { %s2810_s12 = scalar_lea.vmem %s3666_s18, 1024  ;;  %p2815_p9 = scmp.lt.s32.totalorder %s3666_s18, %s3666_s18 }
 0x8d8   :  { %p2811_p8 = scmp.ne.s32.totalorder %s3666_s18, %s2810_s12  ;;  %p2816_p10 = scmp.lt.s32.totalorder %s2810_s12, %s2810_s12 }
 0x8da   :  { %p2817_p11 = por %p2816_p10, %p2815_p9 }
 0x8dc   :  { %p2818_p12 = pnand %p2817_p11, %p2811_p8 }
 0x8de   :  { %2821 = shalt.err (!%p2818_p12)
}
 0x8df   :  { %s2822_s19 = scalar_lea.hbm %s3729_s6, 1024 }
 0x8e0   :  { %p2823_p13 = scmp.ne.s32.totalorder %s3729_s6, %s2822_s19  ;;  %p2826_p0 = scmp.lt.u32.totalorder %s2822_s19, %s3729_s6 }
 0x8e2   :  { %p2828_p1 = pnand %p2826_p0, %p2823_p13 }
 0x8e4   :  { %2831 = shalt.err (!%p2828_p1)
}
 0x8e5   :  { %2138 = dma.vmem_to_hbm [thread:$0]  %s3666_s18, 1024, %s3729_s6, [#allocation7], %s2849_s3, %s2849_s3, %s2850_s20  }
 0x8e6   :  { %2840 = dma.done.wait [#allocation7], 1024  }
 0x8e7   :  { %2841 = vsyncadd [#allocation7], 4294966272 }
 0x8e8   :  { %2842 = dma.done.wait [#allocation18], 512  }
 0x8e9   :  { %2843 = vsyncadd [#allocation18], 4294966784 }
 0x8ea   :  { %2172 = vsyncpa [#allocation6], 1 }
 0x8eb   :  { %2173 = vsyncpa [#allocation9], 1 }
 0x8ec   :  { %2174 = vsyncpa [#allocation12], 1 }
 0x8ed   :  { %2175 = vsyncpa [#allocation15], 1 }
 0x8ee   :  { %2176 = vsyncpa [#allocation7], 1 }
 0x8ef   :  { %2177 = vsyncpa [#allocation18], 1 }

</bundles_post_ra>
